<compile_context>
chip_gen: v5e
topology: v5e:2x2
jax: 0.10.0
libtpu: 0.0.40
codegen_flags: <defaults>
</compile_context>

<pallas_src>
import jax
import jax.numpy as jnp
from jax.experimental import pallas as pl
from jax.experimental.pallas import tpu as pltpu

IMG_SIZE = 28
N_IN = IMG_SIZE       # input feature size per time step
N_MID = 256           # RNN hidden size
N_OUT = IMG_SIZE      # fc output size
N_OUT_PAD = 128       # fc output padded to one full lane tile


def _round_up(x, m):
    return ((x + m - 1) // m) * m


def rnn_fc_kernel(x_ref, w_ih_ref, w_hh_ref, b_h_ref, w_fc_ref, b_fc_ref,
                  out_ref, xw_ref):
    """Forward pass for one batch block.

    x_ref:    (T, Bb, N_IN)      time-major rows for this batch block
    w_ih_ref: (N_IN, N_MID)      = W_ih^T           (compute dtype)
    w_hh_ref: (N_MID, N_MID)     = W_hh^T           (compute dtype)
    b_h_ref:  (1, N_MID)         = b_ih + b_hh      (f32)
    w_fc_ref: (N_MID, N_OUT_PAD) = W_fc^T lane-padded (compute dtype)
    b_fc_ref: (1, N_OUT_PAD)     lane-padded        (f32)
    out_ref:  (Bb, N_OUT_PAD)
    xw_ref:   (T*Bb, N_MID) f32 scratch: hoisted input projection
    """
    t_steps, bb, n_in = x_ref.shape
    cdt = w_hh_ref.dtype                       # compute dtype (bf16 or f32)

    # Hoisted: input projection + fused bias for ALL timesteps in one matmul
    # (off the serial critical path).  Leading-dim merge (T, Bb) -> T*Bb is
    # layout-free: bb is a sublane multiple and N_IN is the lane dim.
    x_all = x_ref[...].reshape(t_steps * bb, n_in)
    xw_ref[...] = (
        jnp.dot(x_all, w_ih_ref[...], preferred_element_type=jnp.float32)
        + b_h_ref[...])

    # Peeled t = 0: h0 == 0  =>  h1 = tanh(xw[0]) (no h@W_hh matmul needed).
    # h is carried in the compute dtype to keep vreg pressure low.
    h = jnp.tanh(xw_ref[pl.ds(0, bb), :]).astype(cdt)

    # Fully unrolled serial recurrence (t_steps is static); h stays in vregs.
    for t in range(1, t_steps):
        pre = xw_ref[pl.ds(t * bb, bb), :] + jnp.dot(
            h, w_hh_ref[...], preferred_element_type=jnp.float32)
        h = jnp.tanh(pre).astype(cdt)

    # Final linear layer on h_T (lane-padded output; wrapper slices to N_OUT).
    y = jnp.dot(h.astype(w_fc_ref.dtype), w_fc_ref[...],
                preferred_element_type=jnp.float32) + b_fc_ref[...]
    out_ref[...] = y.astype(out_ref.dtype)


def net_forward(x, params, *, compute_dtype=jnp.bfloat16, block_b=None):
    """x: (B, T, N_IN) batch-first, like the PyTorch module. Returns (B, N_OUT) f32."""
    w_ih, w_hh, b_ih, b_hh, w_fc, b_fc = params
    B, T, _ = x.shape
    cdt = jnp.dtype(compute_dtype)

    if block_b is None:
        # Spill-free cap for the fully-unrolled recurrence: 128 rows with a
        # bf16-carried h, 64 rows on the exact f32 path.
        cap = 128 if cdt.itemsize <= 2 else 64
        if B >= 16:
            # >= 2 batch blocks so the "parallel" axis can use both v7x TCs.
            block_b = _round_up(-(-B // 2), 8)
        else:
            block_b = _round_up(B, 8)
        block_b = min(block_b, cap)
    B_pad = _round_up(B, block_b)
    nb = B_pad // block_b

    if B_pad != B:
        x = jnp.pad(x, ((0, B_pad - B), (0, 0), (0, 0)))

    # Time-major only; per-block (T, block_b, N_IN) tile is rectangular and
    # directly DMA-able (no blocked reshuffle copy in HBM).
    x_tm = jnp.transpose(x, (1, 0, 2)).astype(cdt)             # (T, B_pad, N_IN)

    w_ih_t = w_ih.T.astype(cdt)                                # (N_IN, N_MID)
    w_hh_t = w_hh.T.astype(cdt)                                # (N_MID, N_MID)
    b_h = (b_ih + b_hh).reshape(1, N_MID).astype(jnp.float32)
    w_fc_t = (jnp.zeros((N_MID, N_OUT_PAD), jnp.float32)
                 .at[:, :N_OUT].set(w_fc.T)
                 .astype(cdt))                                 # (N_MID, 128)
    b_fc_p = jnp.zeros((1, N_OUT_PAD), jnp.float32).at[:, :N_OUT].set(b_fc)

    full = lambda b: (0, 0)
    out = pl.pallas_call(
        rnn_fc_kernel,
        out_shape=jax.ShapeDtypeStruct((B_pad, N_OUT_PAD), jnp.float32),
        grid=(nb,),
        in_specs=[
            pl.BlockSpec((T, block_b, N_IN), lambda b: (0, b, 0)),
            pl.BlockSpec((N_IN, N_MID), full),
            pl.BlockSpec((N_MID, N_MID), full),
            pl.BlockSpec((1, N_MID), full),
            pl.BlockSpec((N_MID, N_OUT_PAD), full),
            pl.BlockSpec((1, N_OUT_PAD), full),
        ],
        out_specs=pl.BlockSpec((block_b, N_OUT_PAD), lambda b: (b, 0)),
        scratch_shapes=[pltpu.VMEM((T * block_b, N_MID), jnp.float32)],
        compiler_params=pltpu.CompilerParams(
            dimension_semantics=("parallel",)),
    )(x_tm, w_ih_t, w_hh_t, b_h, w_fc_t, b_fc_p)

    return out[:B, :N_OUT]


def net_forward_ref(x, params):
    """Pure-JAX reference matching torch.nn.RNN + Linear semantics."""
    w_ih, w_hh, b_ih, b_hh, w_fc, b_fc = params
    B, T, _ = x.shape
    h = jnp.zeros((B, N_MID), jnp.float32)
    for t in range(T):
        h = jnp.tanh(x[:, t, :] @ w_ih.T + b_ih + h @ w_hh.T + b_hh)
    return h @ w_fc.T + b_fc


def init_params(key):
    """Deterministic init, same shapes as the PyTorch module's parameters."""
    k = jax.random.split(key, 6)
    s_rnn = 1.0 / jnp.sqrt(N_MID)
    s_fc = 1.0 / jnp.sqrt(N_MID)
    w_ih = jax.random.uniform(k[0], (N_MID, N_IN), jnp.float32, -s_rnn, s_rnn)
    w_hh = jax.random.uniform(k[1], (N_MID, N_MID), jnp.float32, -s_rnn, s_rnn)
    b_ih = jax.random.uniform(k[2], (N_MID,), jnp.float32, -s_rnn, s_rnn)
    b_hh = jax.random.uniform(k[3], (N_MID,), jnp.float32, -s_rnn, s_rnn)
    w_fc = jax.random.uniform(k[4], (N_OUT, N_MID), jnp.float32, -s_fc, s_fc)
    b_fc = jax.random.uniform(k[5], (N_OUT,), jnp.float32, -s_fc, s_fc)
    return (w_ih, w_hh, b_ih, b_hh, w_fc, b_fc)


if __name__ == "__main__":
    key = jax.random.PRNGKey(0)
    k_p, k_x = jax.random.split(key)
    params = init_params(k_p)

    B, T = 8, IMG_SIZE               # 8 sequences of 28 "rows" of 28 features
    x = jax.random.normal(k_x, (B, T, N_IN), jnp.float32)

    y_ref = net_forward_ref(x, params)

    # Exact-semantics f32 path.
    y_f32 = jax.block_until_ready(
        net_forward(x, params, compute_dtype=jnp.float32))
    assert y_f32.shape == (B, N_OUT)
    assert jnp.allclose(y_f32, y_ref, atol=1e-4, rtol=1e-4), (
        f"f32 max abs err {jnp.max(jnp.abs(y_f32 - y_ref))}")

    # Default bf16 path (MXU-native on v6e/v7x), f32 accumulation; looser
    # tolerance since the recurrence weights/state are bf16.
    y = jax.block_until_ready(net_forward(x, params))
    assert y.shape == (B, N_OUT)
    assert bool(jnp.all(jnp.isfinite(y)))
    assert float(jnp.max(jnp.abs(y - y_ref))) < 0.1, (
        f"bf16 max abs err {jnp.max(jnp.abs(y - y_ref))}")

    print("KERNEL_OK")
</pallas_src>

<mosaic_0001>
module attributes {stable_mosaic.version = 11 : i64} {
  func.func @rnn_fc_kernel(%arg0: i32, %arg1: memref<28x8x28xf32, #tpu.memory_space<vmem>>, %arg2: memref<28x256xf32, #tpu.memory_space<vmem>>, %arg3: memref<256x256xf32, #tpu.memory_space<vmem>>, %arg4: memref<1x256xf32, #tpu.memory_space<vmem>>, %arg5: memref<256x128xf32, #tpu.memory_space<vmem>>, %arg6: memref<1x128xf32, #tpu.memory_space<vmem>>, %arg7: memref<8x128xf32, #tpu.memory_space<vmem>>, %arg8: memref<224x256xf32, #tpu.memory_space<vmem>>) attributes {dimension_semantics = [#tpu.dimension_semantics<parallel>], iteration_bounds = array<i64: 1>, scalar_prefetch = 0 : i64, scratch_operands = 1 : i64, tpu.core_type = #tpu.core_type<tc>, window_params = [{transform_indices = @transform_0, window_bounds = array<i64: 28, 8, 28>}, {pipeline_mode = #tpu.pipeline_mode<synchronous>, transform_indices = @transform_1, window_bounds = array<i64: 28, 256>}, {pipeline_mode = #tpu.pipeline_mode<synchronous>, transform_indices = @transform_2, window_bounds = array<i64: 256, 256>}, {pipeline_mode = #tpu.pipeline_mode<synchronous>, transform_indices = @transform_3, window_bounds = array<i64: 1, 256>}, {pipeline_mode = #tpu.pipeline_mode<synchronous>, transform_indices = @transform_4, window_bounds = array<i64: 256, 128>}, {pipeline_mode = #tpu.pipeline_mode<synchronous>, transform_indices = @transform_5, window_bounds = array<i64: 1, 128>}, {transform_indices = @transform_6, window_bounds = array<i64: 8, 128>}]} {
    %c0 = arith.constant 0 : index
    %c0_0 = arith.constant 0 : index
    %c0_1 = arith.constant 0 : index
    %0 = vector.load %arg1[%c0, %c0_0, %c0_1] : memref<28x8x28xf32, #tpu.memory_space<vmem>>, vector<28x8x28xf32>
    %1 = vector.shape_cast %0 : vector<28x8x28xf32> to vector<224x28xf32>
    %c0_2 = arith.constant 0 : index
    %c0_3 = arith.constant 0 : index
    %2 = vector.load %arg2[%c0_2, %c0_3] : memref<28x256xf32, #tpu.memory_space<vmem>>, vector<28x256xf32>
    %cst = arith.constant dense<0.000000e+00> : vector<224x256xf32>
    %3 = tpu.matmul %1, %2, %cst {dimension_numbers = #tpu.dot_dimension_numbers<[1], [0], [0], [1], [0, 0, 1, 1], [], []>} : vector<224x28xf32>, vector<28x256xf32>, vector<224x256xf32> -> vector<224x256xf32>
    %c0_4 = arith.constant 0 : index
    %c0_5 = arith.constant 0 : index
    %4 = vector.load %arg4[%c0_4, %c0_5] : memref<1x256xf32, #tpu.memory_space<vmem>>, vector<1x256xf32>
    %5 = vector.broadcast %4 : vector<1x256xf32> to vector<224x256xf32>
    %6 = arith.addf %3, %5 : vector<224x256xf32>
    %c0_6 = arith.constant 0 : index
    %c0_7 = arith.constant 0 : index
    %7 = vector.load %arg8[%c0_6, %c0_7] : memref<224x256xf32, #tpu.memory_space<vmem>>, vector<224x256xf32>
    tpu.vector_store %arg8[%c0_6, %c0_7], %6 {strides = array<i32>} : memref<224x256xf32, #tpu.memory_space<vmem>>, vector<224x256xf32>,
    %c0_8 = arith.constant 0 : index
    %c0_9 = arith.constant 0 : index
    %8 = vector.load %arg8[%c0_8, %c0_9] : memref<224x256xf32, #tpu.memory_space<vmem>>, vector<8x256xf32>
    %9 = math.tanh %8 : vector<8x256xf32>
    %c8 = arith.constant 8 : index
    %c0_10 = arith.constant 0 : index
    %10 = vector.load %arg8[%c8, %c0_10] : memref<224x256xf32, #tpu.memory_space<vmem>>, vector<8x256xf32>
    %c0_11 = arith.constant 0 : index
    %c0_12 = arith.constant 0 : index
    %11 = vector.load %arg3[%c0_11, %c0_12] : memref<256x256xf32, #tpu.memory_space<vmem>>, vector<256x256xf32>
    %cst_13 = arith.constant dense<0.000000e+00> : vector<8x256xf32>
    %12 = tpu.matmul %9, %11, %cst_13 {dimension_numbers = #tpu.dot_dimension_numbers<[1], [0], [0], [1], [0, 0, 1, 1], [], []>} : vector<8x256xf32>, vector<256x256xf32>, vector<8x256xf32> -> vector<8x256xf32>
    %13 = arith.addf %10, %12 : vector<8x256xf32>
    %14 = math.tanh %13 : vector<8x256xf32>
    %c16 = arith.constant 16 : index
    %c0_14 = arith.constant 0 : index
    %15 = vector.load %arg8[%c16, %c0_14] : memref<224x256xf32, #tpu.memory_space<vmem>>, vector<8x256xf32>
    %c0_15 = arith.constant 0 : index
    %c0_16 = arith.constant 0 : index
    %16 = vector.load %arg3[%c0_15, %c0_16] : memref<256x256xf32, #tpu.memory_space<vmem>>, vector<256x256xf32>
    %cst_17 = arith.constant dense<0.000000e+00> : vector<8x256xf32>
    %17 = tpu.matmul %14, %16, %cst_17 {dimension_numbers = #tpu.dot_dimension_numbers<[1], [0], [0], [1], [0, 0, 1, 1], [], []>} : vector<8x256xf32>, vector<256x256xf32>, vector<8x256xf32> -> vector<8x256xf32>
    %18 = arith.addf %15, %17 : vector<8x256xf32>
    %19 = math.tanh %18 : vector<8x256xf32>
    %c24 = arith.constant 24 : index
    %c0_18 = arith.constant 0 : index
    %20 = vector.load %arg8[%c24, %c0_18] : memref<224x256xf32, #tpu.memory_space<vmem>>, vector<8x256xf32>
    %c0_19 = arith.constant 0 : index
    %c0_20 = arith.constant 0 : index
    %21 = vector.load %arg3[%c0_19, %c0_20] : memref<256x256xf32, #tpu.memory_space<vmem>>, vector<256x256xf32>
    %cst_21 = arith.constant dense<0.000000e+00> : vector<8x256xf32>
    %22 = tpu.matmul %19, %21, %cst_21 {dimension_numbers = #tpu.dot_dimension_numbers<[1], [0], [0], [1], [0, 0, 1, 1], [], []>} : vector<8x256xf32>, vector<256x256xf32>, vector<8x256xf32> -> vector<8x256xf32>
    %23 = arith.addf %20, %22 : vector<8x256xf32>
    %24 = math.tanh %23 : vector<8x256xf32>
    %c32 = arith.constant 32 : index
    %c0_22 = arith.constant 0 : index
    %25 = vector.load %arg8[%c32, %c0_22] : memref<224x256xf32, #tpu.memory_space<vmem>>, vector<8x256xf32>
    %c0_23 = arith.constant 0 : index
    %c0_24 = arith.constant 0 : index
    %26 = vector.load %arg3[%c0_23, %c0_24] : memref<256x256xf32, #tpu.memory_space<vmem>>, vector<256x256xf32>
    %cst_25 = arith.constant dense<0.000000e+00> : vector<8x256xf32>
    %27 = tpu.matmul %24, %26, %cst_25 {dimension_numbers = #tpu.dot_dimension_numbers<[1], [0], [0], [1], [0, 0, 1, 1], [], []>} : vector<8x256xf32>, vector<256x256xf32>, vector<8x256xf32> -> vector<8x256xf32>
    %28 = arith.addf %25, %27 : vector<8x256xf32>
    %29 = math.tanh %28 : vector<8x256xf32>
    %c40 = arith.constant 40 : index
    %c0_26 = arith.constant 0 : index
    %30 = vector.load %arg8[%c40, %c0_26] : memref<224x256xf32, #tpu.memory_space<vmem>>, vector<8x256xf32>
    %c0_27 = arith.constant 0 : index
    %c0_28 = arith.constant 0 : index
    %31 = vector.load %arg3[%c0_27, %c0_28] : memref<256x256xf32, #tpu.memory_space<vmem>>, vector<256x256xf32>
    %cst_29 = arith.constant dense<0.000000e+00> : vector<8x256xf32>
    %32 = tpu.matmul %29, %31, %cst_29 {dimension_numbers = #tpu.dot_dimension_numbers<[1], [0], [0], [1], [0, 0, 1, 1], [], []>} : vector<8x256xf32>, vector<256x256xf32>, vector<8x256xf32> -> vector<8x256xf32>
    %33 = arith.addf %30, %32 : vector<8x256xf32>
    %34 = math.tanh %33 : vector<8x256xf32>
    %c48 = arith.constant 48 : index
    %c0_30 = arith.constant 0 : index
    %35 = vector.load %arg8[%c48, %c0_30] : memref<224x256xf32, #tpu.memory_space<vmem>>, vector<8x256xf32>
    %c0_31 = arith.constant 0 : index
    %c0_32 = arith.constant 0 : index
    %36 = vector.load %arg3[%c0_31, %c0_32] : memref<256x256xf32, #tpu.memory_space<vmem>>, vector<256x256xf32>
    %cst_33 = arith.constant dense<0.000000e+00> : vector<8x256xf32>
    %37 = tpu.matmul %34, %36, %cst_33 {dimension_numbers = #tpu.dot_dimension_numbers<[1], [0], [0], [1], [0, 0, 1, 1], [], []>} : vector<8x256xf32>, vector<256x256xf32>, vector<8x256xf32> -> vector<8x256xf32>
    %38 = arith.addf %35, %37 : vector<8x256xf32>
    %39 = math.tanh %38 : vector<8x256xf32>
    %c56 = arith.constant 56 : index
    %c0_34 = arith.constant 0 : index
    %40 = vector.load %arg8[%c56, %c0_34] : memref<224x256xf32, #tpu.memory_space<vmem>>, vector<8x256xf32>
    %c0_35 = arith.constant 0 : index
    %c0_36 = arith.constant 0 : index
    %41 = vector.load %arg3[%c0_35, %c0_36] : memref<256x256xf32, #tpu.memory_space<vmem>>, vector<256x256xf32>
    %cst_37 = arith.constant dense<0.000000e+00> : vector<8x256xf32>
    %42 = tpu.matmul %39, %41, %cst_37 {dimension_numbers = #tpu.dot_dimension_numbers<[1], [0], [0], [1], [0, 0, 1, 1], [], []>} : vector<8x256xf32>, vector<256x256xf32>, vector<8x256xf32> -> vector<8x256xf32>
    %43 = arith.addf %40, %42 : vector<8x256xf32>
    %44 = math.tanh %43 : vector<8x256xf32>
    %c64 = arith.constant 64 : index
    %c0_38 = arith.constant 0 : index
    %45 = vector.load %arg8[%c64, %c0_38] : memref<224x256xf32, #tpu.memory_space<vmem>>, vector<8x256xf32>
    %c0_39 = arith.constant 0 : index
    %c0_40 = arith.constant 0 : index
    %46 = vector.load %arg3[%c0_39, %c0_40] : memref<256x256xf32, #tpu.memory_space<vmem>>, vector<256x256xf32>
    %cst_41 = arith.constant dense<0.000000e+00> : vector<8x256xf32>
    %47 = tpu.matmul %44, %46, %cst_41 {dimension_numbers = #tpu.dot_dimension_numbers<[1], [0], [0], [1], [0, 0, 1, 1], [], []>} : vector<8x256xf32>, vector<256x256xf32>, vector<8x256xf32> -> vector<8x256xf32>
    %48 = arith.addf %45, %47 : vector<8x256xf32>
    %49 = math.tanh %48 : vector<8x256xf32>
    %c72 = arith.constant 72 : index
    %c0_42 = arith.constant 0 : index
    %50 = vector.load %arg8[%c72, %c0_42] : memref<224x256xf32, #tpu.memory_space<vmem>>, vector<8x256xf32>
    %c0_43 = arith.constant 0 : index
    %c0_44 = arith.constant 0 : index
    %51 = vector.load %arg3[%c0_43, %c0_44] : memref<256x256xf32, #tpu.memory_space<vmem>>, vector<256x256xf32>
    %cst_45 = arith.constant dense<0.000000e+00> : vector<8x256xf32>
    %52 = tpu.matmul %49, %51, %cst_45 {dimension_numbers = #tpu.dot_dimension_numbers<[1], [0], [0], [1], [0, 0, 1, 1], [], []>} : vector<8x256xf32>, vector<256x256xf32>, vector<8x256xf32> -> vector<8x256xf32>
    %53 = arith.addf %50, %52 : vector<8x256xf32>
    %54 = math.tanh %53 : vector<8x256xf32>
    %c80 = arith.constant 80 : index
    %c0_46 = arith.constant 0 : index
    %55 = vector.load %arg8[%c80, %c0_46] : memref<224x256xf32, #tpu.memory_space<vmem>>, vector<8x256xf32>
    %c0_47 = arith.constant 0 : index
    %c0_48 = arith.constant 0 : index
    %56 = vector.load %arg3[%c0_47, %c0_48] : memref<256x256xf32, #tpu.memory_space<vmem>>, vector<256x256xf32>
    %cst_49 = arith.constant dense<0.000000e+00> : vector<8x256xf32>
    %57 = tpu.matmul %54, %56, %cst_49 {dimension_numbers = #tpu.dot_dimension_numbers<[1], [0], [0], [1], [0, 0, 1, 1], [], []>} : vector<8x256xf32>, vector<256x256xf32>, vector<8x256xf32> -> vector<8x256xf32>
    %58 = arith.addf %55, %57 : vector<8x256xf32>
    %59 = math.tanh %58 : vector<8x256xf32>
    %c88 = arith.constant 88 : index
    %c0_50 = arith.constant 0 : index
    %60 = vector.load %arg8[%c88, %c0_50] : memref<224x256xf32, #tpu.memory_space<vmem>>, vector<8x256xf32>
    %c0_51 = arith.constant 0 : index
    %c0_52 = arith.constant 0 : index
    %61 = vector.load %arg3[%c0_51, %c0_52] : memref<256x256xf32, #tpu.memory_space<vmem>>, vector<256x256xf32>
    %cst_53 = arith.constant dense<0.000000e+00> : vector<8x256xf32>
    %62 = tpu.matmul %59, %61, %cst_53 {dimension_numbers = #tpu.dot_dimension_numbers<[1], [0], [0], [1], [0, 0, 1, 1], [], []>} : vector<8x256xf32>, vector<256x256xf32>, vector<8x256xf32> -> vector<8x256xf32>
    %63 = arith.addf %60, %62 : vector<8x256xf32>
    %64 = math.tanh %63 : vector<8x256xf32>
    %c96 = arith.constant 96 : index
    %c0_54 = arith.constant 0 : index
    %65 = vector.load %arg8[%c96, %c0_54] : memref<224x256xf32, #tpu.memory_space<vmem>>, vector<8x256xf32>
    %c0_55 = arith.constant 0 : index
    %c0_56 = arith.constant 0 : index
    %66 = vector.load %arg3[%c0_55, %c0_56] : memref<256x256xf32, #tpu.memory_space<vmem>>, vector<256x256xf32>
    %cst_57 = arith.constant dense<0.000000e+00> : vector<8x256xf32>
    %67 = tpu.matmul %64, %66, %cst_57 {dimension_numbers = #tpu.dot_dimension_numbers<[1], [0], [0], [1], [0, 0, 1, 1], [], []>} : vector<8x256xf32>, vector<256x256xf32>, vector<8x256xf32> -> vector<8x256xf32>
    %68 = arith.addf %65, %67 : vector<8x256xf32>
    %69 = math.tanh %68 : vector<8x256xf32>
    %c104 = arith.constant 104 : index
    %c0_58 = arith.constant 0 : index
    %70 = vector.load %arg8[%c104, %c0_58] : memref<224x256xf32, #tpu.memory_space<vmem>>, vector<8x256xf32>
    %c0_59 = arith.constant 0 : index
    %c0_60 = arith.constant 0 : index
    %71 = vector.load %arg3[%c0_59, %c0_60] : memref<256x256xf32, #tpu.memory_space<vmem>>, vector<256x256xf32>
    %cst_61 = arith.constant dense<0.000000e+00> : vector<8x256xf32>
    %72 = tpu.matmul %69, %71, %cst_61 {dimension_numbers = #tpu.dot_dimension_numbers<[1], [0], [0], [1], [0, 0, 1, 1], [], []>} : vector<8x256xf32>, vector<256x256xf32>, vector<8x256xf32> -> vector<8x256xf32>
    %73 = arith.addf %70, %72 : vector<8x256xf32>
    %74 = math.tanh %73 : vector<8x256xf32>
    %c112 = arith.constant 112 : index
    %c0_62 = arith.constant 0 : index
    %75 = vector.load %arg8[%c112, %c0_62] : memref<224x256xf32, #tpu.memory_space<vmem>>, vector<8x256xf32>
    %c0_63 = arith.constant 0 : index
    %c0_64 = arith.constant 0 : index
    %76 = vector.load %arg3[%c0_63, %c0_64] : memref<256x256xf32, #tpu.memory_space<vmem>>, vector<256x256xf32>
    %cst_65 = arith.constant dense<0.000000e+00> : vector<8x256xf32>
    %77 = tpu.matmul %74, %76, %cst_65 {dimension_numbers = #tpu.dot_dimension_numbers<[1], [0], [0], [1], [0, 0, 1, 1], [], []>} : vector<8x256xf32>, vector<256x256xf32>, vector<8x256xf32> -> vector<8x256xf32>
    %78 = arith.addf %75, %77 : vector<8x256xf32>
    %79 = math.tanh %78 : vector<8x256xf32>
    %c120 = arith.constant 120 : index
    %c0_66 = arith.constant 0 : index
    %80 = vector.load %arg8[%c120, %c0_66] : memref<224x256xf32, #tpu.memory_space<vmem>>, vector<8x256xf32>
    %c0_67 = arith.constant 0 : index
    %c0_68 = arith.constant 0 : index
    %81 = vector.load %arg3[%c0_67, %c0_68] : memref<256x256xf32, #tpu.memory_space<vmem>>, vector<256x256xf32>
    %cst_69 = arith.constant dense<0.000000e+00> : vector<8x256xf32>
    %82 = tpu.matmul %79, %81, %cst_69 {dimension_numbers = #tpu.dot_dimension_numbers<[1], [0], [0], [1], [0, 0, 1, 1], [], []>} : vector<8x256xf32>, vector<256x256xf32>, vector<8x256xf32> -> vector<8x256xf32>
    %83 = arith.addf %80, %82 : vector<8x256xf32>
    %84 = math.tanh %83 : vector<8x256xf32>
    %c128 = arith.constant 128 : index
    %c0_70 = arith.constant 0 : index
    %85 = vector.load %arg8[%c128, %c0_70] : memref<224x256xf32, #tpu.memory_space<vmem>>, vector<8x256xf32>
    %c0_71 = arith.constant 0 : index
    %c0_72 = arith.constant 0 : index
    %86 = vector.load %arg3[%c0_71, %c0_72] : memref<256x256xf32, #tpu.memory_space<vmem>>, vector<256x256xf32>
    %cst_73 = arith.constant dense<0.000000e+00> : vector<8x256xf32>
    %87 = tpu.matmul %84, %86, %cst_73 {dimension_numbers = #tpu.dot_dimension_numbers<[1], [0], [0], [1], [0, 0, 1, 1], [], []>} : vector<8x256xf32>, vector<256x256xf32>, vector<8x256xf32> -> vector<8x256xf32>
    %88 = arith.addf %85, %87 : vector<8x256xf32>
    %89 = math.tanh %88 : vector<8x256xf32>
    %c136 = arith.constant 136 : index
    %c0_74 = arith.constant 0 : index
    %90 = vector.load %arg8[%c136, %c0_74] : memref<224x256xf32, #tpu.memory_space<vmem>>, vector<8x256xf32>
    %c0_75 = arith.constant 0 : index
    %c0_76 = arith.constant 0 : index
    %91 = vector.load %arg3[%c0_75, %c0_76] : memref<256x256xf32, #tpu.memory_space<vmem>>, vector<256x256xf32>
    %cst_77 = arith.constant dense<0.000000e+00> : vector<8x256xf32>
    %92 = tpu.matmul %89, %91, %cst_77 {dimension_numbers = #tpu.dot_dimension_numbers<[1], [0], [0], [1], [0, 0, 1, 1], [], []>} : vector<8x256xf32>, vector<256x256xf32>, vector<8x256xf32> -> vector<8x256xf32>
    %93 = arith.addf %90, %92 : vector<8x256xf32>
    %94 = math.tanh %93 : vector<8x256xf32>
    %c144 = arith.constant 144 : index
    %c0_78 = arith.constant 0 : index
    %95 = vector.load %arg8[%c144, %c0_78] : memref<224x256xf32, #tpu.memory_space<vmem>>, vector<8x256xf32>
    %c0_79 = arith.constant 0 : index
    %c0_80 = arith.constant 0 : index
    %96 = vector.load %arg3[%c0_79, %c0_80] : memref<256x256xf32, #tpu.memory_space<vmem>>, vector<256x256xf32>
    %cst_81 = arith.constant dense<0.000000e+00> : vector<8x256xf32>
    %97 = tpu.matmul %94, %96, %cst_81 {dimension_numbers = #tpu.dot_dimension_numbers<[1], [0], [0], [1], [0, 0, 1, 1], [], []>} : vector<8x256xf32>, vector<256x256xf32>, vector<8x256xf32> -> vector<8x256xf32>
    %98 = arith.addf %95, %97 : vector<8x256xf32>
    %99 = math.tanh %98 : vector<8x256xf32>
    %c152 = arith.constant 152 : index
    %c0_82 = arith.constant 0 : index
    %100 = vector.load %arg8[%c152, %c0_82] : memref<224x256xf32, #tpu.memory_space<vmem>>, vector<8x256xf32>
    %c0_83 = arith.constant 0 : index
    %c0_84 = arith.constant 0 : index
    %101 = vector.load %arg3[%c0_83, %c0_84] : memref<256x256xf32, #tpu.memory_space<vmem>>, vector<256x256xf32>
    %cst_85 = arith.constant dense<0.000000e+00> : vector<8x256xf32>
    %102 = tpu.matmul %99, %101, %cst_85 {dimension_numbers = #tpu.dot_dimension_numbers<[1], [0], [0], [1], [0, 0, 1, 1], [], []>} : vector<8x256xf32>, vector<256x256xf32>, vector<8x256xf32> -> vector<8x256xf32>
    %103 = arith.addf %100, %102 : vector<8x256xf32>
    %104 = math.tanh %103 : vector<8x256xf32>
    %c160 = arith.constant 160 : index
    %c0_86 = arith.constant 0 : index
    %105 = vector.load %arg8[%c160, %c0_86] : memref<224x256xf32, #tpu.memory_space<vmem>>, vector<8x256xf32>
    %c0_87 = arith.constant 0 : index
    %c0_88 = arith.constant 0 : index
    %106 = vector.load %arg3[%c0_87, %c0_88] : memref<256x256xf32, #tpu.memory_space<vmem>>, vector<256x256xf32>
    %cst_89 = arith.constant dense<0.000000e+00> : vector<8x256xf32>
    %107 = tpu.matmul %104, %106, %cst_89 {dimension_numbers = #tpu.dot_dimension_numbers<[1], [0], [0], [1], [0, 0, 1, 1], [], []>} : vector<8x256xf32>, vector<256x256xf32>, vector<8x256xf32> -> vector<8x256xf32>
    %108 = arith.addf %105, %107 : vector<8x256xf32>
    %109 = math.tanh %108 : vector<8x256xf32>
    %c168 = arith.constant 168 : index
    %c0_90 = arith.constant 0 : index
    %110 = vector.load %arg8[%c168, %c0_90] : memref<224x256xf32, #tpu.memory_space<vmem>>, vector<8x256xf32>
    %c0_91 = arith.constant 0 : index
    %c0_92 = arith.constant 0 : index
    %111 = vector.load %arg3[%c0_91, %c0_92] : memref<256x256xf32, #tpu.memory_space<vmem>>, vector<256x256xf32>
    %cst_93 = arith.constant dense<0.000000e+00> : vector<8x256xf32>
    %112 = tpu.matmul %109, %111, %cst_93 {dimension_numbers = #tpu.dot_dimension_numbers<[1], [0], [0], [1], [0, 0, 1, 1], [], []>} : vector<8x256xf32>, vector<256x256xf32>, vector<8x256xf32> -> vector<8x256xf32>
    %113 = arith.addf %110, %112 : vector<8x256xf32>
    %114 = math.tanh %113 : vector<8x256xf32>
    %c176 = arith.constant 176 : index
    %c0_94 = arith.constant 0 : index
    %115 = vector.load %arg8[%c176, %c0_94] : memref<224x256xf32, #tpu.memory_space<vmem>>, vector<8x256xf32>
    %c0_95 = arith.constant 0 : index
    %c0_96 = arith.constant 0 : index
    %116 = vector.load %arg3[%c0_95, %c0_96] : memref<256x256xf32, #tpu.memory_space<vmem>>, vector<256x256xf32>
    %cst_97 = arith.constant dense<0.000000e+00> : vector<8x256xf32>
    %117 = tpu.matmul %114, %116, %cst_97 {dimension_numbers = #tpu.dot_dimension_numbers<[1], [0], [0], [1], [0, 0, 1, 1], [], []>} : vector<8x256xf32>, vector<256x256xf32>, vector<8x256xf32> -> vector<8x256xf32>
    %118 = arith.addf %115, %117 : vector<8x256xf32>
    %119 = math.tanh %118 : vector<8x256xf32>
    %c184 = arith.constant 184 : index
    %c0_98 = arith.constant 0 : index
    %120 = vector.load %arg8[%c184, %c0_98] : memref<224x256xf32, #tpu.memory_space<vmem>>, vector<8x256xf32>
    %c0_99 = arith.constant 0 : index
    %c0_100 = arith.constant 0 : index
    %121 = vector.load %arg3[%c0_99, %c0_100] : memref<256x256xf32, #tpu.memory_space<vmem>>, vector<256x256xf32>
    %cst_101 = arith.constant dense<0.000000e+00> : vector<8x256xf32>
    %122 = tpu.matmul %119, %121, %cst_101 {dimension_numbers = #tpu.dot_dimension_numbers<[1], [0], [0], [1], [0, 0, 1, 1], [], []>} : vector<8x256xf32>, vector<256x256xf32>, vector<8x256xf32> -> vector<8x256xf32>
    %123 = arith.addf %120, %122 : vector<8x256xf32>
    %124 = math.tanh %123 : vector<8x256xf32>
    %c192 = arith.constant 192 : index
    %c0_102 = arith.constant 0 : index
    %125 = vector.load %arg8[%c192, %c0_102] : memref<224x256xf32, #tpu.memory_space<vmem>>, vector<8x256xf32>
    %c0_103 = arith.constant 0 : index
    %c0_104 = arith.constant 0 : index
    %126 = vector.load %arg3[%c0_103, %c0_104] : memref<256x256xf32, #tpu.memory_space<vmem>>, vector<256x256xf32>
    %cst_105 = arith.constant dense<0.000000e+00> : vector<8x256xf32>
    %127 = tpu.matmul %124, %126, %cst_105 {dimension_numbers = #tpu.dot_dimension_numbers<[1], [0], [0], [1], [0, 0, 1, 1], [], []>} : vector<8x256xf32>, vector<256x256xf32>, vector<8x256xf32> -> vector<8x256xf32>
    %128 = arith.addf %125, %127 : vector<8x256xf32>
    %129 = math.tanh %128 : vector<8x256xf32>
    %c200 = arith.constant 200 : index
    %c0_106 = arith.constant 0 : index
    %130 = vector.load %arg8[%c200, %c0_106] : memref<224x256xf32, #tpu.memory_space<vmem>>, vector<8x256xf32>
    %c0_107 = arith.constant 0 : index
    %c0_108 = arith.constant 0 : index
    %131 = vector.load %arg3[%c0_107, %c0_108] : memref<256x256xf32, #tpu.memory_space<vmem>>, vector<256x256xf32>
    %cst_109 = arith.constant dense<0.000000e+00> : vector<8x256xf32>
    %132 = tpu.matmul %129, %131, %cst_109 {dimension_numbers = #tpu.dot_dimension_numbers<[1], [0], [0], [1], [0, 0, 1, 1], [], []>} : vector<8x256xf32>, vector<256x256xf32>, vector<8x256xf32> -> vector<8x256xf32>
    %133 = arith.addf %130, %132 : vector<8x256xf32>
    %134 = math.tanh %133 : vector<8x256xf32>
    %c208 = arith.constant 208 : index
    %c0_110 = arith.constant 0 : index
    %135 = vector.load %arg8[%c208, %c0_110] : memref<224x256xf32, #tpu.memory_space<vmem>>, vector<8x256xf32>
    %c0_111 = arith.constant 0 : index
    %c0_112 = arith.constant 0 : index
    %136 = vector.load %arg3[%c0_111, %c0_112] : memref<256x256xf32, #tpu.memory_space<vmem>>, vector<256x256xf32>
    %cst_113 = arith.constant dense<0.000000e+00> : vector<8x256xf32>
    %137 = tpu.matmul %134, %136, %cst_113 {dimension_numbers = #tpu.dot_dimension_numbers<[1], [0], [0], [1], [0, 0, 1, 1], [], []>} : vector<8x256xf32>, vector<256x256xf32>, vector<8x256xf32> -> vector<8x256xf32>
    %138 = arith.addf %135, %137 : vector<8x256xf32>
    %139 = math.tanh %138 : vector<8x256xf32>
    %c216 = arith.constant 216 : index
    %c0_114 = arith.constant 0 : index
    %140 = vector.load %arg8[%c216, %c0_114] : memref<224x256xf32, #tpu.memory_space<vmem>>, vector<8x256xf32>
    %c0_115 = arith.constant 0 : index
    %c0_116 = arith.constant 0 : index
    %141 = vector.load %arg3[%c0_115, %c0_116] : memref<256x256xf32, #tpu.memory_space<vmem>>, vector<256x256xf32>
    %cst_117 = arith.constant dense<0.000000e+00> : vector<8x256xf32>
    %142 = tpu.matmul %139, %141, %cst_117 {dimension_numbers = #tpu.dot_dimension_numbers<[1], [0], [0], [1], [0, 0, 1, 1], [], []>} : vector<8x256xf32>, vector<256x256xf32>, vector<8x256xf32> -> vector<8x256xf32>
    %143 = arith.addf %140, %142 : vector<8x256xf32>
    %144 = math.tanh %143 : vector<8x256xf32>
    %c0_118 = arith.constant 0 : index
    %c0_119 = arith.constant 0 : index
    %145 = vector.load %arg5[%c0_118, %c0_119] : memref<256x128xf32, #tpu.memory_space<vmem>>, vector<256x128xf32>
    %cst_120 = arith.constant dense<0.000000e+00> : vector<8x128xf32>
    %146 = tpu.matmul %144, %145, %cst_120 {dimension_numbers = #tpu.dot_dimension_numbers<[1], [0], [0], [1], [0, 0, 1, 1], [], []>} : vector<8x256xf32>, vector<256x128xf32>, vector<8x128xf32> -> vector<8x128xf32>
    %c0_121 = arith.constant 0 : index
    %c0_122 = arith.constant 0 : index
    %147 = vector.load %arg6[%c0_121, %c0_122] : memref<1x128xf32, #tpu.memory_space<vmem>>, vector<1x128xf32>
    %148 = vector.broadcast %147 : vector<1x128xf32> to vector<8x128xf32>
    %149 = arith.addf %146, %148 : vector<8x128xf32>
    %c0_123 = arith.constant 0 : index
    %c0_124 = arith.constant 0 : index
    %150 = vector.load %arg7[%c0_123, %c0_124] : memref<8x128xf32, #tpu.memory_space<vmem>>, vector<8x128xf32>
    tpu.vector_store %arg7[%c0_123, %c0_124], %149 {strides = array<i32>} : memref<8x128xf32, #tpu.memory_space<vmem>>, vector<8x128xf32>,
    return
  }
  func.func @transform_0(%arg0: i32) -> (i32, i32, i32) {
    %c0_i32 = arith.constant 0 : i32
    %c0_i32_0 = arith.constant 0 : i32
    %c0_i32_1 = arith.constant 0 : i32
    return %c0_i32, %arg0, %c0_i32_0 : i32, i32, i32
  }
  func.func @transform_1(%arg0: i32) -> (i32, i32) {
    %c0_i32 = arith.constant 0 : i32
    %c0_i32_0 = arith.constant 0 : i32
    %c0_i32_1 = arith.constant 0 : i32
    return %c0_i32, %c0_i32_0 : i32, i32
  }
  func.func @transform_2(%arg0: i32) -> (i32, i32) {
    %c0_i32 = arith.constant 0 : i32
    %c0_i32_0 = arith.constant 0 : i32
    %c0_i32_1 = arith.constant 0 : i32
    return %c0_i32, %c0_i32_0 : i32, i32
  }
  func.func @transform_3(%arg0: i32) -> (i32, i32) {
    %c0_i32 = arith.constant 0 : i32
    %c0_i32_0 = arith.constant 0 : i32
    %c0_i32_1 = arith.constant 0 : i32
    return %c0_i32, %c0_i32_0 : i32, i32
  }
  func.func @transform_4(%arg0: i32) -> (i32, i32) {
    %c0_i32 = arith.constant 0 : i32
    %c0_i32_0 = arith.constant 0 : i32
    %c0_i32_1 = arith.constant 0 : i32
    return %c0_i32, %c0_i32_0 : i32, i32
  }
  func.func @transform_5(%arg0: i32) -> (i32, i32) {
    %c0_i32 = arith.constant 0 : i32
    %c0_i32_0 = arith.constant 0 : i32
    %c0_i32_1 = arith.constant 0 : i32
    return %c0_i32, %c0_i32_0 : i32, i32
  }
  func.func @transform_6(%arg0: i32) -> (i32, i32) {
    %c0_i32 = arith.constant 0 : i32
    %c0_i32_0 = arith.constant 0 : i32
    return %arg0, %c0_i32 : i32, i32
  }
}

</mosaic_0001>

<bundles_post_ra>
// kernel: tpu_custom_call.1
= control target key start
LH: loop header
LB: loop body
LE: loop exit
PB: predicated region body
PF: predicated region fallthrough
CT: control target
= control target key end

     0   :  { %11 = vsyncpa [#allocation4], 0  ;;  %s6105_s0 = inlined_call_operand.hbm [shape: f32[28,8,28], index: 0, kind: input, shape index: {}]   ;;  %s6106_s1 = inlined_call_operand.hbm [shape: f32[28,256], index: 1, kind: input, shape index: {}]   ;;  %s6107_s2 = inlined_call_operand.hbm [shape: f32[256,256], index: 2, kind: input, shape index: {}]   ;;  %s6108_s3 = inlined_call_operand.vmem [shape: f32[1,256], index: 3, kind: input, shape index: {}]   ;;  %s6109_s4 = inlined_call_operand.hbm [shape: f32[256,128], index: 4, kind: input, shape index: {}]   ;;  %s6110_s5 = inlined_call_operand.vmem [shape: f32[1,128], index: 5, kind: input, shape index: {}]   ;;  %s6111_s6 = inlined_call_operand.hbm [shape: f32[8,128], index: 6, kind: output, shape index: {}]  }
   0x1   :  { %12 = vsyncpa [#allocation7], 0 }
   0x2   :  { %13 = vsyncpa [#allocation10], 0  ;;  %s32_s23 = sshll.u32 %s6106_s1, 4  ;;  %s33_s23 = int_to_ptr.hbm [resolvable:$true] %s32_s23 }
   0x3   :  { %14 = vsyncpa [#allocation5], 0  ;;  %s3511_s24 = smov [#allocation6]   ;;  %s19_s28 = sshll.u32 %s6105_s0, 4  ;;  %s20_s28 = int_to_ptr.hbm [resolvable:$true] %s19_s28 }
   0x4   :  { %s34_s25 = sshll.u32 %s3511_s24, 4  ;;  %s3512_s29 = smov 256   ;;  %s35_s25 = int_to_ptr.vmem [resolvable:$true] %s34_s25 }
   0x5   :  { %s3513_s30 = smov 16   ;;  %s3514_s7 = smov [#allocation3]  }
   0x6   :  { %40 = dma.hbm_to_vmem [thread:$0]  %s33_s23, 1024, %s35_s25, [#allocation7], %s3512_s29, %s3512_s29, %s3513_s30  }
   0x7   :  { %s21_s8 = sshll.u32 %s3514_s7, 4  ;;  %s3515_s9 = smov 128   ;;  %s22_s8 = int_to_ptr.vmem [resolvable:$true] %s21_s8 }
   0x8   :  { %s3516_s10 = smov 8   ;;  %s45_s12 = sshll.u32 %s6107_s2, 4  ;;  %s46_s12 = int_to_ptr.hbm [resolvable:$true] %s45_s12 }
   0x9   :  { %27 = dma.hbm_to_vmem [thread:$0]  %s20_s28, 3584, %s22_s8, [#allocation4], %s3515_s9, %s3515_s9, %s3516_s10  }
   0xa   :  { %s3517_s13 = smov [#allocation8]   ;;  %s60_s16 = sshll.u32 %s6109_s4, 4  ;;  %s61_s16 = int_to_ptr.hbm [resolvable:$true] %s60_s16 }
   0xb   :  { %s47_s14 = sshll.u32 %s3517_s13, 4  ;;  %s3518_s17 = smov [#allocation9]   ;;  %s48_s14 = int_to_ptr.vmem [resolvable:$true] %s47_s14 }
   0xc   :  { %53 = dma.hbm_to_vmem [thread:$0]  %s46_s12, 8192, %s48_s14, [#allocation7], %s3512_s29, %s3512_s29, %s3513_s30  }
   0xd   :  { %s62_s18 = sshll.u32 %s3518_s17, 4  ;;  %s63_s18 = int_to_ptr.vmem [resolvable:$true] %s62_s18 }
   0xe   :  { %68 = dma.hbm_to_vmem [thread:$0]  %s61_s16, 4096, %s63_s18, [#allocation10], %s3515_s9, %s3515_s9, %s3516_s10  }
   0xf   :  { %3503 = dma.done.wait [#allocation4], 3584  }
  0x10   :  { %3504 = vsyncadd [#allocation4], 4294963712 }
  0x11   :  { %3505 = dma.done.wait [#allocation7], 9216  }
  0x12   :  { %3506 = vsyncadd [#allocation7], 4294958080 }
  0x13   :  { %3507 = dma.done.wait [#allocation10], 4096  }
  0x14   :  { %3508 = vsyncadd [#allocation10], 4294963200  ;;  %vm214_vm0 = vcmask 1043456   ;;  %v121_v0 = vld [vmem:[#allocation6 + $0x30] sm:$0xf]  ;;  %v119_v2 = vld [vmem:[#allocation6 + $0x20] sm:$0xff] }
  0x15   :  { %v122_v1 = vld [vmem:[#allocation6 + $0x38] sm:$0xf]  ;;  %2965 = vmatpush.msk.msra.mxu0 %vm214_vm0, %v121_v0  ;;  %v120_v3 = vld [vmem:[#allocation6 + $0x28] sm:$0xff]  ;;  %v117_v4 = vld [vmem:[#allocation6 + $0x10] sm:$0xff]  ;;  %vm129_vm1 = vcmask 228352   ;;  %s3519_s20 = smov [#allocation11]  }
  0x16   :  { %2994 = vmatpush.msk.msra.mxu1 %vm214_vm0, %v122_v1  ;;  %v118_v5 = vld [vmem:[#allocation6 + $0x18] sm:$0xff]  ;;  %v3567_v6 = vld [vmem:[#allocation8 + $0xf0] sm:$0xff]  ;;  %v3571_v8 = vld [vmem:[#allocation8 + $0xe0] sm:$0xff]  ;;  %s2951_s21 = sshll.u32 %s3519_s20, 4  ;;  %s2953_s24 = sshll.u32 %s6111_s6, 4  ;;  %s2952_s21 = int_to_ptr.vmem [resolvable:$true] %s2951_s21  ;;  %s2954_s24 = int_to_ptr.hbm [resolvable:$true] %s2953_s24 }
  0x17   :  { %234 = vmatpush.msra.mxu0 %v119_v2  ;;  %v3569_v7 = vld [vmem:[#allocation8 + $0x1f0] sm:$0xff]  ;;  %v115_v9 = vld [vmem:[#allocation6] sm:$0xff]  ;;  %v116_v10 = vld [vmem:[#allocation6 + $0x8] sm:$0xff]  ;;  %549 = vmatpush.msra.mxu2 %v3567_v6 }
  0x18   :  { %335 = vmatpush.msra.mxu1 %v120_v3  ;;  %569 = vmatpush.msra.mxu3 %v3569_v7  ;;  %v3575_v11 = vld [vmem:[#allocation8 + $0x1e0] sm:$0xff]  ;;  %v3579_v13 = vld [vmem:[#allocation8 + $0xd0] sm:$0xff]  ;;  %v3603_v21 = vld [vmem:[#allocation8 + $0xf8] sm:$0xff] }
  0x19   :  { %235 = vmatpush.msra.mxu0 %v117_v4  ;;  %v87_v12 = vld [vmem:[#allocation3] sm:$0xff]  ;;  %550 = vmatpush.msra.mxu2 %v3571_v8  ;;  %v3581_v14 = vld [vmem:[#allocation8 + $0x1d0] sm:$0xff]  ;;  %v3612_v24 = vld [vmem:[#allocation8 + $0x1f8] sm:$0xff] }
  0x1a   :  { %336 = vmatpush.msra.mxu1 %v118_v5  ;;  %570 = vmatpush.msra.mxu3 %v3575_v11  ;;  %v3585_v15 = vld [vmem:[#allocation8 + $0xc0] sm:$0xff]  ;;  %v3591_v17 = vld [vmem:[#allocation8 + $0xb0] sm:$0xff]  ;;  %6255 = vst [vmem:[#allocation16_spill] sm:$0xff] %v3612_v24  ;;  %v3614_v25 = vld [vmem:[#allocation8 + $0xe8] sm:$0xff] }
  0x1b   :  { %236 = vmatpush.msra.mxu0 %v115_v9  ;;  %v3587_v16 = vld [vmem:[#allocation8 + $0x1c0] sm:$0xff]  ;;  %551 = vmatpush.msra.mxu2 %v3579_v13  ;;  %v3593_v18 = vld [vmem:[#allocation8 + $0x1b0] sm:$0xff]  ;;  %6256 = vst [vmem:[#allocation17_spill] sm:$0xff] %v3614_v25  ;;  %v3624_v28 = vld [vmem:[#allocation8 + $0x1e8] sm:$0xff] }
  0x1c   :  { %337 = vmatpush.msra.mxu1 %v116_v10  ;;  %2966 = vmatmul.msk.f32.vlgmr.msra.gmra.mxu0 %vm129_vm1, %v87_v12  ;;  %v3597_v19 = vld [vmem:[#allocation8 + $0xa0] sm:$0xff]  ;;  %v3605_v22 = vld [vmem:[#allocation8 + $0x90] sm:$0xff]  ;;  %6257 = vst [vmem:[#allocation18_spill] sm:$0xff] %v3624_v28  ;;  %v3626_v29 = vld [vmem:[#allocation8 + $0xd8] sm:$0xff] }
  0x1d   :  { %2995 = vmatmul.msk.f32.vlgmr.msra.gmra.mxu1 %vm129_vm1, %v87_v12  ;;  %571 = vmatpush.msra.mxu3 %v3581_v14  ;;  %v3599_v20 = vld [vmem:[#allocation8 + $0x1a0] sm:$0xff]  ;;  %v3607_v23 = vld [vmem:[#allocation8 + $0x190] sm:$0xff]  ;;  %v3636_v32 = vld [vmem:[#allocation8 + $0x1d8] sm:$0xff] }
  0x1e   :  { %552 = vmatpush.msra.mxu2 %v3585_v15  ;;  %847 = vmatpush.msrb.mxu0 %v3603_v21  ;;  %v3616_v26 = vld [vmem:[#allocation8 + $0x80] sm:$0xff]  ;;  %v3628_v30 = vld [vmem:[#allocation8 + $0x70] sm:$0xff]  ;;  %6258 = vst [vmem:[#allocation19_spill] sm:$0xff] %v3636_v32  ;;  %v3638_v33 = vld [vmem:[#allocation8 + $0xc8] sm:$0xff] }
  0x1f   :  { %572 = vmatpush.msra.mxu3 %v3587_v16  ;;  %v3618_v27 = vld [vmem:[#allocation8 + $0x180] sm:$0xff]  ;;  %867 = vmatpush.msrb.mxu1 %v3612_v24  ;;  %v3630_v31 = vld [vmem:[#allocation8 + $0x170] sm:$0xff]  ;;  %v3648_v36 = vld [vmem:[#allocation8 + $0x1c8] sm:$0xff] }
  0x20   :  { %553 = vmatpush.msra.mxu2 %v3591_v17  ;;  %848 = vmatpush.msrb.mxu0 %v3614_v25  ;;  %v3640_v34 = vld [vmem:[#allocation8 + $0x60] sm:$0xff]  ;;  %6259 = vst [vmem:[#allocation20_spill] sm:$0xff] %v3648_v36  ;;  %v3650_v37 = vld [vmem:[#allocation8 + $0xb8] sm:$0xff]  ;;  %v3652_v38 = vld [vmem:[#allocation8 + $0x50] sm:$0xff] }
  0x21   :  { %573 = vmatpush.msra.mxu3 %v3593_v18  ;;  %868 = vmatpush.msrb.mxu1 %v3624_v28  ;;  %v3642_v35 = vld [vmem:[#allocation8 + $0x160] sm:$0xff]  ;;  %v3654_v39 = vld [vmem:[#allocation8 + $0x150] sm:$0xff]  ;;  %v3660_v40 = vld [vmem:[#allocation8 + $0x1b8] sm:$0xff] }
  0x22   :  { %554 = vmatpush.msra.mxu2 %v3597_v19  ;;  %849 = vmatpush.msrb.mxu0 %v3626_v29  ;;  %v3662_v41 = vld [vmem:[#allocation8 + $0xa8] sm:$0xff]  ;;  %v3664_v42 = vld [vmem:[#allocation8 + $0x40] sm:$0xff]  ;;  %v3674_v45 = vld [vmem:[#allocation8 + $0x98] sm:$0xff] }
  0x23   :  { %574 = vmatpush.msra.mxu3 %v3599_v20  ;;  %869 = vmatpush.msrb.mxu1 %v3636_v32  ;;  %v3666_v43 = vld [vmem:[#allocation8 + $0x140] sm:$0xff]  ;;  %v3672_v44 = vld [vmem:[#allocation8 + $0x1a8] sm:$0xff]  ;;  %v3676_v46 = vld [vmem:[#allocation8 + $0x30] sm:$0xff] }
  0x24   :  { %555 = vmatpush.msra.mxu2 %v3605_v22  ;;  %850 = vmatpush.msrb.mxu0 %v3638_v33  ;;  %v3678_v47 = vld [vmem:[#allocation8 + $0x130] sm:$0xff]  ;;  %v3684_v48 = vld [vmem:[#allocation8 + $0x198] sm:$0xff]  ;;  %v3686_v49 = vld [vmem:[#allocation8 + $0x20] sm:$0xff] }
  0x25   :  { %575 = vmatpush.msra.mxu3 %v3607_v23  ;;  %870 = vmatpush.msrb.mxu1 %v3648_v36  ;;  %6260 = vst [vmem:[#allocation21_spill] sm:$0xff] %v3678_v47  ;;  %v3688_v50 = vld [vmem:[#allocation8 + $0x120] sm:$0xff]  ;;  %v3693_v51 = vld [vmem:[#allocation8 + $0x10] sm:$0xff]  ;;  %v3721_v55 = vld [vmem:[#allocation8 + $0x88] sm:$0xff] }
  0x26   :  { %556 = vmatpush.msra.mxu2 %v3616_v26  ;;  %851 = vmatpush.msrb.mxu0 %v3650_v37  ;;  %6261 = vst [vmem:[#allocation22_spill] sm:$0xff] %v3684_v48  ;;  %v3695_v52 = vld [vmem:[#allocation8 + $0x110] sm:$0xff]  ;;  %v3699_v53 = vld [vmem:[#allocation8] sm:$0xff]  ;;  %v3723_v56 = vld [vmem:[#allocation8 + $0x188] sm:$0xff] }
  0x27   :  { %576 = vmatpush.msra.mxu3 %v3618_v27  ;;  %871 = vmatpush.msrb.mxu1 %v3660_v40  ;;  %6262 = vst [vmem:[#allocation23_spill] sm:$0xff] %v3688_v50  ;;  %v3701_v54 = vld [vmem:[#allocation8 + $0x100] sm:$0xff]  ;;  %v3727_v57 = vld [vmem:[#allocation8 + $0x78] sm:$0xff]  ;;  %v3735_v59 = vld [vmem:[#allocation8 + $0x68] sm:$0xff] }
  0x28   :  { %557 = vmatpush.msra.mxu2 %v3628_v30  ;;  %852 = vmatpush.msrb.mxu0 %v3662_v41  ;;  %6263 = vst [vmem:[#allocation24_spill] sm:$0xff] %v3699_v53  ;;  %v3729_v58 = vld [vmem:[#allocation8 + $0x178] sm:$0xff]  ;;  %v3737_v60 = vld [vmem:[#allocation8 + $0x168] sm:$0xff] }
  0x29   :  { %577 = vmatpush.msra.mxu3 %v3630_v31  ;;  %872 = vmatpush.msrb.mxu1 %v3672_v44  ;;  %6264 = vst [vmem:[#allocation25_spill] sm:$0xff] %v3701_v54  ;;  %v3739_v61 = vld [vmem:[#allocation8 + $0x58] sm:$0xff]  ;;  %v3747_v63 = vld [vmem:[#allocation8 + $0x48] sm:$0xff] }
  0x2a   :  { %558 = vmatpush.msra.mxu2 %v3640_v34  ;;  %853 = vmatpush.msrb.mxu0 %v3674_v45  ;;  %6265 = vst [vmem:[#allocation26_spill] sm:$0xff] %v3723_v56  ;;  %v3741_v62 = vld [vmem:[#allocation8 + $0x158] sm:$0xff]  ;;  %v3749_v0 = vld [vmem:[#allocation8 + $0x148] sm:$0xff] }
  0x2b   :  { %578 = vmatpush.msra.mxu3 %v3642_v35  ;;  %873 = vmatpush.msrb.mxu1 %v3684_v48  ;;  %6266 = vst [vmem:[#allocation27_spill] sm:$0xff] %v3729_v58  ;;  %v3759_v1 = vld [vmem:[#allocation8 + $0x38] sm:$0xff]  ;;  %v3763_v3 = vld [vmem:[#allocation8 + $0x28] sm:$0xff] }
  0x2c   :  { %559 = vmatpush.msra.mxu2 %v3652_v38  ;;  %854 = vmatpush.msrb.mxu0 %v3721_v55  ;;  %6267 = vst [vmem:[#allocation28_spill] sm:$0xff] %v3737_v60  ;;  %v3761_v2 = vld [vmem:[#allocation8 + $0x138] sm:$0xff]  ;;  %v3769_v4 = vld [vmem:[#allocation8 + $0x128] sm:$0xff] }
  0x2d   :  { %579 = vmatpush.msra.mxu3 %v3654_v39  ;;  %874 = vmatpush.msrb.mxu1 %v3723_v56  ;;  %6268 = vst [vmem:[#allocation29_spill] sm:$0xff] %v3741_v62  ;;  %v3771_v5 = vld [vmem:[#allocation8 + $0x18] sm:$0xff]  ;;  %v88_v10 = vld [vmem:[#allocation3 + $0x8] sm:$0xff] }
  0x2e   :  { %560 = vmatpush.msra.mxu2 %v3664_v42  ;;  %855 = vmatpush.msrb.mxu0 %v3727_v57  ;;  %6269 = vst [vmem:[#allocation30_spill] sm:$0xff] %v3747_v63  ;;  %v3773_v9 = vld [vmem:[#allocation8 + $0x118] sm:$0xff]  ;;  %v3780_v12 = vld [vmem:[#allocation8 + $0x8] sm:$0xff] }
  0x2f   :  { %580 = vmatpush.msra.mxu3 %v3666_v43  ;;  %875 = vmatpush.msrb.mxu1 %v3729_v58  ;;  %6270 = vst [vmem:[#allocation31_spill] sm:$0xff] %v3749_v0 }
  0x30   :  { %561 = vmatpush.msra.mxu2 %v3676_v46  ;;  %856 = vmatpush.msrb.mxu0 %v3735_v59  ;;  %6271 = vst [vmem:[#allocation32_spill] sm:$0xff] %v3759_v1 }
  0x31   :  { %581 = vmatpush.msra.mxu3 %v3678_v47  ;;  %876 = vmatpush.msrb.mxu1 %v3737_v60  ;;  %6272 = vst [vmem:[#allocation33_spill] sm:$0xff] %v3761_v2 }
  0x32   :  { %562 = vmatpush.msra.mxu2 %v3686_v49  ;;  %857 = vmatpush.msrb.mxu0 %v3739_v61  ;;  %6273 = vst [vmem:[#allocation34_spill] sm:$0xff] %v3763_v3 }
  0x33   :  { %582 = vmatpush.msra.mxu3 %v3688_v50  ;;  %877 = vmatpush.msrb.mxu1 %v3741_v62  ;;  %6274 = vst [vmem:[#allocation35_spill] sm:$0xff] %v3769_v4 }
  0x34   :  { %563 = vmatpush.msra.mxu2 %v3693_v51  ;;  %858 = vmatpush.msrb.mxu0 %v3747_v63  ;;  %6275 = vst [vmem:[#allocation36_spill] sm:$0xff] %v3771_v5 }
  0x35   :  { %583 = vmatpush.msra.mxu3 %v3695_v52  ;;  %878 = vmatpush.msrb.mxu1 %v3749_v0  ;;  %6276 = vst [vmem:[#allocation37_spill] sm:$0xff] %v3773_v9 }
  0x36   :  { %564 = vmatpush.msra.mxu2 %v3699_v53  ;;  %859 = vmatpush.msrb.mxu0 %v3759_v1  ;;  %6277 = vst [vmem:[#allocation38_spill] sm:$0xff] %v3780_v12 }
  0x37   :  { %584 = vmatpush.msra.mxu3 %v3701_v54  ;;  %879 = vmatpush.msrb.mxu1 %v3761_v2  ;;  %v3782_v54 = vld [vmem:[#allocation8 + $0x108] sm:$0xff] }
  0x38   :  { %589 = vmatpush.msrb.mxu2 %v3603_v21  ;;  %2967 = vmatmul.msk.f32.gmra.mxu0 %vm129_vm1, %v88_v10  ;;  %6278 = vst [vmem:[#allocation39_spill] sm:$0xff] %v3782_v54 }
  0x39   :  { %609 = vmatpush.msrb.mxu3 %v3612_v24  ;;  %2996 = vmatmul.msk.f32.gmra.mxu1 %vm129_vm1, %v88_v10  ;;  %v123_v10 = vld [vmem:[%s6108_s3] sm:$0x3] }
  0x3a   :  { %590 = vmatpush.msrb.mxu2 %v3614_v25  ;;  %860 = vmatpush.msrb.mxu0 %v3763_v3  ;;  %v3806_v53 = vperm.slane %v123_v10, 0 }
  0x3b   :  { %610 = vmatpush.msrb.mxu3 %v3624_v28  ;;  %880 = vmatpush.msrb.mxu1 %v3769_v4 }
  0x3c   :  { %591 = vmatpush.msrb.mxu2 %v3626_v29  ;;  %861 = vmatpush.msrb.mxu0 %v3771_v5 }
  0x3d   :  { %611 = vmatpush.msrb.mxu3 %v3636_v32  ;;  %881 = vmatpush.msrb.mxu1 %v3773_v9 }
  0x3e   :  { %592 = vmatpush.msrb.mxu2 %v3638_v33  ;;  %862 = vmatpush.msrb.mxu0 %v3780_v12 }
  0x3f   :  { %612 = vmatpush.msrb.mxu3 %v3648_v36  ;;  %882 = vmatpush.msrb.mxu1 %v3782_v54 }
  0x40   :  { %593 = vmatpush.msrb.mxu2 %v3650_v37  ;;  %933 = vmatpush.msra.mxu0 %v3603_v21 }
  0x41   :  { %613 = vmatpush.msrb.mxu3 %v3660_v40  ;;  %953 = vmatpush.msra.mxu1 %v3612_v24  ;;  %v3808_v24 = vperm.slane %v123_v10, 1  ;;  %v6281_v10 = vld [vmem:[#allocation16_spill] sm:$0xff] }
  0x42   :  { %594 = vmatpush.msrb.mxu2 %v3662_v41  ;;  %934 = vmatpush.msra.mxu0 %v3614_v25 }
  0x43   :  { %614 = vmatpush.msrb.mxu3 %v3672_v44  ;;  %954 = vmatpush.msra.mxu1 %v3624_v28 }
  0x44   :  { %595 = vmatpush.msrb.mxu2 %v3674_v45  ;;  %935 = vmatpush.msra.mxu0 %v3626_v29 }
  0x45   :  { %615 = vmatpush.msrb.mxu3 %v3684_v48  ;;  %955 = vmatpush.msra.mxu1 %v3636_v32 }
  0x46   :  { %596 = vmatpush.msrb.mxu2 %v3721_v55  ;;  %936 = vmatpush.msra.mxu0 %v3638_v33 }
  0x47   :  { %616 = vmatpush.msrb.mxu3 %v3723_v56  ;;  %956 = vmatpush.msra.mxu1 %v3648_v36 }
  0x48   :  { %597 = vmatpush.msrb.mxu2 %v3727_v57  ;;  %937 = vmatpush.msra.mxu0 %v3650_v37 }
  0x49   :  { %617 = vmatpush.msrb.mxu3 %v3729_v58  ;;  %957 = vmatpush.msra.mxu1 %v3660_v40 }
  0x4a   :  { %598 = vmatpush.msrb.mxu2 %v3735_v59  ;;  %938 = vmatpush.msra.mxu0 %v3662_v41 }
  0x4b   :  { %618 = vmatpush.msrb.mxu3 %v3737_v60  ;;  %958 = vmatpush.msra.mxu1 %v3672_v44 }
  0x4c   :  { %599 = vmatpush.msrb.mxu2 %v3739_v61  ;;  %939 = vmatpush.msra.mxu0 %v3674_v45 }
  0x4d   :  { %619 = vmatpush.msrb.mxu3 %v3741_v62  ;;  %959 = vmatpush.msra.mxu1 %v3684_v48 }
  0x4e   :  { %600 = vmatpush.msrb.mxu2 %v3747_v63  ;;  %940 = vmatpush.msra.mxu0 %v3721_v55 }
  0x4f   :  { %620 = vmatpush.msrb.mxu3 %v3749_v0  ;;  %960 = vmatpush.msra.mxu1 %v3723_v56 }
  0x50   :  { %601 = vmatpush.msrb.mxu2 %v3759_v1  ;;  %941 = vmatpush.msra.mxu0 %v3727_v57 }
  0x51   :  { %621 = vmatpush.msrb.mxu3 %v3761_v2  ;;  %961 = vmatpush.msra.mxu1 %v3729_v58 }
  0x52   :  { %602 = vmatpush.msrb.mxu2 %v3763_v3  ;;  %942 = vmatpush.msra.mxu0 %v3735_v59 }
  0x53   :  { %622 = vmatpush.msrb.mxu3 %v3769_v4  ;;  %962 = vmatpush.msra.mxu1 %v3737_v60 }
  0x54   :  { %603 = vmatpush.msrb.mxu2 %v3771_v5  ;;  %943 = vmatpush.msra.mxu0 %v3739_v61 }
  0x55   :  { %623 = vmatpush.msrb.mxu3 %v3773_v9  ;;  %963 = vmatpush.msra.mxu1 %v3741_v62 }
  0x56   :  { %604 = vmatpush.msrb.mxu2 %v3780_v12  ;;  %944 = vmatpush.msra.mxu0 %v3747_v63 }
  0x57   :  { %624 = vmatpush.msrb.mxu3 %v3782_v54  ;;  %964 = vmatpush.msra.mxu1 %v3749_v0 }
  0x58   :  { %945 = vmatpush.msra.mxu0 %v3759_v1 }
  0x59   :  { %965 = vmatpush.msra.mxu1 %v3761_v2 }
  0x5a   :  { %946 = vmatpush.msra.mxu0 %v3763_v3 }
  0x5b   :  { %966 = vmatpush.msra.mxu1 %v3769_v4 }
  0x5c   :  { %947 = vmatpush.msra.mxu0 %v3771_v5 }
  0x5d   :  { %967 = vmatpush.msra.mxu1 %v3773_v9 }
  0x5e   :  { %948 = vmatpush.msra.mxu0 %v3780_v12 }
  0x5f   :  { %968 = vmatpush.msra.mxu1 %v3782_v54 }
  0x99   :  { %v238_v28 = vpop.f32.mrf.mxu0 }
  0x9a   :  { %v339_v25 = vpop.f32.mrf.mxu1  ;;  %v239_v32 = vadd.f32 %v238_v28, %v3806_v53 }
  0x9b   :  { %v340_v36 = vadd.f32 %v339_v25, %v3808_v24 }
  0x9c   :  { %3033 = vtanh.f32 %v239_v32  ;;  %v6279_v32 = vld [vmem:[#allocation24_spill] sm:$0xff] }
  0x9d   :  { %3035 = vtanh.f32 %v340_v36  ;;  %v6280_v36 = vld [vmem:[#allocation25_spill] sm:$0xff] }
  0xa2   :  { %v3034_v28 = vpop.eup %3033 }
  0xa3   :  { %v3036_v25 = vpop.eup %3035  ;;  %565 = vmatmul.f32.vlgmr.msra.gmra.mxu2 %v3034_v28 }
  0xa4   :  { %585 = vmatmul.f32.vlgmr.msra.gmra.mxu3 %v3036_v25  ;;  %635 = vmatpush.msra.mxu2 %v3567_v6 }
  0xa5   :  { %655 = vmatpush.msra.mxu3 %v3569_v7 }
  0xa6   :  { %636 = vmatpush.msra.mxu2 %v3571_v8 }
  0xa7   :  { %656 = vmatpush.msra.mxu3 %v3575_v11 }
  0xa8   :  { %637 = vmatpush.msra.mxu2 %v3579_v13 }
  0xa9   :  { %657 = vmatpush.msra.mxu3 %v3581_v14 }
  0xaa   :  { %638 = vmatpush.msra.mxu2 %v3585_v15 }
  0xab   :  { %605 = vmatmul.f32.vlgmr.msrb.gmra.mxu2 %v3034_v28  ;;  %658 = vmatpush.msra.mxu3 %v3587_v16  ;;  %v6282_v28 = vld [vmem:[#allocation17_spill] sm:$0xff] }
  0xac   :  { %625 = vmatmul.f32.vlgmr.msrb.gmra.mxu3 %v3036_v25  ;;  %639 = vmatpush.msra.mxu2 %v3591_v17  ;;  %v6283_v25 = vld [vmem:[#allocation18_spill] sm:$0xff] }
  0xad   :  { %659 = vmatpush.msra.mxu3 %v3593_v18 }
  0xae   :  { %640 = vmatpush.msra.mxu2 %v3597_v19 }
  0xaf   :  { %660 = vmatpush.msra.mxu3 %v3599_v20 }
  0xb0   :  { %641 = vmatpush.msra.mxu2 %v3605_v22 }
  0xb1   :  { %661 = vmatpush.msra.mxu3 %v3607_v23 }
  0xb2   :  { %642 = vmatpush.msra.mxu2 %v3616_v26 }
  0xb3   :  { %662 = vmatpush.msra.mxu3 %v3618_v27 }
  0xb4   :  { %643 = vmatpush.msra.mxu2 %v3628_v30 }
  0xb5   :  { %663 = vmatpush.msra.mxu3 %v3630_v31 }
  0xb6   :  { %644 = vmatpush.msra.mxu2 %v3640_v34 }
  0xb7   :  { %664 = vmatpush.msra.mxu3 %v3642_v35 }
  0xb8   :  { %645 = vmatpush.msra.mxu2 %v3652_v38 }
  0xb9   :  { %665 = vmatpush.msra.mxu3 %v3654_v39 }
  0xba   :  { %646 = vmatpush.msra.mxu2 %v3664_v42 }
  0xbb   :  { %666 = vmatpush.msra.mxu3 %v3666_v43 }
  0xbc   :  { %647 = vmatpush.msra.mxu2 %v3676_v46 }
  0xbd   :  { %667 = vmatpush.msra.mxu3 %v3678_v47  ;;  %v6284_v47 = vld [vmem:[#allocation19_spill] sm:$0xff] }
  0xbe   :  { %648 = vmatpush.msra.mxu2 %v3686_v49 }
  0xbf   :  { %668 = vmatpush.msra.mxu3 %v3688_v50  ;;  %v6285_v50 = vld [vmem:[#allocation20_spill] sm:$0xff] }
  0xc0   :  { %649 = vmatpush.msra.mxu2 %v3693_v51 }
  0xc1   :  { %669 = vmatpush.msra.mxu3 %v3695_v52 }
  0xc2   :  { %650 = vmatpush.msra.mxu2 %v6279_v32 }
  0xc3   :  { %670 = vmatpush.msra.mxu3 %v6280_v36 }
  0xc4   :  { %675 = vmatpush.msrb.mxu2 %v3603_v21 }
  0xc5   :  { %695 = vmatpush.msrb.mxu3 %v6281_v10 }
  0xc6   :  { %676 = vmatpush.msrb.mxu2 %v6282_v28 }
  0xc7   :  { %696 = vmatpush.msrb.mxu3 %v6283_v25 }
  0xc8   :  { %677 = vmatpush.msrb.mxu2 %v3626_v29 }
  0xc9   :  { %697 = vmatpush.msrb.mxu3 %v6284_v47 }
  0xca   :  { %678 = vmatpush.msrb.mxu2 %v3638_v33 }
  0xcb   :  { %698 = vmatpush.msrb.mxu3 %v6285_v50 }
  0xcc   :  { %679 = vmatpush.msrb.mxu2 %v3650_v37 }
  0xcd   :  { %699 = vmatpush.msrb.mxu3 %v3660_v40 }
  0xce   :  { %680 = vmatpush.msrb.mxu2 %v3662_v41 }
  0xcf   :  { %700 = vmatpush.msrb.mxu3 %v3672_v44 }
  0xd0   :  { %681 = vmatpush.msrb.mxu2 %v3674_v45 }
  0xd1   :  { %701 = vmatpush.msrb.mxu3 %v3684_v48 }
  0xd2   :  { %682 = vmatpush.msrb.mxu2 %v3721_v55 }
  0xd3   :  { %702 = vmatpush.msrb.mxu3 %v3723_v56 }
  0xd4   :  { %683 = vmatpush.msrb.mxu2 %v3727_v57 }
  0xd5   :  { %703 = vmatpush.msrb.mxu3 %v3729_v58  ;;  %v342_v58 = vpop.f32.mrf.mxu1 }
  0xd6   :  { %684 = vmatpush.msrb.mxu2 %v3735_v59 }
  0xd7   :  { %704 = vmatpush.msrb.mxu3 %v3737_v60  ;;  %v90_v60 = vld [vmem:[#allocation3 + $0x18] sm:$0xff] }
  0xd8   :  { %685 = vmatpush.msrb.mxu2 %v3739_v61 }
  0xd9   :  { %705 = vmatpush.msrb.mxu3 %v3741_v62  ;;  %v89_v62 = vld [vmem:[#allocation3 + $0x10] sm:$0xff] }
  0xda   :  { %686 = vmatpush.msrb.mxu2 %v3747_v63  ;;  %2968 = vmatmul.msk.f32.gmra.mxu0 %vm129_vm1, %v89_v62  ;;  %v92_v63 = vld [vmem:[#allocation3 + $0x28] sm:$0xff] }
  0xdb   :  { %706 = vmatpush.msrb.mxu3 %v3749_v0  ;;  %2997 = vmatmul.msk.f32.gmra.mxu1 %vm129_vm1, %v89_v62  ;;  %v241_v0 = vpop.f32.mrf.mxu0  ;;  %v343_v62 = vadd.f32 %v342_v58, %v3808_v24  ;;  %v93_v58 = vld [vmem:[#allocation3 + $0x30] sm:$0xff] }
  0xdc   :  { %687 = vmatpush.msrb.mxu2 %v3759_v1 }
  0xdd   :  { %707 = vmatpush.msrb.mxu3 %v3761_v2 }
  0xde   :  { %688 = vmatpush.msrb.mxu2 %v3763_v3  ;;  %v91_v3 = vld [vmem:[#allocation3 + $0x20] sm:$0xff] }
  0xdf   :  { %708 = vmatpush.msrb.mxu3 %v3769_v4  ;;  %v242_v4 = vadd.f32 %v241_v0, %v3806_v53 }
  0xe0   :  { %689 = vmatpush.msrb.mxu2 %v3771_v5 }
  0xe1   :  { %709 = vmatpush.msrb.mxu3 %v3773_v9 }
  0xe2   :  { %690 = vmatpush.msrb.mxu2 %v3780_v12  ;;  %2969 = vmatmul.msk.f32.gmra.mxu0 %vm129_vm1, %v90_v60 }
  0xe3   :  { %710 = vmatpush.msrb.mxu3 %v3782_v54  ;;  %2998 = vmatmul.msk.f32.gmra.mxu1 %vm129_vm1, %v90_v60 }
  0xea   :  { %2970 = vmatmul.msk.f32.gmra.mxu0 %vm129_vm1, %v91_v3 }
  0xeb   :  { %2999 = vmatmul.msk.f32.gmra.mxu1 %vm129_vm1, %v91_v3  ;;  %v6302_v3 = vld [vmem:[#allocation39_spill] sm:$0xff] }
  0xf2   :  { %2971 = vmatmul.msk.f32.gmra.mxu0 %vm129_vm1, %v92_v63 }
  0xf3   :  { %3000 = vmatmul.msk.f32.gmra.mxu1 %vm129_vm1, %v92_v63  ;;  %v6299_v63 = vld [vmem:[#allocation33_spill] sm:$0xff] }
  0xfa   :  { %2972 = vmatmul.msk.f32.gmra.mxu0 %vm129_vm1, %v93_v58 }
  0xfb   :  { %3001 = vmatmul.msk.f32.gmra.mxu1 %vm129_vm1, %v93_v58 }
 0x126   :  { %v566_v2 = vpop.f32.mrf.mxu2 }
 0x127   :  { %v586_v5 = vpop.f32.mrf.mxu3 }
 0x128   :  { %v587_v9 = vadd.f32 %v586_v5, %v566_v2  ;;  %v6301_v2 = vld [vmem:[#allocation37_spill] sm:$0xff]  ;;  %v95_v5 = vld [vmem:[#allocation3 + $0x40] sm:$0xff] }
 0x12a   :  { %v629_v12 = vadd.f32 %v587_v9, %v242_v4  ;;  %v94_v4 = vld [vmem:[#allocation3 + $0x38] sm:$0xff]  ;;  %v96_v9 = vld [vmem:[#allocation3 + $0x48] sm:$0xff] }
 0x12b   :  { %2973 = vmatmul.msk.f32.gmra.mxu0 %vm129_vm1, %v94_v4  ;;  %3002 = vmatmul.msk.f32.gmra.mxu1 %vm129_vm1, %v94_v4 }
 0x12c   :  { %3037 = vtanh.f32 %v629_v12  ;;  %v97_v12 = vld [vmem:[#allocation3 + $0x50] sm:$0xff] }
 0x12e   :  { %v606_v54 = vpop.f32.mrf.mxu2 }
 0x12f   :  { %v626_v1 = vpop.f32.mrf.mxu3 }
 0x130   :  { %v627_v56 = vadd.f32 %v626_v1, %v606_v54  ;;  %v6287_v54 = vld [vmem:[#allocation23_spill] sm:$0xff] }
 0x131   :  { %v6300_v1 = vld [vmem:[#allocation35_spill] sm:$0xff] }
 0x132   :  { %v3038_v60 = vpop.eup %3037  ;;  %v630_v48 = vadd.f32 %v627_v56, %v343_v62  ;;  %v6298_v56 = vld [vmem:[#allocation31_spill] sm:$0xff] }
 0x133   :  { %651 = vmatmul.f32.vlgmr.msra.gmra.mxu2 %v3038_v60  ;;  %2974 = vmatmul.msk.f32.gmra.mxu0 %vm129_vm1, %v95_v5 }
 0x134   :  { %3039 = vtanh.f32 %v630_v48  ;;  %721 = vmatpush.msra.mxu2 %v3567_v6  ;;  %v6286_v48 = vld [vmem:[#allocation21_spill] sm:$0xff]  ;;  %3003 = vmatmul.msk.f32.gmra.mxu1 %vm129_vm1, %v95_v5 }
 0x136   :  { %722 = vmatpush.msra.mxu2 %v3571_v8 }
 0x138   :  { %723 = vmatpush.msra.mxu2 %v3579_v13 }
 0x13a   :  { %v3040_v0 = vpop.eup %3039  ;;  %724 = vmatpush.msra.mxu2 %v3585_v15 }
 0x13b   :  { %671 = vmatmul.f32.vlgmr.msra.gmra.mxu3 %v3040_v0  ;;  %691 = vmatmul.f32.vlgmr.msrb.gmra.mxu2 %v3038_v60 }
 0x13c   :  { %725 = vmatpush.msra.mxu2 %v3591_v17  ;;  %741 = vmatpush.msra.mxu3 %v3569_v7 }
 0x13d   :  { %2975 = vmatmul.msk.f32.gmra.mxu0 %vm129_vm1, %v96_v9  ;;  %3004 = vmatmul.msk.f32.gmra.mxu1 %vm129_vm1, %v96_v9 }
 0x13e   :  { %726 = vmatpush.msra.mxu2 %v3597_v19  ;;  %742 = vmatpush.msra.mxu3 %v3575_v11 }
 0x140   :  { %727 = vmatpush.msra.mxu2 %v3605_v22  ;;  %743 = vmatpush.msra.mxu3 %v3581_v14 }
 0x142   :  { %728 = vmatpush.msra.mxu2 %v3616_v26  ;;  %744 = vmatpush.msra.mxu3 %v3587_v16 }
 0x143   :  { %711 = vmatmul.f32.vlgmr.msrb.gmra.mxu3 %v3040_v0  ;;  %v99_v0 = vld [vmem:[#allocation3 + $0x60] sm:$0xff] }
 0x144   :  { %729 = vmatpush.msra.mxu2 %v3628_v30  ;;  %745 = vmatpush.msra.mxu3 %v3593_v18 }
 0x145   :  { %2976 = vmatmul.msk.f32.gmra.mxu0 %vm129_vm1, %v97_v12  ;;  %3005 = vmatmul.msk.f32.gmra.mxu1 %vm129_vm1, %v97_v12 }
 0x146   :  { %730 = vmatpush.msra.mxu2 %v3640_v34  ;;  %746 = vmatpush.msra.mxu3 %v3599_v20 }
 0x148   :  { %731 = vmatpush.msra.mxu2 %v3652_v38  ;;  %747 = vmatpush.msra.mxu3 %v3607_v23 }
 0x14a   :  { %732 = vmatpush.msra.mxu2 %v3664_v42  ;;  %748 = vmatpush.msra.mxu3 %v3618_v27 }
 0x14c   :  { %733 = vmatpush.msra.mxu2 %v3676_v46  ;;  %749 = vmatpush.msra.mxu3 %v3630_v31 }
 0x14e   :  { %734 = vmatpush.msra.mxu2 %v3686_v49  ;;  %750 = vmatpush.msra.mxu3 %v3642_v35 }
 0x150   :  { %735 = vmatpush.msra.mxu2 %v3693_v51  ;;  %751 = vmatpush.msra.mxu3 %v3654_v39 }
 0x152   :  { %736 = vmatpush.msra.mxu2 %v6279_v32  ;;  %752 = vmatpush.msra.mxu3 %v3666_v43 }
 0x154   :  { %761 = vmatpush.msrb.mxu2 %v3603_v21  ;;  %753 = vmatpush.msra.mxu3 %v6286_v48  ;;  %v6288_v21 = vld [vmem:[#allocation22_spill] sm:$0xff] }
 0x156   :  { %762 = vmatpush.msrb.mxu2 %v6282_v28  ;;  %754 = vmatpush.msra.mxu3 %v6287_v54 }
 0x157   :  { %v244_v28 = vpop.f32.mrf.mxu0 }
 0x158   :  { %763 = vmatpush.msrb.mxu2 %v3626_v29  ;;  %755 = vmatpush.msra.mxu3 %v3695_v52  ;;  %v6289_v29 = vld [vmem:[#allocation30_spill] sm:$0xff]  ;;  %v245_v62 = vadd.f32 %v244_v28, %v3806_v53  ;;  %v345_v4 = vpop.f32.mrf.mxu1  ;;  %v101_v28 = vld [vmem:[#allocation3 + $0x70] sm:$0xff] }
 0x159   :  { %v346_v5 = vadd.f32 %v345_v4, %v3808_v24 }
 0x15a   :  { %764 = vmatpush.msrb.mxu2 %v3638_v33  ;;  %756 = vmatpush.msra.mxu3 %v6280_v36  ;;  %v6290_v33 = vld [vmem:[#allocation26_spill] sm:$0xff] }
 0x15c   :  { %765 = vmatpush.msrb.mxu2 %v3650_v37  ;;  %781 = vmatpush.msrb.mxu3 %v6281_v10  ;;  %v6291_v37 = vld [vmem:[#allocation32_spill] sm:$0xff]  ;;  %v98_v10 = vld [vmem:[#allocation3 + $0x58] sm:$0xff] }
 0x15d   :  { %2977 = vmatmul.msk.f32.gmra.mxu0 %vm129_vm1, %v98_v10  ;;  %3006 = vmatmul.msk.f32.gmra.mxu1 %vm129_vm1, %v98_v10 }
 0x15e   :  { %766 = vmatpush.msrb.mxu2 %v3662_v41  ;;  %782 = vmatpush.msrb.mxu3 %v6283_v25  ;;  %v6292_v41 = vld [vmem:[#allocation27_spill] sm:$0xff] }
 0x160   :  { %767 = vmatpush.msrb.mxu2 %v3674_v45  ;;  %783 = vmatpush.msrb.mxu3 %v6284_v47  ;;  %v6293_v45 = vld [vmem:[#allocation34_spill] sm:$0xff]  ;;  %v6294_v47 = vld [vmem:[#allocation28_spill] sm:$0xff] }
 0x162   :  { %768 = vmatpush.msrb.mxu2 %v3721_v55  ;;  %784 = vmatpush.msrb.mxu3 %v6285_v50  ;;  %v6296_v50 = vld [vmem:[#allocation29_spill] sm:$0xff] }
 0x164   :  { %769 = vmatpush.msrb.mxu2 %v3727_v57  ;;  %785 = vmatpush.msrb.mxu3 %v3660_v40  ;;  %v6295_v40 = vld [vmem:[#allocation36_spill] sm:$0xff] }
 0x165   :  { %2978 = vmatmul.msk.f32.gmra.mxu0 %vm129_vm1, %v99_v0  ;;  %3007 = vmatmul.msk.f32.gmra.mxu1 %vm129_vm1, %v99_v0  ;;  %v4036_v0 = vpop.f32.mrf.mxu1 }
 0x166   :  { %770 = vmatpush.msrb.mxu2 %v3735_v59  ;;  %786 = vmatpush.msrb.mxu3 %v3672_v44  ;;  %v6297_v44 = vld [vmem:[#allocation38_spill] sm:$0xff] }
 0x168   :  { %771 = vmatpush.msrb.mxu2 %v3739_v61  ;;  %787 = vmatpush.msrb.mxu3 %v6288_v21 }
 0x16a   :  { %772 = vmatpush.msrb.mxu2 %v6289_v29  ;;  %788 = vmatpush.msrb.mxu3 %v6290_v33 }
 0x16c   :  { %773 = vmatpush.msrb.mxu2 %v6291_v37  ;;  %789 = vmatpush.msrb.mxu3 %v6292_v41 }
 0x16e   :  { %774 = vmatpush.msrb.mxu2 %v6293_v45  ;;  %790 = vmatpush.msrb.mxu3 %v6294_v47 }
 0x170   :  { %775 = vmatpush.msrb.mxu2 %v6295_v40  ;;  %791 = vmatpush.msrb.mxu3 %v6296_v50 }
 0x172   :  { %776 = vmatpush.msrb.mxu2 %v6297_v44  ;;  %792 = vmatpush.msrb.mxu3 %v6298_v56 }
 0x174   :  { %793 = vmatpush.msrb.mxu3 %v6299_v63 }
 0x176   :  { %794 = vmatpush.msrb.mxu3 %v6300_v1 }
 0x178   :  { %795 = vmatpush.msrb.mxu3 %v6301_v2 }
 0x17a   :  { %796 = vmatpush.msrb.mxu3 %v6302_v3  ;;  %v100_v3 = vld [vmem:[#allocation3 + $0x68] sm:$0xff] }
 0x17b   :  { %2979 = vmatmul.msk.f32.gmra.mxu0 %vm129_vm1, %v100_v3  ;;  %3008 = vmatmul.msk.f32.gmra.mxu1 %vm129_vm1, %v100_v3  ;;  %v104_v3 = vld [vmem:[#allocation3 + $0x88] sm:$0xff] }
 0x183   :  { %2980 = vmatmul.msk.f32.gmra.mxu0 %vm129_vm1, %v101_v28  ;;  %3009 = vmatmul.msk.f32.gmra.mxu1 %vm129_vm1, %v101_v28 }
 0x1b6   :  { %v652_v25 = vpop.f32.mrf.mxu2 }
 0x1be   :  { %v672_v60 = vpop.f32.mrf.mxu3  ;;  %v692_v9 = vpop.f32.mrf.mxu2 }
 0x1bf   :  { %v673_v58 = vadd.f32 %v672_v60, %v652_v25  ;;  %v105_v60 = vld [vmem:[#allocation3 + $0x90] sm:$0xff] }
 0x1c1   :  { %v715_v21 = vadd.f32 %v673_v58, %v245_v62  ;;  %v4026_v62 = vpop.f32.mrf.mxu0 }
 0x1c3   :  { %3041 = vtanh.f32 %v715_v21 }
 0x1c6   :  { %v712_v12 = vpop.f32.mrf.mxu3 }
 0x1c7   :  { %v713_v10 = vadd.f32 %v712_v12, %v692_v9 }
 0x1c9   :  { %v3042_v2 = vpop.eup %3041  ;;  %v716_v1 = vadd.f32 %v713_v10, %v346_v5  ;;  %v349_v10 = vadd.f32 %v4036_v0, %v3808_v24  ;;  %v4149_v0 = vld [vmem:[#allocation8 + $0xe8] sm:$0xff] }
 0x1ca   :  { %737 = vmatmul.f32.vlgmr.msra.gmra.mxu2 %v3042_v2 }
 0x1cb   :  { %3043 = vtanh.f32 %v716_v1  ;;  %807 = vmatpush.msra.mxu2 %v3567_v6  ;;  %v102_v1 = vld [vmem:[#allocation3 + $0x78] sm:$0xff] }
 0x1cc   :  { %2981 = vmatmul.msk.f32.gmra.mxu0 %vm129_vm1, %v102_v1  ;;  %3010 = vmatmul.msk.f32.gmra.mxu1 %vm129_vm1, %v102_v1 }
 0x1cd   :  { %808 = vmatpush.msra.mxu2 %v3571_v8 }
 0x1cf   :  { %809 = vmatpush.msra.mxu2 %v3579_v13 }
 0x1d1   :  { %v3044_v25 = vpop.eup %3043  ;;  %810 = vmatpush.msra.mxu2 %v3585_v15 }
 0x1d2   :  { %757 = vmatmul.f32.vlgmr.msra.gmra.mxu3 %v3044_v25  ;;  %777 = vmatmul.f32.vlgmr.msrb.gmra.mxu2 %v3042_v2  ;;  %v103_v2 = vld [vmem:[#allocation3 + $0x80] sm:$0xff] }
 0x1d3   :  { %827 = vmatpush.msra.mxu3 %v3569_v7  ;;  %811 = vmatpush.msra.mxu2 %v3591_v17 }
 0x1d4   :  { %2982 = vmatmul.msk.f32.gmra.mxu0 %vm129_vm1, %v103_v2  ;;  %3011 = vmatmul.msk.f32.gmra.mxu1 %vm129_vm1, %v103_v2  ;;  %v4136_v2 = vld [vmem:[#allocation8 + $0xf0] sm:$0xff] }
 0x1d5   :  { %828 = vmatpush.msra.mxu3 %v3575_v11  ;;  %812 = vmatpush.msra.mxu2 %v3597_v19 }
 0x1d7   :  { %829 = vmatpush.msra.mxu3 %v3581_v14  ;;  %813 = vmatpush.msra.mxu2 %v3605_v22 }
 0x1d9   :  { %830 = vmatpush.msra.mxu3 %v3587_v16  ;;  %814 = vmatpush.msra.mxu2 %v3616_v26 }
 0x1da   :  { %797 = vmatmul.f32.vlgmr.msrb.gmra.mxu3 %v3044_v25 }
 0x1db   :  { %831 = vmatpush.msra.mxu3 %v3593_v18  ;;  %815 = vmatpush.msra.mxu2 %v3628_v30 }
 0x1dc   :  { %2983 = vmatmul.msk.f32.gmra.mxu0 %vm129_vm1, %v104_v3  ;;  %3012 = vmatmul.msk.f32.gmra.mxu1 %vm129_vm1, %v104_v3  ;;  %v4139_v3 = vld [vmem:[#allocation8 + $0xf8] sm:$0xff] }
 0x1dd   :  { %832 = vmatpush.msra.mxu3 %v3599_v20  ;;  %816 = vmatpush.msra.mxu2 %v3640_v34 }
 0x1df   :  { %817 = vmatpush.msra.mxu2 %v3652_v38  ;;  %833 = vmatpush.msra.mxu3 %v3607_v23 }
 0x1e1   :  { %818 = vmatpush.msra.mxu2 %v3664_v42  ;;  %834 = vmatpush.msra.mxu3 %v3618_v27 }
 0x1e3   :  { %819 = vmatpush.msra.mxu2 %v3676_v46  ;;  %835 = vmatpush.msra.mxu3 %v3630_v31 }
 0x1e4   :  { %2984 = vmatmul.msk.f32.gmra.mxu0 %vm129_vm1, %v105_v60  ;;  %3013 = vmatmul.msk.f32.gmra.mxu1 %vm129_vm1, %v105_v60 }
 0x1e5   :  { %820 = vmatpush.msra.mxu2 %v3686_v49  ;;  %836 = vmatpush.msra.mxu3 %v3642_v35 }
 0x1e7   :  { %821 = vmatpush.msra.mxu2 %v3693_v51  ;;  %837 = vmatpush.msra.mxu3 %v3654_v39 }
 0x1e9   :  { %822 = vmatpush.msra.mxu2 %v6279_v32  ;;  %838 = vmatpush.msra.mxu3 %v3666_v43 }
 0x1eb   :  { %893 = vmatpush.msrb.mxu2 %v3567_v6  ;;  %839 = vmatpush.msra.mxu3 %v6286_v48  ;;  %v106_v6 = vld [vmem:[#allocation3 + $0x98] sm:$0xff] }
 0x1ec   :  { %2985 = vmatmul.msk.f32.gmra.mxu0 %vm129_vm1, %v106_v6  ;;  %3014 = vmatmul.msk.f32.gmra.mxu1 %vm129_vm1, %v106_v6  ;;  %v4146_v6 = vld [vmem:[#allocation8 + $0xe0] sm:$0xff] }
 0x1ed   :  { %894 = vmatpush.msrb.mxu2 %v3571_v8  ;;  %840 = vmatpush.msra.mxu3 %v6287_v54  ;;  %v4043_v8 = vpop.f32.mrf.mxu0 }
 0x1ef   :  { %841 = vmatpush.msra.mxu3 %v3695_v52  ;;  %895 = vmatpush.msrb.mxu2 %v3579_v13  ;;  %v4052_v13 = vpop.f32.mrf.mxu1 }
 0x1f1   :  { %842 = vmatpush.msra.mxu3 %v6280_v36  ;;  %896 = vmatpush.msrb.mxu2 %v3585_v15  ;;  %v108_v15 = vld [vmem:[#allocation3 + $0xa8] sm:$0xff] }
 0x1f3   :  { %913 = vmatpush.msrb.mxu3 %v3569_v7  ;;  %897 = vmatpush.msrb.mxu2 %v3591_v17  ;;  %v107_v7 = vld [vmem:[#allocation3 + $0xa0] sm:$0xff]  ;;  %v109_v17 = vld [vmem:[#allocation3 + $0xb0] sm:$0xff] }
 0x1f4   :  { %2986 = vmatmul.msk.f32.gmra.mxu0 %vm129_vm1, %v107_v7  ;;  %3015 = vmatmul.msk.f32.gmra.mxu1 %vm129_vm1, %v107_v7  ;;  %v4152_v7 = vld [vmem:[#allocation8 + $0xd0] sm:$0xff] }
 0x1f5   :  { %914 = vmatpush.msrb.mxu3 %v3575_v11  ;;  %898 = vmatpush.msrb.mxu2 %v3597_v19  ;;  %v4058_v11 = vpop.f32.mrf.mxu0 }
 0x1f6   :  { %6303 = vst [vmem:[#allocation24_spill] sm:$0xff] %v4058_v11 }
 0x1f7   :  { %915 = vmatpush.msrb.mxu3 %v3581_v14  ;;  %899 = vmatpush.msrb.mxu2 %v3605_v22  ;;  %v4068_v14 = vpop.f32.mrf.mxu1 }
 0x1f9   :  { %916 = vmatpush.msrb.mxu3 %v3587_v16  ;;  %900 = vmatpush.msrb.mxu2 %v3616_v26  ;;  %v111_v26 = vld [vmem:[#allocation3 + $0xc0] sm:$0xff] }
 0x1fb   :  { %917 = vmatpush.msrb.mxu3 %v3593_v18  ;;  %901 = vmatpush.msrb.mxu2 %v3628_v30  ;;  %v112_v30 = vld [vmem:[#allocation3 + $0xc8] sm:$0xff] }
 0x1fc   :  { %2987 = vmatmul.msk.f32.gmra.mxu0 %vm129_vm1, %v108_v15  ;;  %3016 = vmatmul.msk.f32.gmra.mxu1 %vm129_vm1, %v108_v15  ;;  %v4155_v15 = vld [vmem:[#allocation8 + $0xd8] sm:$0xff] }
 0x1fd   :  { %918 = vmatpush.msrb.mxu3 %v3599_v20  ;;  %902 = vmatpush.msrb.mxu2 %v3640_v34  ;;  %v4076_v16 = vpop.f32.mrf.mxu0  ;;  %v110_v20 = vld [vmem:[#allocation3 + $0xb8] sm:$0xff] }
 0x1fe   :  { %6304 = vst [vmem:[#allocation25_spill] sm:$0xff] %v4076_v16 }
 0x1ff   :  { %919 = vmatpush.msrb.mxu3 %v3607_v23  ;;  %903 = vmatpush.msrb.mxu2 %v3652_v38  ;;  %v4083_v18 = vpop.f32.mrf.mxu1 }
 0x200   :  { %6305 = vst [vmem:[#allocation16_spill] sm:$0xff] %v4083_v18 }
 0x201   :  { %920 = vmatpush.msrb.mxu3 %v3618_v27  ;;  %904 = vmatpush.msrb.mxu2 %v3664_v42  ;;  %v114_v42 = vld [vmem:[#allocation3 + $0xd8] sm:$0xff] }
 0x203   :  { %921 = vmatpush.msrb.mxu3 %v3630_v31  ;;  %905 = vmatpush.msrb.mxu2 %v3676_v46 }
 0x204   :  { %2988 = vmatmul.msk.f32.gmra.mxu0 %vm129_vm1, %v109_v17  ;;  %3017 = vmatmul.msk.f32.gmra.mxu1 %vm129_vm1, %v109_v17 }
 0x205   :  { %922 = vmatpush.msrb.mxu3 %v3642_v35  ;;  %906 = vmatpush.msrb.mxu2 %v3686_v49  ;;  %v4089_v19 = vpop.f32.mrf.mxu0  ;;  %v113_v35 = vld [vmem:[#allocation3 + $0xd0] sm:$0xff] }
 0x206   :  { %6306 = vst [vmem:[#allocation17_spill] sm:$0xff] %v4089_v19 }
 0x207   :  { %923 = vmatpush.msrb.mxu3 %v3654_v39  ;;  %907 = vmatpush.msrb.mxu2 %v3693_v51  ;;  %v4093_v22 = vpop.f32.mrf.mxu1 }
 0x208   :  { %6307 = vst [vmem:[#allocation18_spill] sm:$0xff] %v4093_v22 }
 0x209   :  { %924 = vmatpush.msrb.mxu3 %v3666_v43  ;;  %908 = vmatpush.msrb.mxu2 %v6279_v32 }
 0x20b   :  { %925 = vmatpush.msrb.mxu3 %v6286_v48 }
 0x20c   :  { %2989 = vmatmul.msk.f32.gmra.mxu0 %vm129_vm1, %v110_v20  ;;  %3018 = vmatmul.msk.f32.gmra.mxu1 %vm129_vm1, %v110_v20  ;;  %v4158_v20 = vld [vmem:[#allocation8 + $0xc0] sm:$0xff] }
 0x20d   :  { %926 = vmatpush.msrb.mxu3 %v6287_v54  ;;  %v4096_v23 = vpop.f32.mrf.mxu0  ;;  %v248_v54 = vadd.f32 %v4026_v62, %v3806_v53 }
 0x20e   :  { %6308 = vst [vmem:[#allocation19_spill] sm:$0xff] %v4096_v23 }
 0x20f   :  { %927 = vmatpush.msrb.mxu3 %v3695_v52  ;;  %v4100_v27 = vpop.f32.mrf.mxu1 }
 0x210   :  { %6309 = vst [vmem:[#allocation20_spill] sm:$0xff] %v4100_v27 }
 0x211   :  { %928 = vmatpush.msrb.mxu3 %v6280_v36 }
 0x214   :  { %2990 = vmatmul.msk.f32.gmra.mxu0 %vm129_vm1, %v111_v26  ;;  %3019 = vmatmul.msk.f32.gmra.mxu1 %vm129_vm1, %v111_v26  ;;  %v4161_v26 = vld [vmem:[#allocation8 + $0xc8] sm:$0xff] }
 0x215   :  { %v4102_v31 = vpop.f32.mrf.mxu0 }
 0x216   :  { %6310 = vst [vmem:[#allocation21_spill] sm:$0xff] %v4102_v31 }
 0x217   :  { %v4106_v34 = vpop.f32.mrf.mxu1 }
 0x218   :  { %6311 = vst [vmem:[#allocation23_spill] sm:$0xff] %v4106_v34 }
 0x21c   :  { %2991 = vmatmul.msk.f32.gmra.mxu0 %vm129_vm1, %v112_v30  ;;  %3020 = vmatmul.msk.f32.gmra.mxu1 %vm129_vm1, %v112_v30  ;;  %v4164_v30 = vld [vmem:[#allocation8 + $0x1f0] sm:$0xff] }
 0x21d   :  { %v4110_v38 = vpop.f32.mrf.mxu0 }
 0x21e   :  { %6312 = vst [vmem:[#allocation22_spill] sm:$0xff] %v4110_v38  ;;  %v4256_v38 = vld [vmem:[#allocation8 + $0x170] sm:$0xff] }
 0x21f   :  { %v4112_v39 = vpop.f32.mrf.mxu1 }
 0x220   :  { %6313 = vst [vmem:[#allocation30_spill] sm:$0xff] %v4112_v39  ;;  %v4300_v39 = vld [vmem:[#allocation8 + $0x110] sm:$0xff] }
 0x224   :  { %2992 = vmatmul.msk.f32.gmra.mxu0 %vm129_vm1, %v113_v35  ;;  %3021 = vmatmul.msk.f32.gmra.mxu1 %vm129_vm1, %v113_v35  ;;  %v4167_v35 = vld [vmem:[#allocation8 + $0x1f8] sm:$0xff] }
 0x225   :  { %v4116_v43 = vpop.f32.mrf.mxu0 }
 0x226   :  { %6314 = vst [vmem:[#allocation26_spill] sm:$0xff] %v4116_v43 }
 0x227   :  { %v4118_v46 = vpop.f32.mrf.mxu1 }
 0x228   :  { %6315 = vst [vmem:[#allocation32_spill] sm:$0xff] %v4118_v46  ;;  %v4248_v46 = vld [vmem:[#allocation8 + $0x180] sm:$0xff] }
 0x22c   :  { %2993 = vmatmul.msk.f32.gmra.mxu0 %vm129_vm1, %v114_v42  ;;  %3022 = vmatmul.msk.f32.gmra.mxu1 %vm129_vm1, %v114_v42  ;;  %v4170_v42 = vld [vmem:[#allocation8 + $0xb0] sm:$0xff] }
 0x22d   :  { %v4120_v49 = vpop.f32.mrf.mxu0 }
 0x22e   :  { %6316 = vst [vmem:[#allocation27_spill] sm:$0xff] %v4120_v49  ;;  %v4237_v49 = vld [vmem:[#allocation8 + $0x198] sm:$0xff] }
 0x22f   :  { %v4122_v51 = vpop.f32.mrf.mxu1 }
 0x230   :  { %6317 = vst [vmem:[#allocation34_spill] sm:$0xff] %v4122_v51 }
 0x235   :  { %v4124_v52 = vpop.f32.mrf.mxu0 }
 0x236   :  { %6318 = vst [vmem:[#allocation28_spill] sm:$0xff] %v4124_v52  ;;  %v4227_v52 = vld [vmem:[#allocation8 + $0x1a8] sm:$0xff] }
 0x237   :  { %v4126_v32 = vpop.f32.mrf.mxu1 }
 0x238   :  { %6319 = vst [vmem:[#allocation36_spill] sm:$0xff] %v4126_v32  ;;  %v4234_v32 = vld [vmem:[#allocation8 + $0x190] sm:$0xff] }
 0x23d   :  { %v4130_v4 = vpop.f32.mrf.mxu0 }
 0x23e   :  { %6320 = vst [vmem:[#allocation29_spill] sm:$0xff] %v4130_v4  ;;  %v4220_v4 = vld [vmem:[#allocation8 + $0x70] sm:$0xff] }
 0x23f   :  { %v4132_v5 = vpop.f32.mrf.mxu1 }
 0x240   :  { %6321 = vst [vmem:[#allocation38_spill] sm:$0xff] %v4132_v5  ;;  %v4224_v5 = vld [vmem:[#allocation8 + $0x1a0] sm:$0xff] }
 0x249   :  { %v4142_v62 = vpop.f32.mrf.mxu0  ;;  %v4144_v60 = vpop.f32.mrf.mxu1 }
 0x24a   :  { %6322 = vst [vmem:[#allocation31_spill] sm:$0xff] %v4142_v62  ;;  %v4214_v62 = vld [vmem:[#allocation8 + $0x1b0] sm:$0xff] }
 0x24b   :  { %6323 = vst [vmem:[#allocation33_spill] sm:$0xff] %v4144_v60  ;;  %v4217_v60 = vld [vmem:[#allocation8 + $0x1b8] sm:$0xff] }
 0x24d   :  { %v738_v36 = vpop.f32.mrf.mxu2 }
 0x255   :  { %v758_v48 = vpop.f32.mrf.mxu3  ;;  %v778_v9 = vpop.f32.mrf.mxu2 }
 0x256   :  { %v759_v58 = vadd.f32 %v758_v48, %v738_v36  ;;  %v4173_v36 = vld [vmem:[#allocation8 + $0xb8] sm:$0xff]  ;;  %v4176_v48 = vld [vmem:[#allocation8 + $0x1e0] sm:$0xff] }
 0x258   :  { %v801_v21 = vadd.f32 %v759_v58, %v248_v54  ;;  %v4179_v54 = vld [vmem:[#allocation8 + $0x1e8] sm:$0xff]  ;;  %v4182_v58 = vld [vmem:[#allocation8 + $0xa0] sm:$0xff] }
 0x25a   :  { %3045 = vtanh.f32 %v801_v21  ;;  %v4185_v21 = vld [vmem:[#allocation8 + $0xa8] sm:$0xff] }
 0x25d   :  { %v798_v12 = vpop.f32.mrf.mxu3 }
 0x25e   :  { %v799_v28 = vadd.f32 %v798_v12, %v778_v9  ;;  %v4188_v9 = vpop.f32.mrf.mxu0  ;;  %v4190_v12 = vpop.f32.mrf.mxu1 }
 0x25f   :  { %6324 = vst [vmem:[#allocation40_spill] sm:$0xff] %v4188_v9  ;;  %v4207_v9 = vld [vmem:[#allocation8 + $0x1c8] sm:$0xff] }
 0x260   :  { %v3046_v25 = vpop.eup %3045  ;;  %v802_v1 = vadd.f32 %v799_v28, %v349_v10  ;;  %6325 = vst [vmem:[#allocation41_spill] sm:$0xff] %v4190_v12  ;;  %v4192_v10 = vld [vmem:[#allocation8 + $0x1d0] sm:$0xff]  ;;  %v4195_v28 = vld [vmem:[#allocation8 + $0x1d8] sm:$0xff]  ;;  %v4210_v12 = vld [vmem:[#allocation8 + $0x80] sm:$0xff] }
 0x261   :  { %823 = vmatmul.f32.vlgmr.msra.gmra.mxu2 %v3046_v25  ;;  %863 = vmatmul.f32.vlgmr.msrb.gmra.mxu0 %v3046_v25  ;;  %v4198_v25 = vld [vmem:[#allocation8 + $0x90] sm:$0xff] }
 0x262   :  { %3047 = vtanh.f32 %v802_v1  ;;  %979 = vmatpush.msra.mxu2 %v4136_v2  ;;  %1019 = vmatpush.msrb.mxu0 %v4139_v3  ;;  %v4201_v1 = vld [vmem:[#allocation8 + $0x98] sm:$0xff] }
 0x264   :  { %980 = vmatpush.msra.mxu2 %v4146_v6  ;;  %1020 = vmatpush.msrb.mxu0 %v4149_v0 }
 0x266   :  { %981 = vmatpush.msra.mxu2 %v4152_v7  ;;  %1021 = vmatpush.msrb.mxu0 %v4155_v15  ;;  %v4244_v51 = vpop.f32.mrf.mxu0  ;;  %v4246_v43 = vpop.f32.mrf.mxu1 }
 0x267   :  { %6326 = vst [vmem:[#allocation42_spill] sm:$0xff] %v4244_v51  ;;  %v4264_v51 = vld [vmem:[#allocation8 + $0x160] sm:$0xff] }
 0x268   :  { %v3048_v17 = vpop.eup %3047  ;;  %982 = vmatpush.msra.mxu2 %v4158_v20  ;;  %1022 = vmatpush.msrb.mxu0 %v4161_v26  ;;  %6327 = vst [vmem:[#allocation43_spill] sm:$0xff] %v4246_v43  ;;  %v4292_v43 = vld [vmem:[#allocation8 + $0x130] sm:$0xff] }
 0x269   :  { %843 = vmatmul.f32.vlgmr.msra.gmra.mxu3 %v3048_v17  ;;  %883 = vmatmul.f32.vlgmr.msrb.gmra.mxu1 %v3048_v17  ;;  %v4204_v17 = vld [vmem:[#allocation8 + $0x1c0] sm:$0xff] }
 0x26a   :  { %999 = vmatpush.msra.mxu3 %v4164_v30  ;;  %1039 = vmatpush.msrb.mxu1 %v4167_v35 }
 0x26b   :  { %983 = vmatpush.msra.mxu2 %v4170_v42  ;;  %1023 = vmatpush.msrb.mxu0 %v4173_v36 }
 0x26c   :  { %1000 = vmatpush.msra.mxu3 %v4176_v48  ;;  %1040 = vmatpush.msrb.mxu1 %v4179_v54 }
 0x26d   :  { %984 = vmatpush.msra.mxu2 %v4182_v58  ;;  %1024 = vmatpush.msrb.mxu0 %v4185_v21 }
 0x26e   :  { %1001 = vmatpush.msra.mxu3 %v4192_v10  ;;  %1041 = vmatpush.msrb.mxu1 %v4195_v28 }
 0x26f   :  { %985 = vmatpush.msra.mxu2 %v4198_v25  ;;  %1025 = vmatpush.msrb.mxu0 %v4201_v1 }
 0x270   :  { %1002 = vmatpush.msra.mxu3 %v4204_v17  ;;  %1042 = vmatpush.msrb.mxu1 %v4207_v9 }
 0x271   :  { %986 = vmatpush.msra.mxu2 %v4210_v12  ;;  %1026 = vmatpush.msrb.mxu0 %v3721_v55  ;;  %v4230_v55 = vld [vmem:[#allocation8 + $0x60] sm:$0xff] }
 0x272   :  { %1003 = vmatpush.msra.mxu3 %v4214_v62  ;;  %1043 = vmatpush.msrb.mxu1 %v4217_v60 }
 0x273   :  { %987 = vmatpush.msra.mxu2 %v4220_v4  ;;  %1027 = vmatpush.msrb.mxu0 %v3727_v57  ;;  %v4240_v57 = vld [vmem:[#allocation8 + $0x50] sm:$0xff] }
 0x274   :  { %1004 = vmatpush.msra.mxu3 %v4224_v5  ;;  %1044 = vmatpush.msrb.mxu1 %v4227_v52 }
 0x275   :  { %988 = vmatpush.msra.mxu2 %v4230_v55  ;;  %1028 = vmatpush.msrb.mxu0 %v3735_v59  ;;  %v4252_v59 = vld [vmem:[#allocation8 + $0x40] sm:$0xff] }
 0x276   :  { %1005 = vmatpush.msra.mxu3 %v4234_v32  ;;  %1045 = vmatpush.msrb.mxu1 %v4237_v49  ;;  %6328 = vst [vmem:[#allocation44_spill] sm:$0xff] %v4252_v59 }
 0x277   :  { %989 = vmatpush.msra.mxu2 %v4240_v57  ;;  %1029 = vmatpush.msrb.mxu0 %v3739_v61  ;;  %v4260_v61 = vld [vmem:[#allocation8 + $0x30] sm:$0xff] }
 0x278   :  { %1006 = vmatpush.msra.mxu3 %v4248_v46  ;;  %1046 = vmatpush.msrb.mxu1 %v6290_v33  ;;  %6329 = vst [vmem:[#allocation45_spill] sm:$0xff] %v4260_v61  ;;  %v4268_v33 = vld [vmem:[#allocation8 + $0x20] sm:$0xff] }
 0x279   :  { %990 = vmatpush.msra.mxu2 %v4252_v59  ;;  %1030 = vmatpush.msrb.mxu0 %v6289_v29  ;;  %6330 = vst [vmem:[#allocation46_spill] sm:$0xff] %v4268_v33  ;;  %v4272_v29 = vld [vmem:[#allocation8 + $0x150] sm:$0xff] }
 0x27a   :  { %1007 = vmatpush.msra.mxu3 %v4256_v38  ;;  %1047 = vmatpush.msrb.mxu1 %v6292_v41  ;;  %v4276_v41 = vld [vmem:[#allocation8 + $0x10] sm:$0xff] }
 0x27b   :  { %991 = vmatpush.msra.mxu2 %v4260_v61  ;;  %1031 = vmatpush.msrb.mxu0 %v6291_v37  ;;  %6331 = vst [vmem:[#allocation47_spill] sm:$0xff] %v4276_v41  ;;  %v4280_v37 = vld [vmem:[#allocation8 + $0x140] sm:$0xff] }
 0x27c   :  { %1008 = vmatpush.msra.mxu3 %v4264_v51  ;;  %1048 = vmatpush.msrb.mxu1 %v6294_v47  ;;  %v4284_v47 = vld [vmem:[#allocation8] sm:$0xff] }
 0x27d   :  { %992 = vmatpush.msra.mxu2 %v4268_v33  ;;  %1032 = vmatpush.msrb.mxu0 %v6293_v45  ;;  %6332 = vst [vmem:[#allocation48_spill] sm:$0xff] %v4284_v47  ;;  %v4288_v45 = vpop.f32.mrf.mxu0 }
 0x27e   :  { %1009 = vmatpush.msra.mxu3 %v4272_v29  ;;  %1049 = vmatpush.msrb.mxu1 %v6296_v50  ;;  %6333 = vst [vmem:[#allocation49_spill] sm:$0xff] %v4288_v45  ;;  %v4290_v50 = vpop.f32.mrf.mxu1  ;;  %v4304_v45 = vld [vmem:[#allocation8 + $0x100] sm:$0xff] }
 0x27f   :  { %993 = vmatpush.msra.mxu2 %v4276_v41  ;;  %1033 = vmatpush.msrb.mxu0 %v6295_v40  ;;  %6334 = vst [vmem:[#allocation50_spill] sm:$0xff] %v4290_v50  ;;  %v4296_v40 = vld [vmem:[#allocation8 + $0x120] sm:$0xff] }
 0x280   :  { %1010 = vmatpush.msra.mxu3 %v4280_v37  ;;  %1050 = vmatpush.msrb.mxu1 %v6298_v56  ;;  %6335 = vst [vmem:[#allocation51_spill] sm:$0xff] %v4296_v40  ;;  %v6336_v56 = vld [vmem:[#allocation35_spill] sm:$0xff] }
 0x281   :  { %994 = vmatpush.msra.mxu2 %v4284_v47  ;;  %1034 = vmatpush.msrb.mxu0 %v6297_v44  ;;  %6337 = vst [vmem:[#allocation35_spill] sm:$0xff] %v4300_v39  ;;  %v6338_v44 = vld [vmem:[#allocation37_spill] sm:$0xff]  ;;  %v6340_v50 = vld [vmem:[#allocation39_spill] sm:$0xff] }
 0x282   :  { %1011 = vmatpush.msra.mxu3 %v4292_v43  ;;  %1051 = vmatpush.msrb.mxu1 %v6299_v63  ;;  %6339 = vst [vmem:[#allocation37_spill] sm:$0xff] %v4304_v45 }
 0x284   :  { %1012 = vmatpush.msra.mxu3 %v4296_v40  ;;  %1052 = vmatpush.msrb.mxu1 %v6336_v56 }
 0x285   :  { %v4308_v31 = vpop.f32.mrf.mxu0 }
 0x286   :  { %1013 = vmatpush.msra.mxu3 %v4300_v39  ;;  %1053 = vmatpush.msrb.mxu1 %v6338_v44  ;;  %6341 = vst [vmem:[#allocation39_spill] sm:$0xff] %v4308_v31  ;;  %v4310_v63 = vpop.f32.mrf.mxu1 }
 0x287   :  { %6342 = vst [vmem:[#allocation52_spill] sm:$0xff] %v4310_v63 }
 0x288   :  { %1014 = vmatpush.msra.mxu3 %v4304_v45  ;;  %1054 = vmatpush.msrb.mxu1 %v6340_v50 }
 0x28d   :  { %v4312_v34 = vpop.f32.mrf.mxu0 }
 0x28e   :  { %6343 = vst [vmem:[#allocation53_spill] sm:$0xff] %v4312_v34  ;;  %v4314_v23 = vpop.f32.mrf.mxu1 }
 0x28f   :  { %6344 = vst [vmem:[#allocation54_spill] sm:$0xff] %v4314_v23 }
 0x295   :  { %v4316_v56 = vpop.f32.mrf.mxu0 }
 0x296   :  { %6345 = vst [vmem:[#allocation55_spill] sm:$0xff] %v4316_v56  ;;  %v4318_v27 = vpop.f32.mrf.mxu1 }
 0x297   :  { %6346 = vst [vmem:[#allocation56_spill] sm:$0xff] %v4318_v27 }
 0x29d   :  { %v4320_v19 = vpop.f32.mrf.mxu0 }
 0x29e   :  { %6347 = vst [vmem:[#allocation57_spill] sm:$0xff] %v4320_v19  ;;  %v4322_v44 = vpop.f32.mrf.mxu1 }
 0x29f   :  { %6348 = vst [vmem:[#allocation58_spill] sm:$0xff] %v4322_v44 }
 0x2a5   :  { %v4324_v22 = vpop.f32.mrf.mxu0 }
 0x2a6   :  { %6349 = vst [vmem:[#allocation59_spill] sm:$0xff] %v4324_v22  ;;  %v4326_v16 = vpop.f32.mrf.mxu1 }
 0x2a7   :  { %6350 = vst [vmem:[#allocation60_spill] sm:$0xff] %v4326_v16  ;;  %v352_v16 = vadd.f32 %v4052_v13, %v3808_v24 }
 0x2ad   :  { %v4328_v50 = vpop.f32.mrf.mxu0 }
 0x2ae   :  { %6351 = vst [vmem:[#allocation61_spill] sm:$0xff] %v4328_v50  ;;  %v4330_v31 = vpop.f32.mrf.mxu1 }
 0x2af   :  { %6352 = vst [vmem:[#allocation62_spill] sm:$0xff] %v4330_v31 }
 0x2b5   :  { %v4332_v63 = vpop.f32.mrf.mxu0 }
 0x2b6   :  { %6353 = vst [vmem:[#allocation63_spill] sm:$0xff] %v4332_v63  ;;  %v4334_v34 = vpop.f32.mrf.mxu1 }
 0x2b7   :  { %6354 = vst [vmem:[#allocation64_spill] sm:$0xff] %v4334_v34  ;;  %v251_v34 = vadd.f32 %v4043_v8, %v3806_v53  ;;  %v4373_v8 = vld [vmem:[#allocation8 + $0x188] sm:$0xff] }
 0x2bd   :  { %v4336_v23 = vpop.f32.mrf.mxu0 }
 0x2be   :  { %6355 = vst [vmem:[#allocation65_spill] sm:$0xff] %v4336_v23  ;;  %v4338_v56 = vpop.f32.mrf.mxu1 }
 0x2bf   :  { %6356 = vst [vmem:[#allocation66_spill] sm:$0xff] %v4338_v56 }
 0x2c5   :  { %v4340_v27 = vpop.f32.mrf.mxu0 }
 0x2c6   :  { %6357 = vst [vmem:[#allocation67_spill] sm:$0xff] %v4340_v27  ;;  %v4342_v19 = vpop.f32.mrf.mxu1  ;;  %v4430_v27 = vld [vmem:[#allocation8 + $0x38] sm:$0xff] }
 0x2c7   :  { %6358 = vst [vmem:[#allocation68_spill] sm:$0xff] %v4342_v19  ;;  %v4433_v19 = vld [vmem:[#allocation8 + $0x108] sm:$0xff] }
 0x2c8   :  { %6363 = vst [vmem:[#allocation73_spill] sm:$0xff] %v4430_v27 }
 0x2c9   :  { %6364 = vst [vmem:[#allocation74_spill] sm:$0xff] %v4433_v19 }
 0x2de   :  { %v864_v44 = vpop.f32.mrf.mxu0 }
 0x2e4   :  { %v824_v31 = vpop.f32.mrf.mxu2 }
 0x2e6   :  { %v884_v22 = vpop.f32.mrf.mxu1 }
 0x2e7   :  { %v885_v50 = vadd.f32 %v884_v22, %v864_v44  ;;  %v4393_v22 = vld [vmem:[#allocation8 + $0x158] sm:$0xff]  ;;  %v4417_v44 = vld [vmem:[#allocation8 + $0x128] sm:$0xff] }
 0x2e8   :  { %6360 = vst [vmem:[#allocation70_spill] sm:$0xff] %v4417_v44 }
 0x2e9   :  { %v888_v18 = vadd.f32 %v885_v50, %v352_v16  ;;  %v4385_v16 = vld [vmem:[#allocation8 + $0x168] sm:$0xff] }
 0x2ea   :  { %v4422_v50 = vld [vmem:[#allocation8 + $0x48] sm:$0xff] }
 0x2eb   :  { %3049 = vtanh.f32 %v888_v18  ;;  %v4390_v18 = vld [vmem:[#allocation8 + $0x88] sm:$0xff]  ;;  %6361 = vst [vmem:[#allocation71_spill] sm:$0xff] %v4422_v50 }
 0x2ec   :  { %v844_v63 = vpop.f32.mrf.mxu3 }
 0x2ed   :  { %v845_v23 = vadd.f32 %v844_v63, %v824_v31  ;;  %v4401_v31 = vld [vmem:[#allocation8 + $0x148] sm:$0xff]  ;;  %v4409_v63 = vld [vmem:[#allocation8 + $0x138] sm:$0xff] }
 0x2ef   :  { %v887_v11 = vadd.f32 %v845_v23, %v251_v34  ;;  %v4398_v23 = vld [vmem:[#allocation8 + $0x78] sm:$0xff]  ;;  %v4406_v34 = vld [vmem:[#allocation8 + $0x68] sm:$0xff] }
 0x2f1   :  { %v3050_v56 = vpop.eup %3049  ;;  %3051 = vtanh.f32 %v887_v11  ;;  %v4379_v11 = vld [vmem:[#allocation8 + $0x178] sm:$0xff] }
 0x2f2   :  { %929 = vmatmul.f32.vlgmr.msrb.gmra.mxu3 %v3050_v56  ;;  %969 = vmatmul.f32.vlgmr.msra.gmra.mxu1 %v3050_v56  ;;  %v4414_v56 = vld [vmem:[#allocation8 + $0x58] sm:$0xff] }
 0x2f3   :  { %1085 = vmatpush.msrb.mxu3 %v4164_v30  ;;  %1125 = vmatpush.msra.mxu1 %v4167_v35  ;;  %6359 = vst [vmem:[#allocation69_spill] sm:$0xff] %v4414_v56 }
 0x2f5   :  { %1086 = vmatpush.msrb.mxu3 %v4176_v48  ;;  %1126 = vmatpush.msra.mxu1 %v4179_v54 }
 0x2f7   :  { %v3052_v13 = vpop.eup %3051  ;;  %1087 = vmatpush.msrb.mxu3 %v4192_v10  ;;  %1127 = vmatpush.msra.mxu1 %v4195_v28 }
 0x2f8   :  { %909 = vmatmul.f32.vlgmr.msrb.gmra.mxu2 %v3052_v13  ;;  %949 = vmatmul.f32.vlgmr.msra.gmra.mxu0 %v3052_v13  ;;  %v4425_v13 = vld [vmem:[#allocation8 + $0x118] sm:$0xff] }
 0x2f9   :  { %1065 = vmatpush.msrb.mxu2 %v4136_v2  ;;  %1088 = vmatpush.msrb.mxu3 %v4204_v17  ;;  %6362 = vst [vmem:[#allocation72_spill] sm:$0xff] %v4425_v13 }
 0x2fa   :  { %1105 = vmatpush.msra.mxu0 %v4139_v3  ;;  %1128 = vmatpush.msra.mxu1 %v4207_v9 }
 0x2fb   :  { %1066 = vmatpush.msrb.mxu2 %v4146_v6  ;;  %1089 = vmatpush.msrb.mxu3 %v4214_v62 }
 0x2fc   :  { %1106 = vmatpush.msra.mxu0 %v4149_v0  ;;  %1129 = vmatpush.msra.mxu1 %v4217_v60 }
 0x2fd   :  { %1067 = vmatpush.msrb.mxu2 %v4152_v7  ;;  %1090 = vmatpush.msrb.mxu3 %v4224_v5 }
 0x2fe   :  { %1107 = vmatpush.msra.mxu0 %v4155_v15  ;;  %1130 = vmatpush.msra.mxu1 %v4227_v52 }
 0x2ff   :  { %1068 = vmatpush.msrb.mxu2 %v4158_v20  ;;  %1091 = vmatpush.msrb.mxu3 %v4234_v32 }
 0x300   :  { %1108 = vmatpush.msra.mxu0 %v4161_v26  ;;  %1131 = vmatpush.msra.mxu1 %v4237_v49 }
 0x301   :  { %1069 = vmatpush.msrb.mxu2 %v4170_v42  ;;  %1092 = vmatpush.msrb.mxu3 %v4248_v46 }
 0x302   :  { %1109 = vmatpush.msra.mxu0 %v4173_v36  ;;  %1132 = vmatpush.msra.mxu1 %v4373_v8 }
 0x303   :  { %1070 = vmatpush.msrb.mxu2 %v4182_v58  ;;  %1093 = vmatpush.msrb.mxu3 %v4256_v38 }
 0x304   :  { %1110 = vmatpush.msra.mxu0 %v4185_v21  ;;  %1133 = vmatpush.msra.mxu1 %v4379_v11 }
 0x305   :  { %1071 = vmatpush.msrb.mxu2 %v4198_v25  ;;  %1094 = vmatpush.msrb.mxu3 %v4264_v51 }
 0x306   :  { %1111 = vmatpush.msra.mxu0 %v4201_v1  ;;  %1134 = vmatpush.msra.mxu1 %v4385_v16 }
 0x307   :  { %1072 = vmatpush.msrb.mxu2 %v4210_v12  ;;  %1095 = vmatpush.msrb.mxu3 %v4272_v29 }
 0x308   :  { %1112 = vmatpush.msra.mxu0 %v4390_v18  ;;  %1135 = vmatpush.msra.mxu1 %v4393_v22 }
 0x309   :  { %1073 = vmatpush.msrb.mxu2 %v4220_v4  ;;  %1096 = vmatpush.msrb.mxu3 %v4280_v37 }
 0x30a   :  { %1113 = vmatpush.msra.mxu0 %v4398_v23  ;;  %1136 = vmatpush.msra.mxu1 %v4401_v31 }
 0x30b   :  { %1074 = vmatpush.msrb.mxu2 %v4230_v55  ;;  %1097 = vmatpush.msrb.mxu3 %v4292_v43 }
 0x30c   :  { %1114 = vmatpush.msra.mxu0 %v4406_v34  ;;  %1137 = vmatpush.msra.mxu1 %v4409_v63 }
 0x30d   :  { %1075 = vmatpush.msrb.mxu2 %v4240_v57  ;;  %1098 = vmatpush.msrb.mxu3 %v4296_v40 }
 0x30e   :  { %1115 = vmatpush.msra.mxu0 %v4414_v56  ;;  %1138 = vmatpush.msra.mxu1 %v4417_v44 }
 0x30f   :  { %1076 = vmatpush.msrb.mxu2 %v4252_v59  ;;  %1099 = vmatpush.msrb.mxu3 %v4300_v39  ;;  %v4437_v39 = vld [vmem:[#allocation8 + $0x28] sm:$0xff] }
 0x310   :  { %1116 = vmatpush.msra.mxu0 %v4422_v50  ;;  %1139 = vmatpush.msra.mxu1 %v4425_v13  ;;  %6365 = vst [vmem:[#allocation75_spill] sm:$0xff] %v4437_v39  ;;  %v4441_v13 = vld [vmem:[#allocation8 + $0x18] sm:$0xff]  ;;  %v6367_v59 = vld [vmem:[#allocation24_spill] sm:$0xff] }
 0x311   :  { %1077 = vmatpush.msrb.mxu2 %v4260_v61  ;;  %1100 = vmatpush.msrb.mxu3 %v4304_v45  ;;  %6366 = vst [vmem:[#allocation76_spill] sm:$0xff] %v4441_v13  ;;  %v4445_v45 = vld [vmem:[#allocation8 + $0x8] sm:$0xff]  ;;  %v254_v44 = vadd.f32 %v6367_v59, %v3806_v53  ;;  %v6371_v59 = vld [vmem:[#allocation35_spill] sm:$0xff] }
 0x312   :  { %1117 = vmatpush.msra.mxu0 %v4430_v27  ;;  %1140 = vmatpush.msra.mxu1 %v4433_v19 }
 0x313   :  { %1078 = vmatpush.msrb.mxu2 %v4268_v33  ;;  %v355_v33 = vadd.f32 %v4068_v14, %v3808_v24 }
 0x314   :  { %1118 = vmatpush.msra.mxu0 %v4437_v39 }
 0x315   :  { %1079 = vmatpush.msrb.mxu2 %v4276_v41 }
 0x316   :  { %1119 = vmatpush.msra.mxu0 %v4441_v13 }
 0x317   :  { %1080 = vmatpush.msrb.mxu2 %v4284_v47 }
 0x318   :  { %1120 = vmatpush.msra.mxu0 %v4445_v45 }
 0x36f   :  { %v970_v27 = vpop.f32.mrf.mxu1 }
 0x375   :  { %v950_v19 = vpop.f32.mrf.mxu0  ;;  %v930_v39 = vpop.f32.mrf.mxu3 }
 0x376   :  { %v971_v61 = vadd.f32 %v970_v27, %v950_v19  ;;  %v6368_v19 = vld [vmem:[#allocation69_spill] sm:$0xff]  ;;  %v6369_v27 = vld [vmem:[#allocation70_spill] sm:$0xff] }
 0x378   :  { %v974_v50 = vadd.f32 %v971_v61, %v355_v33  ;;  %v6372_v61 = vld [vmem:[#allocation71_spill] sm:$0xff]  ;;  %v6373_v33 = vld [vmem:[#allocation72_spill] sm:$0xff] }
 0x37a   :  { %3053 = vtanh.f32 %v974_v50  ;;  %v6378_v50 = vld [vmem:[#allocation46_spill] sm:$0xff] }
 0x37b   :  { %v910_v41 = vpop.f32.mrf.mxu2 }
 0x37c   :  { %v931_v13 = vadd.f32 %v930_v39, %v910_v41  ;;  %v6370_v39 = vld [vmem:[#allocation44_spill] sm:$0xff]  ;;  %v6374_v41 = vld [vmem:[#allocation45_spill] sm:$0xff] }
 0x37e   :  { %v973_v56 = vadd.f32 %v931_v13, %v254_v44  ;;  %v6377_v44 = vld [vmem:[#allocation74_spill] sm:$0xff]  ;;  %v6379_v13 = vld [vmem:[#allocation75_spill] sm:$0xff] }
 0x380   :  { %v3054_v47 = vpop.eup %3053  ;;  %3055 = vtanh.f32 %v973_v56  ;;  %v6376_v56 = vld [vmem:[#allocation73_spill] sm:$0xff] }
 0x381   :  { %1015 = vmatmul.f32.vlgmr.msra.gmra.mxu3 %v3054_v47  ;;  %1055 = vmatmul.f32.vlgmr.msrb.gmra.mxu1 %v3054_v47  ;;  %v6375_v47 = vld [vmem:[#allocation37_spill] sm:$0xff] }
 0x382   :  { %1171 = vmatpush.msra.mxu3 %v4164_v30  ;;  %1211 = vmatpush.msrb.mxu1 %v4167_v35 }
 0x384   :  { %1172 = vmatpush.msra.mxu3 %v4176_v48  ;;  %1212 = vmatpush.msrb.mxu1 %v4179_v54 }
 0x386   :  { %v3056_v14 = vpop.eup %3055  ;;  %1173 = vmatpush.msra.mxu3 %v4192_v10  ;;  %1213 = vmatpush.msrb.mxu1 %v4195_v28 }
 0x387   :  { %995 = vmatmul.f32.vlgmr.msra.gmra.mxu2 %v3056_v14  ;;  %1035 = vmatmul.f32.vlgmr.msrb.gmra.mxu0 %v3056_v14  ;;  %v6380_v14 = vld [vmem:[#allocation47_spill] sm:$0xff] }
 0x388   :  { %1151 = vmatpush.msra.mxu2 %v4136_v2  ;;  %1174 = vmatpush.msra.mxu3 %v4204_v17 }
 0x389   :  { %1191 = vmatpush.msrb.mxu0 %v4139_v3  ;;  %1214 = vmatpush.msrb.mxu1 %v4207_v9 }
 0x38a   :  { %1152 = vmatpush.msra.mxu2 %v4146_v6  ;;  %1175 = vmatpush.msra.mxu3 %v4214_v62 }
 0x38b   :  { %1192 = vmatpush.msrb.mxu0 %v4149_v0  ;;  %1215 = vmatpush.msrb.mxu1 %v4217_v60 }
 0x38c   :  { %1153 = vmatpush.msra.mxu2 %v4152_v7  ;;  %1176 = vmatpush.msra.mxu3 %v4224_v5 }
 0x38d   :  { %1193 = vmatpush.msrb.mxu0 %v4155_v15  ;;  %1216 = vmatpush.msrb.mxu1 %v4227_v52 }
 0x38e   :  { %1154 = vmatpush.msra.mxu2 %v4158_v20  ;;  %1177 = vmatpush.msra.mxu3 %v4234_v32 }
 0x38f   :  { %1194 = vmatpush.msrb.mxu0 %v4161_v26  ;;  %1217 = vmatpush.msrb.mxu1 %v4237_v49 }
 0x390   :  { %1155 = vmatpush.msra.mxu2 %v4170_v42  ;;  %1178 = vmatpush.msra.mxu3 %v4248_v46 }
 0x391   :  { %1195 = vmatpush.msrb.mxu0 %v4173_v36  ;;  %1218 = vmatpush.msrb.mxu1 %v4373_v8 }
 0x392   :  { %1156 = vmatpush.msra.mxu2 %v4182_v58  ;;  %1179 = vmatpush.msra.mxu3 %v4256_v38 }
 0x393   :  { %1196 = vmatpush.msrb.mxu0 %v4185_v21  ;;  %1219 = vmatpush.msrb.mxu1 %v4379_v11 }
 0x394   :  { %1157 = vmatpush.msra.mxu2 %v4198_v25  ;;  %1180 = vmatpush.msra.mxu3 %v4264_v51 }
 0x395   :  { %1197 = vmatpush.msrb.mxu0 %v4201_v1  ;;  %1220 = vmatpush.msrb.mxu1 %v4385_v16 }
 0x396   :  { %1158 = vmatpush.msra.mxu2 %v4210_v12  ;;  %1181 = vmatpush.msra.mxu3 %v4272_v29 }
 0x397   :  { %1198 = vmatpush.msrb.mxu0 %v4390_v18  ;;  %1221 = vmatpush.msrb.mxu1 %v4393_v22 }
 0x398   :  { %1159 = vmatpush.msra.mxu2 %v4220_v4  ;;  %1182 = vmatpush.msra.mxu3 %v4280_v37 }
 0x399   :  { %1199 = vmatpush.msrb.mxu0 %v4398_v23  ;;  %1222 = vmatpush.msrb.mxu1 %v4401_v31 }
 0x39a   :  { %1160 = vmatpush.msra.mxu2 %v4230_v55  ;;  %1183 = vmatpush.msra.mxu3 %v4292_v43 }
 0x39b   :  { %1200 = vmatpush.msrb.mxu0 %v4406_v34  ;;  %1223 = vmatpush.msrb.mxu1 %v4409_v63 }
 0x39c   :  { %1161 = vmatpush.msra.mxu2 %v4240_v57  ;;  %1184 = vmatpush.msra.mxu3 %v4296_v40 }
 0x39d   :  { %1201 = vmatpush.msrb.mxu0 %v6368_v19  ;;  %1224 = vmatpush.msrb.mxu1 %v6369_v27 }
 0x39e   :  { %1162 = vmatpush.msra.mxu2 %v6370_v39  ;;  %1185 = vmatpush.msra.mxu3 %v6371_v59  ;;  %v6381_v39 = vld [vmem:[#allocation76_spill] sm:$0xff] }
 0x39f   :  { %1202 = vmatpush.msrb.mxu0 %v6372_v61  ;;  %1225 = vmatpush.msrb.mxu1 %v6373_v33  ;;  %v6382_v59 = vld [vmem:[#allocation48_spill] sm:$0xff] }
 0x3a0   :  { %1163 = vmatpush.msra.mxu2 %v6374_v41  ;;  %1186 = vmatpush.msra.mxu3 %v6375_v47  ;;  %v6383_v47 = vld [vmem:[#allocation16_spill] sm:$0xff] }
 0x3a1   :  { %1203 = vmatpush.msrb.mxu0 %v6376_v56  ;;  %1226 = vmatpush.msrb.mxu1 %v6377_v44  ;;  %v358_v61 = vadd.f32 %v6383_v47, %v3808_v24  ;;  %v6391_v47 = vld [vmem:[#allocation72_spill] sm:$0xff] }
 0x3a2   :  { %1164 = vmatpush.msra.mxu2 %v6378_v50 }
 0x3a3   :  { %1204 = vmatpush.msrb.mxu0 %v6379_v13  ;;  %v6384_v13 = vld [vmem:[#allocation25_spill] sm:$0xff] }
 0x3a4   :  { %1165 = vmatpush.msra.mxu2 %v6380_v14  ;;  %v257_v19 = vadd.f32 %v6384_v13, %v3806_v53  ;;  %v6395_v13 = vld [vmem:[#allocation74_spill] sm:$0xff] }
 0x3a5   :  { %1205 = vmatpush.msrb.mxu0 %v6381_v39 }
 0x3a6   :  { %1166 = vmatpush.msra.mxu2 %v6382_v59 }
 0x3a7   :  { %1206 = vmatpush.msrb.mxu0 %v4445_v45 }
 0x3fe   :  { %v1056_v33 = vpop.f32.mrf.mxu1 }
 0x404   :  { %v1036_v41 = vpop.f32.mrf.mxu0  ;;  %v1016_v44 = vpop.f32.mrf.mxu3 }
 0x405   :  { %v1057_v56 = vadd.f32 %v1056_v33, %v1036_v41  ;;  %v6389_v33 = vld [vmem:[#allocation35_spill] sm:$0xff] }
 0x406   :  { %v6390_v41 = vld [vmem:[#allocation71_spill] sm:$0xff] }
 0x407   :  { %v1060_v27 = vadd.f32 %v1057_v56, %v358_v61  ;;  %v6388_v61 = vld [vmem:[#allocation44_spill] sm:$0xff]  ;;  %v6392_v56 = vld [vmem:[#allocation45_spill] sm:$0xff] }
 0x409   :  { %3057 = vtanh.f32 %v1060_v27 }
 0x40a   :  { %v996_v50 = vpop.f32.mrf.mxu2 }
 0x40b   :  { %v1017_v14 = vadd.f32 %v1016_v44, %v996_v50  ;;  %v6393_v44 = vld [vmem:[#allocation37_spill] sm:$0xff] }
 0x40c   :  { %v6394_v50 = vld [vmem:[#allocation73_spill] sm:$0xff] }
 0x40d   :  { %v1059_v40 = vadd.f32 %v1017_v14, %v257_v19  ;;  %v6386_v19 = vld [vmem:[#allocation69_spill] sm:$0xff]  ;;  %v6396_v14 = vld [vmem:[#allocation46_spill] sm:$0xff] }
 0x40f   :  { %v3058_v39 = vpop.eup %3057  ;;  %3059 = vtanh.f32 %v1059_v40  ;;  %v6385_v40 = vld [vmem:[#allocation51_spill] sm:$0xff] }
 0x410   :  { %1101 = vmatmul.f32.vlgmr.msrb.gmra.mxu3 %v3058_v39  ;;  %1141 = vmatmul.f32.vlgmr.msra.gmra.mxu1 %v3058_v39  ;;  %v6387_v39 = vld [vmem:[#allocation70_spill] sm:$0xff] }
 0x411   :  { %1257 = vmatpush.msrb.mxu3 %v4164_v30  ;;  %1297 = vmatpush.msra.mxu1 %v4167_v35 }
 0x413   :  { %1258 = vmatpush.msrb.mxu3 %v4176_v48  ;;  %1298 = vmatpush.msra.mxu1 %v4179_v54 }
 0x415   :  { %v3060_v27 = vpop.eup %3059  ;;  %1259 = vmatpush.msrb.mxu3 %v4192_v10  ;;  %1299 = vmatpush.msra.mxu1 %v4195_v28 }
 0x416   :  { %1081 = vmatmul.f32.vlgmr.msrb.gmra.mxu2 %v3060_v27  ;;  %1121 = vmatmul.f32.vlgmr.msra.gmra.mxu0 %v3060_v27  ;;  %v6397_v27 = vld [vmem:[#allocation75_spill] sm:$0xff] }
 0x417   :  { %1237 = vmatpush.msrb.mxu2 %v4136_v2  ;;  %1260 = vmatpush.msrb.mxu3 %v4204_v17 }
 0x418   :  { %1277 = vmatpush.msra.mxu0 %v4139_v3  ;;  %1300 = vmatpush.msra.mxu1 %v4207_v9 }
 0x419   :  { %1238 = vmatpush.msrb.mxu2 %v4146_v6  ;;  %1261 = vmatpush.msrb.mxu3 %v4214_v62 }
 0x41a   :  { %1278 = vmatpush.msra.mxu0 %v4149_v0  ;;  %1301 = vmatpush.msra.mxu1 %v4217_v60 }
 0x41b   :  { %1239 = vmatpush.msrb.mxu2 %v4152_v7  ;;  %1262 = vmatpush.msrb.mxu3 %v4224_v5 }
 0x41c   :  { %1279 = vmatpush.msra.mxu0 %v4155_v15  ;;  %1302 = vmatpush.msra.mxu1 %v4227_v52 }
 0x41d   :  { %1240 = vmatpush.msrb.mxu2 %v4158_v20  ;;  %1263 = vmatpush.msrb.mxu3 %v4234_v32 }
 0x41e   :  { %1280 = vmatpush.msra.mxu0 %v4161_v26  ;;  %1303 = vmatpush.msra.mxu1 %v4237_v49 }
 0x41f   :  { %1241 = vmatpush.msrb.mxu2 %v4170_v42  ;;  %1264 = vmatpush.msrb.mxu3 %v4248_v46 }
 0x420   :  { %1281 = vmatpush.msra.mxu0 %v4173_v36  ;;  %1304 = vmatpush.msra.mxu1 %v4373_v8 }
 0x421   :  { %1242 = vmatpush.msrb.mxu2 %v4182_v58  ;;  %1265 = vmatpush.msrb.mxu3 %v4256_v38 }
 0x422   :  { %1282 = vmatpush.msra.mxu0 %v4185_v21  ;;  %1305 = vmatpush.msra.mxu1 %v4379_v11 }
 0x423   :  { %1243 = vmatpush.msrb.mxu2 %v4198_v25  ;;  %1266 = vmatpush.msrb.mxu3 %v4264_v51 }
 0x424   :  { %1283 = vmatpush.msra.mxu0 %v4201_v1  ;;  %1306 = vmatpush.msra.mxu1 %v4385_v16 }
 0x425   :  { %1244 = vmatpush.msrb.mxu2 %v4210_v12  ;;  %1267 = vmatpush.msrb.mxu3 %v4272_v29 }
 0x426   :  { %1284 = vmatpush.msra.mxu0 %v4390_v18  ;;  %1307 = vmatpush.msra.mxu1 %v4393_v22 }
 0x427   :  { %1245 = vmatpush.msrb.mxu2 %v4220_v4  ;;  %1268 = vmatpush.msrb.mxu3 %v4280_v37 }
 0x428   :  { %1285 = vmatpush.msra.mxu0 %v4398_v23  ;;  %1308 = vmatpush.msra.mxu1 %v4401_v31 }
 0x429   :  { %1246 = vmatpush.msrb.mxu2 %v4230_v55  ;;  %1269 = vmatpush.msrb.mxu3 %v4292_v43 }
 0x42a   :  { %1286 = vmatpush.msra.mxu0 %v4406_v34  ;;  %1309 = vmatpush.msra.mxu1 %v4409_v63 }
 0x42b   :  { %1247 = vmatpush.msrb.mxu2 %v4240_v57  ;;  %1270 = vmatpush.msrb.mxu3 %v6385_v40 }
 0x42c   :  { %1287 = vmatpush.msra.mxu0 %v6386_v19  ;;  %1310 = vmatpush.msra.mxu1 %v6387_v39  ;;  %v6398_v39 = vld [vmem:[#allocation47_spill] sm:$0xff] }
 0x42d   :  { %1248 = vmatpush.msrb.mxu2 %v6388_v61  ;;  %1271 = vmatpush.msrb.mxu3 %v6389_v33  ;;  %v6399_v61 = vld [vmem:[#allocation76_spill] sm:$0xff] }
 0x42e   :  { %1288 = vmatpush.msra.mxu0 %v6390_v41  ;;  %1311 = vmatpush.msra.mxu1 %v6391_v47 }
 0x42f   :  { %1249 = vmatpush.msrb.mxu2 %v6392_v56  ;;  %1272 = vmatpush.msrb.mxu3 %v6393_v44  ;;  %v6400_v44 = vld [vmem:[#allocation18_spill] sm:$0xff] }
 0x430   :  { %1289 = vmatpush.msra.mxu0 %v6394_v50  ;;  %1312 = vmatpush.msra.mxu1 %v6395_v13  ;;  %v361_v41 = vadd.f32 %v6400_v44, %v3808_v24  ;;  %v6409_v44 = vld [vmem:[#allocation45_spill] sm:$0xff] }
 0x431   :  { %1250 = vmatpush.msrb.mxu2 %v6396_v14 }
 0x432   :  { %1290 = vmatpush.msra.mxu0 %v6397_v27  ;;  %v6401_v27 = vld [vmem:[#allocation17_spill] sm:$0xff] }
 0x433   :  { %1251 = vmatpush.msrb.mxu2 %v6398_v39  ;;  %v260_v19 = vadd.f32 %v6401_v27, %v3806_v53  ;;  %v6413_v27 = vld [vmem:[#allocation46_spill] sm:$0xff] }
 0x434   :  { %1291 = vmatpush.msra.mxu0 %v6399_v61 }
 0x435   :  { %1252 = vmatpush.msrb.mxu2 %v6382_v59 }
 0x436   :  { %1292 = vmatpush.msra.mxu0 %v4445_v45 }
 0x48d   :  { %v1142_v47 = vpop.f32.mrf.mxu1 }
 0x493   :  { %v1122_v56 = vpop.f32.mrf.mxu0  ;;  %v1102_v13 = vpop.f32.mrf.mxu3 }
 0x494   :  { %v1143_v50 = vadd.f32 %v1142_v47, %v1122_v56  ;;  %v6407_v47 = vld [vmem:[#allocation71_spill] sm:$0xff]  ;;  %v6408_v56 = vld [vmem:[#allocation72_spill] sm:$0xff] }
 0x496   :  { %v1146_v33 = vadd.f32 %v1143_v50, %v361_v41  ;;  %v6406_v41 = vld [vmem:[#allocation35_spill] sm:$0xff]  ;;  %v6410_v50 = vld [vmem:[#allocation37_spill] sm:$0xff] }
 0x498   :  { %3061 = vtanh.f32 %v1146_v33 }
 0x499   :  { %v1082_v14 = vpop.f32.mrf.mxu2 }
 0x49a   :  { %v1103_v39 = vadd.f32 %v1102_v13, %v1082_v14  ;;  %v6411_v13 = vld [vmem:[#allocation73_spill] sm:$0xff]  ;;  %v6412_v14 = vld [vmem:[#allocation74_spill] sm:$0xff] }
 0x49c   :  { %v1145_v40 = vadd.f32 %v1103_v39, %v260_v19  ;;  %v6403_v19 = vld [vmem:[#allocation69_spill] sm:$0xff]  ;;  %v6404_v39 = vld [vmem:[#allocation70_spill] sm:$0xff] }
 0x49e   :  { %v3062_v61 = vpop.eup %3061  ;;  %3063 = vtanh.f32 %v1145_v40  ;;  %v6402_v40 = vld [vmem:[#allocation51_spill] sm:$0xff] }
 0x49f   :  { %1187 = vmatmul.f32.vlgmr.msra.gmra.mxu3 %v3062_v61  ;;  %1227 = vmatmul.f32.vlgmr.msrb.gmra.mxu1 %v3062_v61  ;;  %v6405_v61 = vld [vmem:[#allocation44_spill] sm:$0xff] }
 0x4a0   :  { %1343 = vmatpush.msra.mxu3 %v4164_v30  ;;  %1383 = vmatpush.msrb.mxu1 %v4167_v35 }
 0x4a2   :  { %1344 = vmatpush.msra.mxu3 %v4176_v48  ;;  %1384 = vmatpush.msrb.mxu1 %v4179_v54 }
 0x4a4   :  { %v3064_v33 = vpop.eup %3063  ;;  %1345 = vmatpush.msra.mxu3 %v4192_v10  ;;  %1385 = vmatpush.msrb.mxu1 %v4195_v28 }
 0x4a5   :  { %1167 = vmatmul.f32.vlgmr.msra.gmra.mxu2 %v3064_v33  ;;  %1207 = vmatmul.f32.vlgmr.msrb.gmra.mxu0 %v3064_v33  ;;  %v6414_v33 = vld [vmem:[#allocation75_spill] sm:$0xff] }
 0x4a6   :  { %1323 = vmatpush.msra.mxu2 %v4136_v2  ;;  %1346 = vmatpush.msra.mxu3 %v4204_v17 }
 0x4a7   :  { %1363 = vmatpush.msrb.mxu0 %v4139_v3  ;;  %1386 = vmatpush.msrb.mxu1 %v4207_v9 }
 0x4a8   :  { %1324 = vmatpush.msra.mxu2 %v4146_v6  ;;  %1347 = vmatpush.msra.mxu3 %v4214_v62 }
 0x4a9   :  { %1364 = vmatpush.msrb.mxu0 %v4149_v0  ;;  %1387 = vmatpush.msrb.mxu1 %v4217_v60 }
 0x4aa   :  { %1325 = vmatpush.msra.mxu2 %v4152_v7  ;;  %1348 = vmatpush.msra.mxu3 %v4224_v5 }
 0x4ab   :  { %1365 = vmatpush.msrb.mxu0 %v4155_v15  ;;  %1388 = vmatpush.msrb.mxu1 %v4227_v52 }
 0x4ac   :  { %1326 = vmatpush.msra.mxu2 %v4158_v20  ;;  %1349 = vmatpush.msra.mxu3 %v4234_v32 }
 0x4ad   :  { %1366 = vmatpush.msrb.mxu0 %v4161_v26  ;;  %1389 = vmatpush.msrb.mxu1 %v4237_v49 }
 0x4ae   :  { %1327 = vmatpush.msra.mxu2 %v4170_v42  ;;  %1350 = vmatpush.msra.mxu3 %v4248_v46 }
 0x4af   :  { %1367 = vmatpush.msrb.mxu0 %v4173_v36  ;;  %1390 = vmatpush.msrb.mxu1 %v4373_v8 }
 0x4b0   :  { %1328 = vmatpush.msra.mxu2 %v4182_v58  ;;  %1351 = vmatpush.msra.mxu3 %v4256_v38 }
 0x4b1   :  { %1368 = vmatpush.msrb.mxu0 %v4185_v21  ;;  %1391 = vmatpush.msrb.mxu1 %v4379_v11 }
 0x4b2   :  { %1329 = vmatpush.msra.mxu2 %v4198_v25  ;;  %1352 = vmatpush.msra.mxu3 %v4264_v51 }
 0x4b3   :  { %1369 = vmatpush.msrb.mxu0 %v4201_v1  ;;  %1392 = vmatpush.msrb.mxu1 %v4385_v16 }
 0x4b4   :  { %1330 = vmatpush.msra.mxu2 %v4210_v12  ;;  %1353 = vmatpush.msra.mxu3 %v4272_v29 }
 0x4b5   :  { %1370 = vmatpush.msrb.mxu0 %v4390_v18  ;;  %1393 = vmatpush.msrb.mxu1 %v4393_v22 }
 0x4b6   :  { %1331 = vmatpush.msra.mxu2 %v4220_v4  ;;  %1354 = vmatpush.msra.mxu3 %v4280_v37 }
 0x4b7   :  { %1371 = vmatpush.msrb.mxu0 %v4398_v23  ;;  %1394 = vmatpush.msrb.mxu1 %v4401_v31 }
 0x4b8   :  { %1332 = vmatpush.msra.mxu2 %v4230_v55  ;;  %1355 = vmatpush.msra.mxu3 %v4292_v43 }
 0x4b9   :  { %1372 = vmatpush.msrb.mxu0 %v4406_v34  ;;  %1395 = vmatpush.msrb.mxu1 %v4409_v63 }
 0x4ba   :  { %1333 = vmatpush.msra.mxu2 %v4240_v57  ;;  %1356 = vmatpush.msra.mxu3 %v6402_v40 }
 0x4bb   :  { %1373 = vmatpush.msrb.mxu0 %v6403_v19  ;;  %1396 = vmatpush.msrb.mxu1 %v6404_v39  ;;  %v6415_v39 = vld [vmem:[#allocation47_spill] sm:$0xff] }
 0x4bc   :  { %1334 = vmatpush.msra.mxu2 %v6405_v61  ;;  %1357 = vmatpush.msra.mxu3 %v6406_v41  ;;  %v6416_v61 = vld [vmem:[#allocation76_spill] sm:$0xff] }
 0x4bd   :  { %1374 = vmatpush.msrb.mxu0 %v6407_v47  ;;  %1397 = vmatpush.msrb.mxu1 %v6408_v56 }
 0x4be   :  { %1335 = vmatpush.msra.mxu2 %v6409_v44  ;;  %1358 = vmatpush.msra.mxu3 %v6410_v50  ;;  %v6417_v50 = vld [vmem:[#allocation20_spill] sm:$0xff] }
 0x4bf   :  { %1375 = vmatpush.msrb.mxu0 %v6411_v13  ;;  %1398 = vmatpush.msrb.mxu1 %v6412_v14  ;;  %v364_v47 = vadd.f32 %v6417_v50, %v3808_v24 }
 0x4c0   :  { %1336 = vmatpush.msra.mxu2 %v6413_v27 }
 0x4c1   :  { %1376 = vmatpush.msrb.mxu0 %v6414_v33  ;;  %v6418_v33 = vld [vmem:[#allocation19_spill] sm:$0xff] }
 0x4c2   :  { %1337 = vmatpush.msra.mxu2 %v6415_v39  ;;  %v263_v19 = vadd.f32 %v6418_v33, %v3806_v53  ;;  %v4826_v33 = vld [vmem:[#allocation8 + $0x10] sm:$0xff] }
 0x4c3   :  { %1377 = vmatpush.msrb.mxu0 %v6416_v61  ;;  %6439 = vst [vmem:[#allocation25_spill] sm:$0xff] %v4826_v33 }
 0x4c4   :  { %1338 = vmatpush.msra.mxu2 %v6382_v59 }
 0x4c5   :  { %1378 = vmatpush.msrb.mxu0 %v4445_v45 }
 0x51c   :  { %v1228_v56 = vpop.f32.mrf.mxu1 }
 0x522   :  { %v1208_v44 = vpop.f32.mrf.mxu0  ;;  %v1188_v14 = vpop.f32.mrf.mxu3 }
 0x523   :  { %v1229_v13 = vadd.f32 %v1228_v56, %v1208_v44  ;;  %v6435_v56 = vld [vmem:[#allocation21_spill] sm:$0xff] }
 0x524   :  { %v266_v44 = vadd.f32 %v6435_v56, %v3806_v53  ;;  %v4844_v56 = vld [vmem:[#allocation8 + $0x1e0] sm:$0xff] }
 0x525   :  { %v1232_v41 = vadd.f32 %v1229_v13, %v364_v47 }
 0x527   :  { %3065 = vtanh.f32 %v1232_v41 }
 0x528   :  { %v1168_v27 = vpop.f32.mrf.mxu2 }
 0x529   :  { %v1189_v39 = vadd.f32 %v1188_v14, %v1168_v27  ;;  %v4730_v27 = vld [vmem:[#allocation8 + $0xf0] sm:$0xff] }
 0x52b   :  { %v1231_v40 = vadd.f32 %v1189_v39, %v263_v19 }
 0x52d   :  { %v3066_v61 = vpop.eup %3065  ;;  %3067 = vtanh.f32 %v1231_v40 }
 0x52e   :  { %1273 = vmatmul.f32.vlgmr.msrb.gmra.mxu3 %v3066_v61  ;;  %1313 = vmatmul.f32.vlgmr.msra.gmra.mxu1 %v3066_v61 }
 0x52f   :  { %1429 = vmatpush.msrb.mxu3 %v4164_v30  ;;  %1469 = vmatpush.msra.mxu1 %v4167_v35 }
 0x531   :  { %1430 = vmatpush.msrb.mxu3 %v4176_v48  ;;  %1470 = vmatpush.msra.mxu1 %v4179_v54 }
 0x533   :  { %v3068_v41 = vpop.eup %3067  ;;  %1431 = vmatpush.msrb.mxu3 %v4192_v10  ;;  %1471 = vmatpush.msra.mxu1 %v4195_v28 }
 0x534   :  { %1253 = vmatmul.f32.vlgmr.msrb.gmra.mxu2 %v3068_v41  ;;  %1293 = vmatmul.f32.vlgmr.msra.gmra.mxu0 %v3068_v41  ;;  %v4830_v41 = vld [vmem:[#allocation8] sm:$0xff] }
 0x535   :  { %1409 = vmatpush.msrb.mxu2 %v4136_v2  ;;  %1432 = vmatpush.msrb.mxu3 %v4204_v17  ;;  %v6419_v2 = vld [vmem:[#allocation51_spill] sm:$0xff]  ;;  %6440 = vst [vmem:[#allocation18_spill] sm:$0xff] %v4830_v41 }
 0x536   :  { %1449 = vmatpush.msra.mxu0 %v4139_v3  ;;  %1472 = vmatpush.msra.mxu1 %v4207_v9  ;;  %v6420_v3 = vld [vmem:[#allocation69_spill] sm:$0xff] }
 0x537   :  { %1410 = vmatpush.msrb.mxu2 %v4146_v6  ;;  %1433 = vmatpush.msrb.mxu3 %v4214_v62  ;;  %v6422_v6 = vld [vmem:[#allocation44_spill] sm:$0xff] }
 0x538   :  { %1450 = vmatpush.msra.mxu0 %v4149_v0  ;;  %1473 = vmatpush.msra.mxu1 %v4217_v60  ;;  %v6423_v0 = vld [vmem:[#allocation35_spill] sm:$0xff] }
 0x539   :  { %1411 = vmatpush.msrb.mxu2 %v4152_v7  ;;  %1434 = vmatpush.msrb.mxu3 %v4224_v5  ;;  %v6424_v7 = vld [vmem:[#allocation71_spill] sm:$0xff] }
 0x53a   :  { %1451 = vmatpush.msra.mxu0 %v4155_v15  ;;  %1474 = vmatpush.msra.mxu1 %v4227_v52  ;;  %v6425_v15 = vld [vmem:[#allocation72_spill] sm:$0xff] }
 0x53b   :  { %1412 = vmatpush.msrb.mxu2 %v4158_v20  ;;  %1435 = vmatpush.msrb.mxu3 %v4234_v32  ;;  %v6426_v20 = vld [vmem:[#allocation45_spill] sm:$0xff] }
 0x53c   :  { %1452 = vmatpush.msra.mxu0 %v4161_v26  ;;  %1475 = vmatpush.msra.mxu1 %v4237_v49  ;;  %v6427_v26 = vld [vmem:[#allocation37_spill] sm:$0xff] }
 0x53d   :  { %1413 = vmatpush.msrb.mxu2 %v4170_v42  ;;  %1436 = vmatpush.msrb.mxu3 %v4248_v46  ;;  %v6428_v42 = vld [vmem:[#allocation73_spill] sm:$0xff] }
 0x53e   :  { %1453 = vmatpush.msra.mxu0 %v4173_v36  ;;  %1476 = vmatpush.msra.mxu1 %v4373_v8  ;;  %v6429_v36 = vld [vmem:[#allocation74_spill] sm:$0xff] }
 0x53f   :  { %1414 = vmatpush.msrb.mxu2 %v4182_v58  ;;  %1437 = vmatpush.msrb.mxu3 %v4256_v38  ;;  %v6430_v58 = vld [vmem:[#allocation46_spill] sm:$0xff] }
 0x540   :  { %1454 = vmatpush.msra.mxu0 %v4185_v21  ;;  %1477 = vmatpush.msra.mxu1 %v4379_v11  ;;  %v6431_v21 = vld [vmem:[#allocation75_spill] sm:$0xff] }
 0x541   :  { %1415 = vmatpush.msrb.mxu2 %v4198_v25  ;;  %1438 = vmatpush.msrb.mxu3 %v4264_v51  ;;  %v6433_v25 = vld [vmem:[#allocation76_spill] sm:$0xff] }
 0x542   :  { %1455 = vmatpush.msra.mxu0 %v4201_v1  ;;  %1478 = vmatpush.msra.mxu1 %v4385_v16 }
 0x543   :  { %1416 = vmatpush.msrb.mxu2 %v4210_v12  ;;  %1439 = vmatpush.msrb.mxu3 %v4272_v29  ;;  %v6432_v12 = vld [vmem:[#allocation47_spill] sm:$0xff] }
 0x544   :  { %1456 = vmatpush.msra.mxu0 %v4390_v18  ;;  %1479 = vmatpush.msra.mxu1 %v4393_v22 }
 0x545   :  { %1417 = vmatpush.msrb.mxu2 %v4220_v4  ;;  %1440 = vmatpush.msrb.mxu3 %v4280_v37  ;;  %v6421_v4 = vld [vmem:[#allocation70_spill] sm:$0xff] }
 0x546   :  { %1457 = vmatpush.msra.mxu0 %v4398_v23  ;;  %1480 = vmatpush.msra.mxu1 %v4401_v31 }
 0x547   :  { %1418 = vmatpush.msrb.mxu2 %v4230_v55  ;;  %1441 = vmatpush.msrb.mxu3 %v4292_v43 }
 0x548   :  { %1458 = vmatpush.msra.mxu0 %v4406_v34  ;;  %1481 = vmatpush.msra.mxu1 %v4409_v63 }
 0x549   :  { %1419 = vmatpush.msrb.mxu2 %v4240_v57  ;;  %1442 = vmatpush.msrb.mxu3 %v6419_v2  ;;  %v6434_v57 = vld [vmem:[#allocation23_spill] sm:$0xff] }
 0x54a   :  { %1459 = vmatpush.msra.mxu0 %v6420_v3  ;;  %1482 = vmatpush.msra.mxu1 %v6421_v4  ;;  %v367_v40 = vadd.f32 %v6434_v57, %v3808_v24 }
 0x54b   :  { %1420 = vmatpush.msrb.mxu2 %v6422_v6  ;;  %1443 = vmatpush.msrb.mxu3 %v6423_v0 }
 0x54c   :  { %1460 = vmatpush.msra.mxu0 %v6424_v7  ;;  %1483 = vmatpush.msra.mxu1 %v6425_v15 }
 0x54d   :  { %1421 = vmatpush.msrb.mxu2 %v6426_v20  ;;  %1444 = vmatpush.msrb.mxu3 %v6427_v26 }
 0x54e   :  { %1461 = vmatpush.msra.mxu0 %v6428_v42  ;;  %1484 = vmatpush.msra.mxu1 %v6429_v36 }
 0x54f   :  { %1422 = vmatpush.msrb.mxu2 %v6430_v58 }
 0x550   :  { %1462 = vmatpush.msra.mxu0 %v6431_v21 }
 0x551   :  { %1423 = vmatpush.msrb.mxu2 %v6432_v12 }
 0x552   :  { %1463 = vmatpush.msra.mxu0 %v6433_v25 }
 0x553   :  { %1424 = vmatpush.msrb.mxu2 %v6382_v59 }
 0x554   :  { %1464 = vmatpush.msra.mxu0 %v4445_v45 }
 0x5ab   :  { %v1314_v1 = vpop.f32.mrf.mxu1 }
 0x5b1   :  { %v1294_v55 = vpop.f32.mrf.mxu0  ;;  %v1274_v61 = vpop.f32.mrf.mxu3 }
 0x5b2   :  { %v1315_v19 = vadd.f32 %v1314_v1, %v1294_v55  ;;  %v6442_v55 = vld [vmem:[#allocation22_spill] sm:$0xff] }
 0x5b3   :  { %v269_v57 = vadd.f32 %v6442_v55, %v3806_v53  ;;  %v4895_v55 = vld [vmem:[#allocation8 + $0x170] sm:$0xff] }
 0x5b4   :  { %v1318_v39 = vadd.f32 %v1315_v19, %v367_v40 }
 0x5b6   :  { %3069 = vtanh.f32 %v1318_v39 }
 0x5b7   :  { %v1254_v47 = vpop.f32.mrf.mxu2 }
 0x5b8   :  { %v1275_v50 = vadd.f32 %v1274_v61, %v1254_v47  ;;  %v4838_v61 = vld [vmem:[#allocation8 + $0x1f0] sm:$0xff]  ;;  %v4841_v47 = vld [vmem:[#allocation8 + $0x1f8] sm:$0xff] }
 0x5ba   :  { %v1317_v13 = vadd.f32 %v1275_v50, %v266_v44  ;;  %v4847_v44 = vld [vmem:[#allocation8 + $0x1e8] sm:$0xff] }
 0x5bc   :  { %v3070_v14 = vpop.eup %3069  ;;  %3071 = vtanh.f32 %v1317_v13  ;;  %v4850_v13 = vld [vmem:[#allocation8 + $0x1d0] sm:$0xff] }
 0x5bd   :  { %1359 = vmatmul.f32.vlgmr.msra.gmra.mxu3 %v3070_v14  ;;  %1399 = vmatmul.f32.vlgmr.msrb.gmra.mxu1 %v3070_v14  ;;  %v4853_v14 = vld [vmem:[#allocation8 + $0x1d8] sm:$0xff] }
 0x5be   :  { %1515 = vmatpush.msra.mxu3 %v4164_v30  ;;  %1555 = vmatpush.msrb.mxu1 %v4167_v35  ;;  %v4734_v30 = vld [vmem:[#allocation8 + $0xf8] sm:$0xff]  ;;  %v4738_v35 = vld [vmem:[#allocation8 + $0xe0] sm:$0xff] }
 0x5c0   :  { %1516 = vmatpush.msra.mxu3 %v4176_v48  ;;  %1556 = vmatpush.msrb.mxu1 %v4179_v54  ;;  %v4742_v48 = vld [vmem:[#allocation8 + $0xe8] sm:$0xff]  ;;  %v4746_v54 = vld [vmem:[#allocation8 + $0xd0] sm:$0xff] }
 0x5c2   :  { %v3072_v59 = vpop.eup %3071  ;;  %1517 = vmatpush.msra.mxu3 %v4192_v10  ;;  %1557 = vmatpush.msrb.mxu1 %v4195_v28  ;;  %v4750_v10 = vld [vmem:[#allocation8 + $0xd8] sm:$0xff]  ;;  %v4786_v28 = vld [vmem:[#allocation8 + $0x80] sm:$0xff] }
 0x5c3   :  { %1339 = vmatmul.f32.vlgmr.msra.gmra.mxu2 %v3072_v59  ;;  %1379 = vmatmul.f32.vlgmr.msrb.gmra.mxu0 %v3072_v59  ;;  %v4857_v59 = vld [vmem:[#allocation8 + $0x1c0] sm:$0xff] }
 0x5c4   :  { %1495 = vmatpush.msra.mxu2 %v4730_v27  ;;  %1518 = vmatpush.msra.mxu3 %v4204_v17  ;;  %v4804_v17 = vld [vmem:[#allocation8 + $0x50] sm:$0xff] }
 0x5c5   :  { %1535 = vmatpush.msrb.mxu0 %v4734_v30  ;;  %1558 = vmatpush.msrb.mxu1 %v4207_v9  ;;  %v4754_v9 = vld [vmem:[#allocation8 + $0xc0] sm:$0xff] }
 0x5c6   :  { %1496 = vmatpush.msra.mxu2 %v4738_v35  ;;  %1519 = vmatpush.msra.mxu3 %v4214_v62  ;;  %v4758_v62 = vld [vmem:[#allocation8 + $0xc8] sm:$0xff] }
 0x5c7   :  { %1536 = vmatpush.msrb.mxu0 %v4742_v48  ;;  %1559 = vmatpush.msrb.mxu1 %v4217_v60  ;;  %v4762_v60 = vld [vmem:[#allocation8 + $0xb0] sm:$0xff] }
 0x5c8   :  { %1497 = vmatpush.msra.mxu2 %v4746_v54  ;;  %1520 = vmatpush.msra.mxu3 %v4224_v5  ;;  %v4766_v5 = vld [vmem:[#allocation8 + $0xb8] sm:$0xff] }
 0x5c9   :  { %1537 = vmatpush.msrb.mxu0 %v4750_v10  ;;  %1560 = vmatpush.msrb.mxu1 %v4227_v52  ;;  %v4770_v52 = vld [vmem:[#allocation8 + $0xa0] sm:$0xff] }
 0x5ca   :  { %1498 = vmatpush.msra.mxu2 %v4754_v9  ;;  %1521 = vmatpush.msra.mxu3 %v4234_v32  ;;  %v4774_v32 = vld [vmem:[#allocation8 + $0xa8] sm:$0xff] }
 0x5cb   :  { %1538 = vmatpush.msrb.mxu0 %v4758_v62  ;;  %1561 = vmatpush.msrb.mxu1 %v4237_v49  ;;  %v4778_v49 = vld [vmem:[#allocation8 + $0x90] sm:$0xff] }
 0x5cc   :  { %1499 = vmatpush.msra.mxu2 %v4762_v60  ;;  %1522 = vmatpush.msra.mxu3 %v4248_v46  ;;  %v4782_v46 = vld [vmem:[#allocation8 + $0x98] sm:$0xff] }
 0x5cd   :  { %1539 = vmatpush.msrb.mxu0 %v4766_v5  ;;  %1562 = vmatpush.msrb.mxu1 %v4373_v8 }
 0x5ce   :  { %1500 = vmatpush.msra.mxu2 %v4770_v52  ;;  %1523 = vmatpush.msra.mxu3 %v4256_v38  ;;  %v4792_v38 = vld [vmem:[#allocation8 + $0x70] sm:$0xff] }
 0x5cf   :  { %1540 = vmatpush.msrb.mxu0 %v4774_v32  ;;  %1563 = vmatpush.msrb.mxu1 %v4379_v11 }
 0x5d0   :  { %1501 = vmatpush.msra.mxu2 %v4778_v49  ;;  %1524 = vmatpush.msra.mxu3 %v4264_v51  ;;  %v4798_v51 = vld [vmem:[#allocation8 + $0x60] sm:$0xff] }
 0x5d1   :  { %1541 = vmatpush.msrb.mxu0 %v4782_v46  ;;  %1564 = vmatpush.msrb.mxu1 %v4385_v16 }
 0x5d2   :  { %1502 = vmatpush.msra.mxu2 %v4786_v28  ;;  %1525 = vmatpush.msra.mxu3 %v4272_v29  ;;  %v4810_v29 = vld [vmem:[#allocation8 + $0x40] sm:$0xff] }
 0x5d3   :  { %1542 = vmatpush.msrb.mxu0 %v4390_v18  ;;  %1565 = vmatpush.msrb.mxu1 %v4393_v22  ;;  %6436 = vst [vmem:[#allocation24_spill] sm:$0xff] %v4810_v29 }
 0x5d4   :  { %1503 = vmatpush.msra.mxu2 %v4792_v38  ;;  %1526 = vmatpush.msra.mxu3 %v4280_v37  ;;  %v4822_v37 = vld [vmem:[#allocation8 + $0x20] sm:$0xff] }
 0x5d5   :  { %1543 = vmatpush.msrb.mxu0 %v4398_v23  ;;  %1566 = vmatpush.msrb.mxu1 %v4401_v31  ;;  %6438 = vst [vmem:[#allocation16_spill] sm:$0xff] %v4822_v37 }
 0x5d6   :  { %1504 = vmatpush.msra.mxu2 %v4798_v51  ;;  %1527 = vmatpush.msra.mxu3 %v4292_v43  ;;  %v4816_v43 = vld [vmem:[#allocation8 + $0x30] sm:$0xff] }
 0x5d7   :  { %1544 = vmatpush.msrb.mxu0 %v4406_v34  ;;  %1567 = vmatpush.msrb.mxu1 %v4409_v63  ;;  %6437 = vst [vmem:[#allocation48_spill] sm:$0xff] %v4816_v43 }
 0x5d8   :  { %1505 = vmatpush.msra.mxu2 %v4804_v17  ;;  %1528 = vmatpush.msra.mxu3 %v6419_v2 }
 0x5d9   :  { %1545 = vmatpush.msrb.mxu0 %v6420_v3  ;;  %1568 = vmatpush.msrb.mxu1 %v6421_v4 }
 0x5da   :  { %1506 = vmatpush.msra.mxu2 %v4810_v29  ;;  %1529 = vmatpush.msra.mxu3 %v6423_v0  ;;  %v6441_v0 = vld [vmem:[#allocation30_spill] sm:$0xff] }
 0x5db   :  { %1546 = vmatpush.msrb.mxu0 %v6424_v7  ;;  %1569 = vmatpush.msrb.mxu1 %v6425_v15  ;;  %v370_v20 = vadd.f32 %v6441_v0, %v3808_v24  ;;  %v4869_v0 = vld [vmem:[#allocation8 + $0x1b8] sm:$0xff] }
 0x5dc   :  { %1507 = vmatpush.msra.mxu2 %v4816_v43  ;;  %1530 = vmatpush.msra.mxu3 %v6427_v26 }
 0x5dd   :  { %1547 = vmatpush.msrb.mxu0 %v6428_v42  ;;  %1570 = vmatpush.msrb.mxu1 %v6429_v36 }
 0x5de   :  { %1508 = vmatpush.msra.mxu2 %v4822_v37 }
 0x5df   :  { %1548 = vmatpush.msrb.mxu0 %v6431_v21 }
 0x5e0   :  { %1509 = vmatpush.msra.mxu2 %v4826_v33 }
 0x5e1   :  { %1549 = vmatpush.msrb.mxu0 %v6433_v25 }
 0x5e2   :  { %1510 = vmatpush.msra.mxu2 %v4830_v41 }
 0x5e3   :  { %1550 = vmatpush.msrb.mxu0 %v4445_v45 }
 0x63a   :  { %v1400_v2 = vpop.f32.mrf.mxu1 }
 0x640   :  { %v1380_v6 = vpop.f32.mrf.mxu0  ;;  %v1360_v12 = vpop.f32.mrf.mxu3 }
 0x641   :  { %v1401_v26 = vadd.f32 %v1400_v2, %v1380_v6  ;;  %v4861_v2 = vld [vmem:[#allocation8 + $0x1c8] sm:$0xff]  ;;  %v4865_v6 = vld [vmem:[#allocation8 + $0x1b0] sm:$0xff] }
 0x643   :  { %v1404_v58 = vadd.f32 %v1401_v26, %v370_v20  ;;  %v4873_v20 = vld [vmem:[#allocation8 + $0x1a0] sm:$0xff]  ;;  %v4877_v26 = vld [vmem:[#allocation8 + $0x1a8] sm:$0xff] }
 0x645   :  { %3073 = vtanh.f32 %v1404_v58  ;;  %v4881_v58 = vld [vmem:[#allocation8 + $0x190] sm:$0xff] }
 0x646   :  { %v1340_v1 = vpop.f32.mrf.mxu2 }
 0x647   :  { %v1361_v40 = vadd.f32 %v1360_v12, %v1340_v1  ;;  %v4885_v12 = vld [vmem:[#allocation8 + $0x198] sm:$0xff]  ;;  %v4889_v1 = vld [vmem:[#allocation8 + $0x180] sm:$0xff] }
 0x649   :  { %v1403_v19 = vadd.f32 %v1361_v40, %v269_v57  ;;  %v4901_v57 = vld [vmem:[#allocation8 + $0x160] sm:$0xff] }
 0x64b   :  { %v3074_v39 = vpop.eup %3073  ;;  %3075 = vtanh.f32 %v1403_v19 }
 0x64c   :  { %1445 = vmatmul.f32.vlgmr.msrb.gmra.mxu3 %v3074_v39  ;;  %1485 = vmatmul.f32.vlgmr.msra.gmra.mxu1 %v3074_v39  ;;  %v4977_v39 = vld [vmem:[#allocation8 + $0x188] sm:$0xff] }
 0x64d   :  { %1601 = vmatpush.msrb.mxu3 %v4838_v61  ;;  %1641 = vmatpush.msra.mxu1 %v4841_v47 }
 0x64f   :  { %1602 = vmatpush.msrb.mxu3 %v4844_v56  ;;  %1642 = vmatpush.msra.mxu1 %v4847_v44 }
 0x651   :  { %v3076_v50 = vpop.eup %3075  ;;  %1603 = vmatpush.msrb.mxu3 %v4850_v13  ;;  %1643 = vmatpush.msra.mxu1 %v4853_v14 }
 0x652   :  { %1425 = vmatmul.f32.vlgmr.msrb.gmra.mxu2 %v3076_v50  ;;  %1465 = vmatmul.f32.vlgmr.msra.gmra.mxu0 %v3076_v50  ;;  %v4983_v50 = vld [vmem:[#allocation8 + $0x178] sm:$0xff] }
 0x653   :  { %1581 = vmatpush.msrb.mxu2 %v4730_v27  ;;  %1604 = vmatpush.msrb.mxu3 %v4857_v59 }
 0x654   :  { %1621 = vmatpush.msra.mxu0 %v4734_v30  ;;  %1644 = vmatpush.msra.mxu1 %v4861_v2 }
 0x655   :  { %1582 = vmatpush.msrb.mxu2 %v4738_v35  ;;  %1605 = vmatpush.msrb.mxu3 %v4865_v6 }
 0x656   :  { %1622 = vmatpush.msra.mxu0 %v4742_v48  ;;  %1645 = vmatpush.msra.mxu1 %v4869_v0 }
 0x657   :  { %1583 = vmatpush.msrb.mxu2 %v4746_v54  ;;  %1606 = vmatpush.msrb.mxu3 %v4873_v20 }
 0x658   :  { %1623 = vmatpush.msra.mxu0 %v4750_v10  ;;  %1646 = vmatpush.msra.mxu1 %v4877_v26 }
 0x659   :  { %1584 = vmatpush.msrb.mxu2 %v4754_v9  ;;  %1607 = vmatpush.msrb.mxu3 %v4881_v58 }
 0x65a   :  { %1624 = vmatpush.msra.mxu0 %v4758_v62  ;;  %1647 = vmatpush.msra.mxu1 %v4885_v12 }
 0x65b   :  { %1585 = vmatpush.msrb.mxu2 %v4762_v60  ;;  %1608 = vmatpush.msrb.mxu3 %v4889_v1 }
 0x65c   :  { %1625 = vmatpush.msra.mxu0 %v4766_v5  ;;  %1648 = vmatpush.msra.mxu1 %v4373_v8  ;;  %v4907_v8 = vld [vmem:[#allocation8 + $0x150] sm:$0xff] }
 0x65d   :  { %1586 = vmatpush.msrb.mxu2 %v4770_v52  ;;  %1609 = vmatpush.msrb.mxu3 %v4895_v55 }
 0x65e   :  { %1626 = vmatpush.msra.mxu0 %v4774_v32  ;;  %1649 = vmatpush.msra.mxu1 %v4379_v11  ;;  %v4913_v11 = vld [vmem:[#allocation8 + $0x140] sm:$0xff] }
 0x65f   :  { %1587 = vmatpush.msrb.mxu2 %v4778_v49  ;;  %1610 = vmatpush.msrb.mxu3 %v4901_v57 }
 0x660   :  { %1627 = vmatpush.msra.mxu0 %v4782_v46  ;;  %1650 = vmatpush.msra.mxu1 %v4385_v16  ;;  %v4919_v16 = vld [vmem:[#allocation8 + $0x130] sm:$0xff] }
 0x661   :  { %1588 = vmatpush.msrb.mxu2 %v4786_v28  ;;  %1611 = vmatpush.msrb.mxu3 %v4907_v8 }
 0x662   :  { %1628 = vmatpush.msra.mxu0 %v4390_v18  ;;  %1651 = vmatpush.msra.mxu1 %v4393_v22  ;;  %v4925_v18 = vld [vmem:[#allocation8 + $0x120] sm:$0xff]  ;;  %v4931_v22 = vld [vmem:[#allocation8 + $0x110] sm:$0xff] }
 0x663   :  { %1589 = vmatpush.msrb.mxu2 %v4792_v38  ;;  %1612 = vmatpush.msrb.mxu3 %v4913_v11  ;;  %6443 = vst [vmem:[#allocation17_spill] sm:$0xff] %v4925_v18 }
 0x664   :  { %1629 = vmatpush.msra.mxu0 %v4398_v23  ;;  %1652 = vmatpush.msra.mxu1 %v4401_v31  ;;  %6444 = vst [vmem:[#allocation20_spill] sm:$0xff] %v4931_v22  ;;  %v4937_v23 = vld [vmem:[#allocation8 + $0x100] sm:$0xff] }
 0x665   :  { %1590 = vmatpush.msrb.mxu2 %v4798_v51  ;;  %1613 = vmatpush.msrb.mxu3 %v4919_v16  ;;  %6445 = vst [vmem:[#allocation19_spill] sm:$0xff] %v4937_v23 }
 0x666   :  { %1630 = vmatpush.msra.mxu0 %v4406_v34  ;;  %1653 = vmatpush.msra.mxu1 %v4409_v63  ;;  %v6446_v63 = vld [vmem:[#allocation32_spill] sm:$0xff] }
 0x667   :  { %1591 = vmatpush.msrb.mxu2 %v4804_v17  ;;  %1614 = vmatpush.msrb.mxu3 %v4925_v18 }
 0x668   :  { %1631 = vmatpush.msra.mxu0 %v6420_v3  ;;  %1654 = vmatpush.msra.mxu1 %v6421_v4  ;;  %v373_v3 = vadd.f32 %v6446_v63, %v3808_v24  ;;  %v4997_v63 = vld [vmem:[#allocation8 + $0x158] sm:$0xff] }
 0x669   :  { %1592 = vmatpush.msrb.mxu2 %v4810_v29  ;;  %1615 = vmatpush.msrb.mxu3 %v4931_v22 }
 0x66a   :  { %1632 = vmatpush.msra.mxu0 %v6424_v7  ;;  %1655 = vmatpush.msra.mxu1 %v6425_v15 }
 0x66b   :  { %1593 = vmatpush.msrb.mxu2 %v4816_v43  ;;  %1616 = vmatpush.msrb.mxu3 %v4937_v23 }
 0x66c   :  { %1633 = vmatpush.msra.mxu0 %v6428_v42  ;;  %1656 = vmatpush.msra.mxu1 %v6429_v36  ;;  %v6447_v36 = vld [vmem:[#allocation26_spill] sm:$0xff] }
 0x66d   :  { %1594 = vmatpush.msrb.mxu2 %v4822_v37 }
 0x66e   :  { %1634 = vmatpush.msra.mxu0 %v6431_v21  ;;  %v272_v21 = vadd.f32 %v6447_v36, %v3806_v53  ;;  %v5021_v36 = vld [vmem:[#allocation8 + $0x128] sm:$0xff] }
 0x66f   :  { %1595 = vmatpush.msrb.mxu2 %v4826_v33  ;;  %6449 = vst [vmem:[#allocation69_spill] sm:$0xff] %v5021_v36 }
 0x670   :  { %1635 = vmatpush.msra.mxu0 %v6433_v25 }
 0x671   :  { %1596 = vmatpush.msrb.mxu2 %v4830_v41 }
 0x672   :  { %1636 = vmatpush.msra.mxu0 %v4445_v45 }
 0x6c9   :  { %v1486_v31 = vpop.f32.mrf.mxu1 }
 0x6cf   :  { %v1466_v34 = vpop.f32.mrf.mxu0  ;;  %v1446_v15 = vpop.f32.mrf.mxu3 }
 0x6d0   :  { %v1487_v4 = vadd.f32 %v1486_v31, %v1466_v34  ;;  %v4989_v31 = vld [vmem:[#allocation8 + $0x168] sm:$0xff] }
 0x6d1   :  { %v4994_v34 = vld [vmem:[#allocation8 + $0x88] sm:$0xff] }
 0x6d2   :  { %v1490_v7 = vadd.f32 %v1487_v4, %v373_v3  ;;  %v5002_v3 = vld [vmem:[#allocation8 + $0x78] sm:$0xff]  ;;  %v5005_v4 = vld [vmem:[#allocation8 + $0x148] sm:$0xff] }
 0x6d4   :  { %3077 = vtanh.f32 %v1490_v7  ;;  %v5010_v7 = vld [vmem:[#allocation8 + $0x68] sm:$0xff] }
 0x6d5   :  { %v1426_v42 = vpop.f32.mrf.mxu2 }
 0x6d6   :  { %v1447_v40 = vadd.f32 %v1446_v15, %v1426_v42  ;;  %v5013_v15 = vld [vmem:[#allocation8 + $0x138] sm:$0xff] }
 0x6d7   :  { %v5018_v42 = vld [vmem:[#allocation8 + $0x58] sm:$0xff] }
 0x6d8   :  { %v1489_v19 = vadd.f32 %v1447_v40, %v272_v21  ;;  %6448 = vst [vmem:[#allocation51_spill] sm:$0xff] %v5018_v42  ;;  %v5026_v21 = vld [vmem:[#allocation8 + $0x48] sm:$0xff]  ;;  %v5029_v40 = vld [vmem:[#allocation8 + $0x118] sm:$0xff] }
 0x6d9   :  { %6450 = vst [vmem:[#allocation70_spill] sm:$0xff] %v5026_v21 }
 0x6da   :  { %v3078_v25 = vpop.eup %3077  ;;  %3079 = vtanh.f32 %v1489_v19  ;;  %6451 = vst [vmem:[#allocation44_spill] sm:$0xff] %v5029_v40  ;;  %v5034_v19 = vld [vmem:[#allocation8 + $0x38] sm:$0xff] }
 0x6db   :  { %1531 = vmatmul.f32.vlgmr.msra.gmra.mxu3 %v3078_v25  ;;  %1571 = vmatmul.f32.vlgmr.msrb.gmra.mxu1 %v3078_v25  ;;  %6452 = vst [vmem:[#allocation35_spill] sm:$0xff] %v5034_v19  ;;  %v5037_v25 = vld [vmem:[#allocation8 + $0x108] sm:$0xff] }
 0x6dc   :  { %1687 = vmatpush.msra.mxu3 %v4838_v61  ;;  %1727 = vmatpush.msrb.mxu1 %v4841_v47  ;;  %6453 = vst [vmem:[#allocation71_spill] sm:$0xff] %v5037_v25 }
 0x6de   :  { %1688 = vmatpush.msra.mxu3 %v4844_v56  ;;  %1728 = vmatpush.msrb.mxu1 %v4847_v44 }
 0x6e0   :  { %v3080_v45 = vpop.eup %3079  ;;  %1689 = vmatpush.msra.mxu3 %v4850_v13  ;;  %1729 = vmatpush.msrb.mxu1 %v4853_v14 }
 0x6e1   :  { %1511 = vmatmul.f32.vlgmr.msra.gmra.mxu2 %v3080_v45  ;;  %1551 = vmatmul.f32.vlgmr.msrb.gmra.mxu0 %v3080_v45  ;;  %v5041_v45 = vld [vmem:[#allocation8 + $0x28] sm:$0xff] }
 0x6e2   :  { %1667 = vmatpush.msra.mxu2 %v4730_v27  ;;  %1690 = vmatpush.msra.mxu3 %v4857_v59  ;;  %6454 = vst [vmem:[#allocation72_spill] sm:$0xff] %v5041_v45 }
 0x6e3   :  { %1707 = vmatpush.msrb.mxu0 %v4734_v30  ;;  %1730 = vmatpush.msrb.mxu1 %v4861_v2 }
 0x6e4   :  { %1668 = vmatpush.msra.mxu2 %v4738_v35  ;;  %1691 = vmatpush.msra.mxu3 %v4865_v6 }
 0x6e5   :  { %1708 = vmatpush.msrb.mxu0 %v4742_v48  ;;  %1731 = vmatpush.msrb.mxu1 %v4869_v0 }
 0x6e6   :  { %1669 = vmatpush.msra.mxu2 %v4746_v54  ;;  %1692 = vmatpush.msra.mxu3 %v4873_v20 }
 0x6e7   :  { %1709 = vmatpush.msrb.mxu0 %v4750_v10  ;;  %1732 = vmatpush.msrb.mxu1 %v4877_v26 }
 0x6e8   :  { %1670 = vmatpush.msra.mxu2 %v4754_v9  ;;  %1693 = vmatpush.msra.mxu3 %v4881_v58 }
 0x6e9   :  { %1710 = vmatpush.msrb.mxu0 %v4758_v62  ;;  %1733 = vmatpush.msrb.mxu1 %v4885_v12 }
 0x6ea   :  { %1671 = vmatpush.msra.mxu2 %v4762_v60  ;;  %1694 = vmatpush.msra.mxu3 %v4889_v1 }
 0x6eb   :  { %1711 = vmatpush.msrb.mxu0 %v4766_v5  ;;  %1734 = vmatpush.msrb.mxu1 %v4977_v39 }
 0x6ec   :  { %1672 = vmatpush.msra.mxu2 %v4770_v52  ;;  %1695 = vmatpush.msra.mxu3 %v4895_v55 }
 0x6ed   :  { %1712 = vmatpush.msrb.mxu0 %v4774_v32  ;;  %1735 = vmatpush.msrb.mxu1 %v4983_v50 }
 0x6ee   :  { %1673 = vmatpush.msra.mxu2 %v4778_v49  ;;  %1696 = vmatpush.msra.mxu3 %v4901_v57 }
 0x6ef   :  { %1713 = vmatpush.msrb.mxu0 %v4782_v46  ;;  %1736 = vmatpush.msrb.mxu1 %v4989_v31 }
 0x6f0   :  { %1674 = vmatpush.msra.mxu2 %v4786_v28  ;;  %1697 = vmatpush.msra.mxu3 %v4907_v8 }
 0x6f1   :  { %1714 = vmatpush.msrb.mxu0 %v4994_v34  ;;  %1737 = vmatpush.msrb.mxu1 %v4997_v63 }
 0x6f2   :  { %1675 = vmatpush.msra.mxu2 %v4792_v38  ;;  %1698 = vmatpush.msra.mxu3 %v4913_v11 }
 0x6f3   :  { %1715 = vmatpush.msrb.mxu0 %v5002_v3  ;;  %1738 = vmatpush.msrb.mxu1 %v5005_v4 }
 0x6f4   :  { %1676 = vmatpush.msra.mxu2 %v4798_v51  ;;  %1699 = vmatpush.msra.mxu3 %v4919_v16 }
 0x6f5   :  { %1716 = vmatpush.msrb.mxu0 %v5010_v7  ;;  %1739 = vmatpush.msrb.mxu1 %v5013_v15 }
 0x6f6   :  { %1677 = vmatpush.msra.mxu2 %v4804_v17  ;;  %1700 = vmatpush.msra.mxu3 %v4925_v18 }
 0x6f7   :  { %1717 = vmatpush.msrb.mxu0 %v5018_v42  ;;  %1740 = vmatpush.msrb.mxu1 %v5021_v36 }
 0x6f8   :  { %1678 = vmatpush.msra.mxu2 %v4810_v29  ;;  %1701 = vmatpush.msra.mxu3 %v4931_v22  ;;  %v6457_v29 = vld [vmem:[#allocation27_spill] sm:$0xff] }
 0x6f9   :  { %1718 = vmatpush.msrb.mxu0 %v5026_v21  ;;  %1741 = vmatpush.msrb.mxu1 %v5029_v40  ;;  %v5045_v40 = vld [vmem:[#allocation8 + $0x18] sm:$0xff]  ;;  %v275_v36 = vadd.f32 %v6457_v29, %v3806_v53  ;;  %v6458_v29 = vld [vmem:[#allocation51_spill] sm:$0xff] }
 0x6fa   :  { %1679 = vmatpush.msra.mxu2 %v4816_v43  ;;  %1702 = vmatpush.msra.mxu3 %v4937_v23  ;;  %6455 = vst [vmem:[#allocation45_spill] sm:$0xff] %v5045_v40  ;;  %v5049_v23 = vld [vmem:[#allocation8 + $0x8] sm:$0xff] }
 0x6fb   :  { %1719 = vmatpush.msrb.mxu0 %v5034_v19  ;;  %1742 = vmatpush.msrb.mxu1 %v5037_v25 }
 0x6fc   :  { %1680 = vmatpush.msra.mxu2 %v4822_v37  ;;  %v6456_v37 = vld [vmem:[#allocation34_spill] sm:$0xff] }
 0x6fd   :  { %1720 = vmatpush.msrb.mxu0 %v5041_v45  ;;  %v376_v43 = vadd.f32 %v6456_v37, %v3808_v24  ;;  %v6459_v37 = vld [vmem:[#allocation69_spill] sm:$0xff] }
 0x6fe   :  { %1681 = vmatpush.msra.mxu2 %v4826_v33 }
 0x6ff   :  { %1721 = vmatpush.msrb.mxu0 %v5045_v40 }
 0x700   :  { %1682 = vmatpush.msra.mxu2 %v4830_v41 }
 0x701   :  { %1722 = vmatpush.msrb.mxu0 %v5049_v23 }
 0x758   :  { %v1572_v19 = vpop.f32.mrf.mxu1 }
 0x75e   :  { %v1552_v25 = vpop.f32.mrf.mxu0  ;;  %v1532_v45 = vpop.f32.mrf.mxu3 }
 0x75f   :  { %v1573_v21 = vadd.f32 %v1572_v19, %v1552_v25  ;;  %v6467_v19 = vld [vmem:[#allocation71_spill] sm:$0xff]  ;;  %v6468_v25 = vld [vmem:[#allocation16_spill] sm:$0xff] }
 0x761   :  { %v1576_v22 = vadd.f32 %v1573_v21, %v376_v43  ;;  %v6465_v21 = vld [vmem:[#allocation19_spill] sm:$0xff] }
 0x763   :  { %3081 = vtanh.f32 %v1576_v22  ;;  %v6462_v22 = vld [vmem:[#allocation70_spill] sm:$0xff] }
 0x764   :  { %v1512_v33 = vpop.f32.mrf.mxu2 }
 0x765   :  { %v1533_v40 = vadd.f32 %v1532_v45, %v1512_v33  ;;  %v6460_v33 = vld [vmem:[#allocation24_spill] sm:$0xff] }
 0x766   :  { %v6469_v45 = vld [vmem:[#allocation72_spill] sm:$0xff] }
 0x767   :  { %v1575_v42 = vadd.f32 %v1533_v40, %v275_v36  ;;  %v6464_v36 = vld [vmem:[#allocation48_spill] sm:$0xff]  ;;  %v6466_v40 = vld [vmem:[#allocation35_spill] sm:$0xff] }
 0x769   :  { %v3082_v41 = vpop.eup %3081  ;;  %3083 = vtanh.f32 %v1575_v42  ;;  %v6463_v42 = vld [vmem:[#allocation44_spill] sm:$0xff] }
 0x76a   :  { %1617 = vmatmul.f32.vlgmr.msrb.gmra.mxu3 %v3082_v41  ;;  %1657 = vmatmul.f32.vlgmr.msra.gmra.mxu1 %v3082_v41  ;;  %v6461_v41 = vld [vmem:[#allocation20_spill] sm:$0xff] }
 0x76b   :  { %1773 = vmatpush.msrb.mxu3 %v4838_v61  ;;  %1813 = vmatpush.msra.mxu1 %v4841_v47 }
 0x76d   :  { %1774 = vmatpush.msrb.mxu3 %v4844_v56  ;;  %1814 = vmatpush.msra.mxu1 %v4847_v44 }
 0x76f   :  { %v3084_v43 = vpop.eup %3083  ;;  %1775 = vmatpush.msrb.mxu3 %v4850_v13  ;;  %1815 = vmatpush.msra.mxu1 %v4853_v14 }
 0x770   :  { %1597 = vmatmul.f32.vlgmr.msrb.gmra.mxu2 %v3084_v43  ;;  %1637 = vmatmul.f32.vlgmr.msra.gmra.mxu0 %v3084_v43  ;;  %v6470_v43 = vld [vmem:[#allocation25_spill] sm:$0xff] }
 0x771   :  { %1753 = vmatpush.msrb.mxu2 %v4730_v27  ;;  %1776 = vmatpush.msrb.mxu3 %v4857_v59 }
 0x772   :  { %1793 = vmatpush.msra.mxu0 %v4734_v30  ;;  %1816 = vmatpush.msra.mxu1 %v4861_v2 }
 0x773   :  { %1754 = vmatpush.msrb.mxu2 %v4738_v35  ;;  %1777 = vmatpush.msrb.mxu3 %v4865_v6 }
 0x774   :  { %1794 = vmatpush.msra.mxu0 %v4742_v48  ;;  %1817 = vmatpush.msra.mxu1 %v4869_v0 }
 0x775   :  { %1755 = vmatpush.msrb.mxu2 %v4746_v54  ;;  %1778 = vmatpush.msrb.mxu3 %v4873_v20 }
 0x776   :  { %1795 = vmatpush.msra.mxu0 %v4750_v10  ;;  %1818 = vmatpush.msra.mxu1 %v4877_v26 }
 0x777   :  { %1756 = vmatpush.msrb.mxu2 %v4754_v9  ;;  %1779 = vmatpush.msrb.mxu3 %v4881_v58 }
 0x778   :  { %1796 = vmatpush.msra.mxu0 %v4758_v62  ;;  %1819 = vmatpush.msra.mxu1 %v4885_v12 }
 0x779   :  { %1757 = vmatpush.msrb.mxu2 %v4762_v60  ;;  %1780 = vmatpush.msrb.mxu3 %v4889_v1 }
 0x77a   :  { %1797 = vmatpush.msra.mxu0 %v4766_v5  ;;  %1820 = vmatpush.msra.mxu1 %v4977_v39 }
 0x77b   :  { %1758 = vmatpush.msrb.mxu2 %v4770_v52  ;;  %1781 = vmatpush.msrb.mxu3 %v4895_v55 }
 0x77c   :  { %1798 = vmatpush.msra.mxu0 %v4774_v32  ;;  %1821 = vmatpush.msra.mxu1 %v4983_v50 }
 0x77d   :  { %1759 = vmatpush.msrb.mxu2 %v4778_v49  ;;  %1782 = vmatpush.msrb.mxu3 %v4901_v57 }
 0x77e   :  { %1799 = vmatpush.msra.mxu0 %v4782_v46  ;;  %1822 = vmatpush.msra.mxu1 %v4989_v31 }
 0x77f   :  { %1760 = vmatpush.msrb.mxu2 %v4786_v28  ;;  %1783 = vmatpush.msrb.mxu3 %v4907_v8 }
 0x780   :  { %1800 = vmatpush.msra.mxu0 %v4994_v34  ;;  %1823 = vmatpush.msra.mxu1 %v4997_v63 }
 0x781   :  { %1761 = vmatpush.msrb.mxu2 %v4792_v38  ;;  %1784 = vmatpush.msrb.mxu3 %v4913_v11 }
 0x782   :  { %1801 = vmatpush.msra.mxu0 %v5002_v3  ;;  %1824 = vmatpush.msra.mxu1 %v5005_v4 }
 0x783   :  { %1762 = vmatpush.msrb.mxu2 %v4798_v51  ;;  %1785 = vmatpush.msrb.mxu3 %v4919_v16 }
 0x784   :  { %1802 = vmatpush.msra.mxu0 %v5010_v7  ;;  %1825 = vmatpush.msra.mxu1 %v5013_v15 }
 0x785   :  { %1763 = vmatpush.msrb.mxu2 %v4804_v17  ;;  %1786 = vmatpush.msrb.mxu3 %v4925_v18 }
 0x786   :  { %1803 = vmatpush.msra.mxu0 %v6458_v29  ;;  %1826 = vmatpush.msra.mxu1 %v6459_v37 }
 0x787   :  { %1764 = vmatpush.msrb.mxu2 %v6460_v33  ;;  %1787 = vmatpush.msrb.mxu3 %v6461_v41  ;;  %v6471_v33 = vld [vmem:[#allocation45_spill] sm:$0xff]  ;;  %v6472_v41 = vld [vmem:[#allocation18_spill] sm:$0xff] }
 0x788   :  { %1804 = vmatpush.msra.mxu0 %v6462_v22  ;;  %1827 = vmatpush.msra.mxu1 %v6463_v42 }
 0x789   :  { %1765 = vmatpush.msrb.mxu2 %v6464_v36  ;;  %1788 = vmatpush.msrb.mxu3 %v6465_v21  ;;  %v6473_v21 = vld [vmem:[#allocation36_spill] sm:$0xff] }
 0x78a   :  { %1805 = vmatpush.msra.mxu0 %v6466_v40  ;;  %1828 = vmatpush.msra.mxu1 %v6467_v19  ;;  %v379_v22 = vadd.f32 %v6473_v21, %v3808_v24  ;;  %v6481_v21 = vld [vmem:[#allocation44_spill] sm:$0xff] }
 0x78b   :  { %1766 = vmatpush.msrb.mxu2 %v6468_v25 }
 0x78c   :  { %1806 = vmatpush.msra.mxu0 %v6469_v45  ;;  %v6474_v45 = vld [vmem:[#allocation28_spill] sm:$0xff] }
 0x78d   :  { %1767 = vmatpush.msrb.mxu2 %v6470_v43  ;;  %v278_v29 = vadd.f32 %v6474_v45, %v3806_v53  ;;  %v6485_v45 = vld [vmem:[#allocation71_spill] sm:$0xff] }
 0x78e   :  { %1807 = vmatpush.msra.mxu0 %v6471_v33 }
 0x78f   :  { %1768 = vmatpush.msrb.mxu2 %v6472_v41 }
 0x790   :  { %1808 = vmatpush.msra.mxu0 %v5049_v23 }
 0x7e7   :  { %v1658_v42 = vpop.f32.mrf.mxu1 }
 0x7ed   :  { %v1638_v36 = vpop.f32.mrf.mxu0  ;;  %v1618_v19 = vpop.f32.mrf.mxu3 }
 0x7ee   :  { %v1659_v40 = vadd.f32 %v1658_v42, %v1638_v36  ;;  %v6479_v42 = vld [vmem:[#allocation20_spill] sm:$0xff]  ;;  %v6480_v36 = vld [vmem:[#allocation70_spill] sm:$0xff] }
 0x7f0   :  { %v1662_v37 = vadd.f32 %v1659_v40, %v379_v22  ;;  %v6478_v22 = vld [vmem:[#allocation24_spill] sm:$0xff] }
 0x7f1   :  { %v6482_v40 = vld [vmem:[#allocation48_spill] sm:$0xff] }
 0x7f2   :  { %3085 = vtanh.f32 %v1662_v37 }
 0x7f3   :  { %v1598_v25 = vpop.f32.mrf.mxu2 }
 0x7f4   :  { %v1619_v43 = vadd.f32 %v1618_v19, %v1598_v25  ;;  %v6483_v19 = vld [vmem:[#allocation19_spill] sm:$0xff] }
 0x7f5   :  { %v6484_v25 = vld [vmem:[#allocation35_spill] sm:$0xff] }
 0x7f6   :  { %v1661_v18 = vadd.f32 %v1619_v43, %v278_v29  ;;  %v6476_v29 = vld [vmem:[#allocation51_spill] sm:$0xff]  ;;  %v6486_v43 = vld [vmem:[#allocation16_spill] sm:$0xff] }
 0x7f8   :  { %v3086_v33 = vpop.eup %3085  ;;  %3087 = vtanh.f32 %v1661_v18  ;;  %v6475_v18 = vld [vmem:[#allocation17_spill] sm:$0xff] }
 0x7f9   :  { %1703 = vmatmul.f32.vlgmr.msra.gmra.mxu3 %v3086_v33  ;;  %1743 = vmatmul.f32.vlgmr.msrb.gmra.mxu1 %v3086_v33  ;;  %v6477_v33 = vld [vmem:[#allocation69_spill] sm:$0xff] }
 0x7fa   :  { %1859 = vmatpush.msra.mxu3 %v4838_v61  ;;  %1899 = vmatpush.msrb.mxu1 %v4841_v47 }
 0x7fc   :  { %1860 = vmatpush.msra.mxu3 %v4844_v56  ;;  %1900 = vmatpush.msrb.mxu1 %v4847_v44 }
 0x7fe   :  { %v3088_v37 = vpop.eup %3087  ;;  %1861 = vmatpush.msra.mxu3 %v4850_v13  ;;  %1901 = vmatpush.msrb.mxu1 %v4853_v14 }
 0x7ff   :  { %1683 = vmatmul.f32.vlgmr.msra.gmra.mxu2 %v3088_v37  ;;  %1723 = vmatmul.f32.vlgmr.msrb.gmra.mxu0 %v3088_v37  ;;  %v6487_v37 = vld [vmem:[#allocation72_spill] sm:$0xff] }
 0x800   :  { %1839 = vmatpush.msra.mxu2 %v4730_v27  ;;  %1862 = vmatpush.msra.mxu3 %v4857_v59 }
 0x801   :  { %1879 = vmatpush.msrb.mxu0 %v4734_v30  ;;  %1902 = vmatpush.msrb.mxu1 %v4861_v2 }
 0x802   :  { %1840 = vmatpush.msra.mxu2 %v4738_v35  ;;  %1863 = vmatpush.msra.mxu3 %v4865_v6 }
 0x803   :  { %1880 = vmatpush.msrb.mxu0 %v4742_v48  ;;  %1903 = vmatpush.msrb.mxu1 %v4869_v0 }
 0x804   :  { %1841 = vmatpush.msra.mxu2 %v4746_v54  ;;  %1864 = vmatpush.msra.mxu3 %v4873_v20 }
 0x805   :  { %1881 = vmatpush.msrb.mxu0 %v4750_v10  ;;  %1904 = vmatpush.msrb.mxu1 %v4877_v26 }
 0x806   :  { %1842 = vmatpush.msra.mxu2 %v4754_v9  ;;  %1865 = vmatpush.msra.mxu3 %v4881_v58 }
 0x807   :  { %1882 = vmatpush.msrb.mxu0 %v4758_v62  ;;  %1905 = vmatpush.msrb.mxu1 %v4885_v12 }
 0x808   :  { %1843 = vmatpush.msra.mxu2 %v4762_v60  ;;  %1866 = vmatpush.msra.mxu3 %v4889_v1 }
 0x809   :  { %1883 = vmatpush.msrb.mxu0 %v4766_v5  ;;  %1906 = vmatpush.msrb.mxu1 %v4977_v39 }
 0x80a   :  { %1844 = vmatpush.msra.mxu2 %v4770_v52  ;;  %1867 = vmatpush.msra.mxu3 %v4895_v55 }
 0x80b   :  { %1884 = vmatpush.msrb.mxu0 %v4774_v32  ;;  %1907 = vmatpush.msrb.mxu1 %v4983_v50 }
 0x80c   :  { %1845 = vmatpush.msra.mxu2 %v4778_v49  ;;  %1868 = vmatpush.msra.mxu3 %v4901_v57 }
 0x80d   :  { %1885 = vmatpush.msrb.mxu0 %v4782_v46  ;;  %1908 = vmatpush.msrb.mxu1 %v4989_v31 }
 0x80e   :  { %1846 = vmatpush.msra.mxu2 %v4786_v28  ;;  %1869 = vmatpush.msra.mxu3 %v4907_v8 }
 0x80f   :  { %1886 = vmatpush.msrb.mxu0 %v4994_v34  ;;  %1909 = vmatpush.msrb.mxu1 %v4997_v63 }
 0x810   :  { %1847 = vmatpush.msra.mxu2 %v4792_v38  ;;  %1870 = vmatpush.msra.mxu3 %v4913_v11 }
 0x811   :  { %1887 = vmatpush.msrb.mxu0 %v5002_v3  ;;  %1910 = vmatpush.msrb.mxu1 %v5005_v4 }
 0x812   :  { %1848 = vmatpush.msra.mxu2 %v4798_v51  ;;  %1871 = vmatpush.msra.mxu3 %v4919_v16 }
 0x813   :  { %1888 = vmatpush.msrb.mxu0 %v5010_v7  ;;  %1911 = vmatpush.msrb.mxu1 %v5013_v15 }
 0x814   :  { %1849 = vmatpush.msra.mxu2 %v4804_v17  ;;  %1872 = vmatpush.msra.mxu3 %v6475_v18 }
 0x815   :  { %1889 = vmatpush.msrb.mxu0 %v6476_v29  ;;  %1912 = vmatpush.msrb.mxu1 %v6477_v33  ;;  %v6488_v33 = vld [vmem:[#allocation25_spill] sm:$0xff] }
 0x816   :  { %1850 = vmatpush.msra.mxu2 %v6478_v22  ;;  %1873 = vmatpush.msra.mxu3 %v6479_v42  ;;  %v6489_v22 = vld [vmem:[#allocation45_spill] sm:$0xff] }
 0x817   :  { %1890 = vmatpush.msrb.mxu0 %v6480_v36  ;;  %1913 = vmatpush.msrb.mxu1 %v6481_v21 }
 0x818   :  { %1851 = vmatpush.msra.mxu2 %v6482_v40  ;;  %1874 = vmatpush.msra.mxu3 %v6483_v19  ;;  %v6490_v19 = vld [vmem:[#allocation38_spill] sm:$0xff] }
 0x819   :  { %1891 = vmatpush.msrb.mxu0 %v6484_v25  ;;  %1914 = vmatpush.msrb.mxu1 %v6485_v45  ;;  %v382_v36 = vadd.f32 %v6490_v19, %v3808_v24  ;;  %v6499_v19 = vld [vmem:[#allocation48_spill] sm:$0xff] }
 0x81a   :  { %1852 = vmatpush.msra.mxu2 %v6486_v43 }
 0x81b   :  { %1892 = vmatpush.msrb.mxu0 %v6487_v37  ;;  %v6491_v37 = vld [vmem:[#allocation29_spill] sm:$0xff] }
 0x81c   :  { %1853 = vmatpush.msra.mxu2 %v6488_v33  ;;  %v281_v29 = vadd.f32 %v6491_v37, %v3806_v53  ;;  %v6503_v37 = vld [vmem:[#allocation16_spill] sm:$0xff] }
 0x81d   :  { %1893 = vmatpush.msrb.mxu0 %v6489_v22 }
 0x81e   :  { %1854 = vmatpush.msra.mxu2 %v6472_v41 }
 0x81f   :  { %1894 = vmatpush.msrb.mxu0 %v5049_v23 }
 0x876   :  { %v1744_v21 = vpop.f32.mrf.mxu1 }
 0x87c   :  { %v1724_v40 = vpop.f32.mrf.mxu0  ;;  %v1704_v45 = vpop.f32.mrf.mxu3 }
 0x87d   :  { %v1745_v25 = vadd.f32 %v1744_v21, %v1724_v40  ;;  %v6497_v21 = vld [vmem:[#allocation70_spill] sm:$0xff]  ;;  %v6498_v40 = vld [vmem:[#allocation44_spill] sm:$0xff] }
 0x87f   :  { %v1748_v42 = vadd.f32 %v1745_v25, %v382_v36  ;;  %v6496_v36 = vld [vmem:[#allocation20_spill] sm:$0xff]  ;;  %v6500_v25 = vld [vmem:[#allocation19_spill] sm:$0xff] }
 0x881   :  { %3089 = vtanh.f32 %v1748_v42 }
 0x882   :  { %v1684_v43 = vpop.f32.mrf.mxu2 }
 0x883   :  { %v1705_v33 = vadd.f32 %v1704_v45, %v1684_v43  ;;  %v6501_v45 = vld [vmem:[#allocation35_spill] sm:$0xff] }
 0x884   :  { %v6502_v43 = vld [vmem:[#allocation71_spill] sm:$0xff] }
 0x885   :  { %v1747_v18 = vadd.f32 %v1705_v33, %v281_v29  ;;  %v6493_v29 = vld [vmem:[#allocation51_spill] sm:$0xff]  ;;  %v6494_v33 = vld [vmem:[#allocation69_spill] sm:$0xff] }
 0x887   :  { %v3090_v22 = vpop.eup %3089  ;;  %3091 = vtanh.f32 %v1747_v18  ;;  %v6492_v18 = vld [vmem:[#allocation17_spill] sm:$0xff] }
 0x888   :  { %1789 = vmatmul.f32.vlgmr.msrb.gmra.mxu3 %v3090_v22  ;;  %1829 = vmatmul.f32.vlgmr.msra.gmra.mxu1 %v3090_v22  ;;  %v6495_v22 = vld [vmem:[#allocation24_spill] sm:$0xff] }
 0x889   :  { %1945 = vmatpush.msrb.mxu3 %v4838_v61  ;;  %1985 = vmatpush.msra.mxu1 %v4841_v47 }
 0x88b   :  { %1946 = vmatpush.msrb.mxu3 %v4844_v56  ;;  %1986 = vmatpush.msra.mxu1 %v4847_v44 }
 0x88d   :  { %v3092_v42 = vpop.eup %3091  ;;  %1947 = vmatpush.msrb.mxu3 %v4850_v13  ;;  %1987 = vmatpush.msra.mxu1 %v4853_v14 }
 0x88e   :  { %1769 = vmatmul.f32.vlgmr.msrb.gmra.mxu2 %v3092_v42  ;;  %1809 = vmatmul.f32.vlgmr.msra.gmra.mxu0 %v3092_v42  ;;  %v6504_v42 = vld [vmem:[#allocation72_spill] sm:$0xff] }
 0x88f   :  { %1925 = vmatpush.msrb.mxu2 %v4730_v27  ;;  %1948 = vmatpush.msrb.mxu3 %v4857_v59 }
 0x890   :  { %1965 = vmatpush.msra.mxu0 %v4734_v30  ;;  %1988 = vmatpush.msra.mxu1 %v4861_v2 }
 0x891   :  { %1926 = vmatpush.msrb.mxu2 %v4738_v35  ;;  %1949 = vmatpush.msrb.mxu3 %v4865_v6 }
 0x892   :  { %1966 = vmatpush.msra.mxu0 %v4742_v48  ;;  %1989 = vmatpush.msra.mxu1 %v4869_v0 }
 0x893   :  { %1927 = vmatpush.msrb.mxu2 %v4746_v54  ;;  %1950 = vmatpush.msrb.mxu3 %v4873_v20 }
 0x894   :  { %1967 = vmatpush.msra.mxu0 %v4750_v10  ;;  %1990 = vmatpush.msra.mxu1 %v4877_v26 }
 0x895   :  { %1928 = vmatpush.msrb.mxu2 %v4754_v9  ;;  %1951 = vmatpush.msrb.mxu3 %v4881_v58 }
 0x896   :  { %1968 = vmatpush.msra.mxu0 %v4758_v62  ;;  %1991 = vmatpush.msra.mxu1 %v4885_v12 }
 0x897   :  { %1929 = vmatpush.msrb.mxu2 %v4762_v60  ;;  %1952 = vmatpush.msrb.mxu3 %v4889_v1 }
 0x898   :  { %1969 = vmatpush.msra.mxu0 %v4766_v5  ;;  %1992 = vmatpush.msra.mxu1 %v4977_v39 }
 0x899   :  { %1930 = vmatpush.msrb.mxu2 %v4770_v52  ;;  %1953 = vmatpush.msrb.mxu3 %v4895_v55 }
 0x89a   :  { %1970 = vmatpush.msra.mxu0 %v4774_v32  ;;  %1993 = vmatpush.msra.mxu1 %v4983_v50 }
 0x89b   :  { %1931 = vmatpush.msrb.mxu2 %v4778_v49  ;;  %1954 = vmatpush.msrb.mxu3 %v4901_v57 }
 0x89c   :  { %1971 = vmatpush.msra.mxu0 %v4782_v46  ;;  %1994 = vmatpush.msra.mxu1 %v4989_v31 }
 0x89d   :  { %1932 = vmatpush.msrb.mxu2 %v4786_v28  ;;  %1955 = vmatpush.msrb.mxu3 %v4907_v8 }
 0x89e   :  { %1972 = vmatpush.msra.mxu0 %v4994_v34  ;;  %1995 = vmatpush.msra.mxu1 %v4997_v63 }
 0x89f   :  { %1933 = vmatpush.msrb.mxu2 %v4792_v38  ;;  %1956 = vmatpush.msrb.mxu3 %v4913_v11 }
 0x8a0   :  { %1973 = vmatpush.msra.mxu0 %v5002_v3  ;;  %1996 = vmatpush.msra.mxu1 %v5005_v4 }
 0x8a1   :  { %1934 = vmatpush.msrb.mxu2 %v4798_v51  ;;  %1957 = vmatpush.msrb.mxu3 %v4919_v16 }
 0x8a2   :  { %1974 = vmatpush.msra.mxu0 %v5010_v7  ;;  %1997 = vmatpush.msra.mxu1 %v5013_v15 }
 0x8a3   :  { %1935 = vmatpush.msrb.mxu2 %v4804_v17  ;;  %1958 = vmatpush.msrb.mxu3 %v6492_v18 }
 0x8a4   :  { %1975 = vmatpush.msra.mxu0 %v6493_v29  ;;  %1998 = vmatpush.msra.mxu1 %v6494_v33  ;;  %v6505_v33 = vld [vmem:[#allocation25_spill] sm:$0xff] }
 0x8a5   :  { %1936 = vmatpush.msrb.mxu2 %v6495_v22  ;;  %1959 = vmatpush.msrb.mxu3 %v6496_v36  ;;  %v6506_v22 = vld [vmem:[#allocation45_spill] sm:$0xff] }
 0x8a6   :  { %1976 = vmatpush.msra.mxu0 %v6497_v21  ;;  %1999 = vmatpush.msra.mxu1 %v6498_v40 }
 0x8a7   :  { %1937 = vmatpush.msrb.mxu2 %v6499_v19  ;;  %1960 = vmatpush.msrb.mxu3 %v6500_v25  ;;  %v6507_v25 = vld [vmem:[#allocation33_spill] sm:$0xff] }
 0x8a8   :  { %1977 = vmatpush.msra.mxu0 %v6501_v45  ;;  %2000 = vmatpush.msra.mxu1 %v6502_v43  ;;  %v385_v21 = vadd.f32 %v6507_v25, %v3808_v24 }
 0x8a9   :  { %1938 = vmatpush.msrb.mxu2 %v6503_v37 }
 0x8aa   :  { %1978 = vmatpush.msra.mxu0 %v6504_v42  ;;  %v6508_v42 = vld [vmem:[#allocation31_spill] sm:$0xff] }
 0x8ab   :  { %1939 = vmatpush.msrb.mxu2 %v6505_v33  ;;  %v284_v29 = vadd.f32 %v6508_v42, %v3806_v53  ;;  %v5430_v42 = vld [vmem:[#allocation8 + $0x10] sm:$0xff] }
 0x8ac   :  { %1979 = vmatpush.msra.mxu0 %v6506_v22  ;;  %6529 = vst [vmem:[#allocation46_spill] sm:$0xff] %v5430_v42 }
 0x8ad   :  { %1940 = vmatpush.msrb.mxu2 %v6472_v41 }
 0x8ae   :  { %1980 = vmatpush.msra.mxu0 %v5049_v23 }
 0x905   :  { %v1830_v40 = vpop.f32.mrf.mxu1 }
 0x90b   :  { %v1810_v19 = vpop.f32.mrf.mxu0  ;;  %v1790_v43 = vpop.f32.mrf.mxu3 }
 0x90c   :  { %v1831_v45 = vadd.f32 %v1830_v40, %v1810_v19  ;;  %v6525_v40 = vld [vmem:[#allocation40_spill] sm:$0xff] }
 0x90d   :  { %v287_v19 = vadd.f32 %v6525_v40, %v3806_v53  ;;  %v5448_v40 = vld [vmem:[#allocation8 + $0x1e0] sm:$0xff] }
 0x90e   :  { %v1834_v36 = vadd.f32 %v1831_v45, %v385_v21 }
 0x910   :  { %3093 = vtanh.f32 %v1834_v36 }
 0x911   :  { %v1770_v37 = vpop.f32.mrf.mxu2 }
 0x912   :  { %v1791_v33 = vadd.f32 %v1790_v43, %v1770_v37  ;;  %v5334_v37 = vld [vmem:[#allocation8 + $0xf0] sm:$0xff] }
 0x914   :  { %v1833_v18 = vadd.f32 %v1791_v33, %v284_v29 }
 0x916   :  { %v3094_v22 = vpop.eup %3093  ;;  %3095 = vtanh.f32 %v1833_v18 }
 0x917   :  { %1875 = vmatmul.f32.vlgmr.msra.gmra.mxu3 %v3094_v22  ;;  %1915 = vmatmul.f32.vlgmr.msrb.gmra.mxu1 %v3094_v22 }
 0x918   :  { %2031 = vmatpush.msra.mxu3 %v4838_v61  ;;  %2071 = vmatpush.msrb.mxu1 %v4841_v47 }
 0x91a   :  { %2032 = vmatpush.msra.mxu3 %v4844_v56  ;;  %2072 = vmatpush.msrb.mxu1 %v4847_v44 }
 0x91c   :  { %v3096_v36 = vpop.eup %3095  ;;  %2033 = vmatpush.msra.mxu3 %v4850_v13  ;;  %2073 = vmatpush.msrb.mxu1 %v4853_v14 }
 0x91d   :  { %1855 = vmatmul.f32.vlgmr.msra.gmra.mxu2 %v3096_v36  ;;  %1895 = vmatmul.f32.vlgmr.msrb.gmra.mxu0 %v3096_v36  ;;  %v5434_v36 = vld [vmem:[#allocation8] sm:$0xff] }
 0x91e   :  { %2011 = vmatpush.msra.mxu2 %v4730_v27  ;;  %2034 = vmatpush.msra.mxu3 %v4857_v59  ;;  %v6509_v27 = vld [vmem:[#allocation17_spill] sm:$0xff]  ;;  %6530 = vst [vmem:[#allocation75_spill] sm:$0xff] %v5434_v36 }
 0x91f   :  { %2051 = vmatpush.msrb.mxu0 %v4734_v30  ;;  %2074 = vmatpush.msrb.mxu1 %v4861_v2  ;;  %v6510_v30 = vld [vmem:[#allocation51_spill] sm:$0xff] }
 0x920   :  { %2012 = vmatpush.msra.mxu2 %v4738_v35  ;;  %2035 = vmatpush.msra.mxu3 %v4865_v6  ;;  %v6511_v35 = vld [vmem:[#allocation69_spill] sm:$0xff] }
 0x921   :  { %2052 = vmatpush.msrb.mxu0 %v4742_v48  ;;  %2075 = vmatpush.msrb.mxu1 %v4869_v0  ;;  %v6512_v48 = vld [vmem:[#allocation24_spill] sm:$0xff] }
 0x922   :  { %2013 = vmatpush.msra.mxu2 %v4746_v54  ;;  %2036 = vmatpush.msra.mxu3 %v4873_v20  ;;  %v6513_v54 = vld [vmem:[#allocation20_spill] sm:$0xff] }
 0x923   :  { %2053 = vmatpush.msrb.mxu0 %v4750_v10  ;;  %2076 = vmatpush.msrb.mxu1 %v4877_v26  ;;  %v6514_v10 = vld [vmem:[#allocation70_spill] sm:$0xff] }
 0x924   :  { %2014 = vmatpush.msra.mxu2 %v4754_v9  ;;  %2037 = vmatpush.msra.mxu3 %v4881_v58  ;;  %v6515_v9 = vld [vmem:[#allocation44_spill] sm:$0xff] }
 0x925   :  { %2054 = vmatpush.msrb.mxu0 %v4758_v62  ;;  %2077 = vmatpush.msrb.mxu1 %v4885_v12  ;;  %v6516_v62 = vld [vmem:[#allocation48_spill] sm:$0xff] }
 0x926   :  { %2015 = vmatpush.msra.mxu2 %v4762_v60  ;;  %2038 = vmatpush.msra.mxu3 %v4889_v1  ;;  %v6517_v60 = vld [vmem:[#allocation19_spill] sm:$0xff] }
 0x927   :  { %2055 = vmatpush.msrb.mxu0 %v4766_v5  ;;  %2078 = vmatpush.msrb.mxu1 %v4977_v39  ;;  %v6518_v5 = vld [vmem:[#allocation35_spill] sm:$0xff] }
 0x928   :  { %2016 = vmatpush.msra.mxu2 %v4770_v52  ;;  %2039 = vmatpush.msra.mxu3 %v4895_v55  ;;  %v6519_v52 = vld [vmem:[#allocation71_spill] sm:$0xff] }
 0x929   :  { %2056 = vmatpush.msrb.mxu0 %v4774_v32  ;;  %2079 = vmatpush.msrb.mxu1 %v4983_v50  ;;  %v6520_v32 = vld [vmem:[#allocation16_spill] sm:$0xff] }
 0x92a   :  { %2017 = vmatpush.msra.mxu2 %v4778_v49  ;;  %2040 = vmatpush.msra.mxu3 %v4901_v57  ;;  %v6521_v49 = vld [vmem:[#allocation72_spill] sm:$0xff] }
 0x92b   :  { %2057 = vmatpush.msrb.mxu0 %v4782_v46  ;;  %2080 = vmatpush.msrb.mxu1 %v4989_v31  ;;  %v6522_v46 = vld [vmem:[#allocation25_spill] sm:$0xff] }
 0x92c   :  { %2018 = vmatpush.msra.mxu2 %v4786_v28  ;;  %2041 = vmatpush.msra.mxu3 %v4907_v8  ;;  %v6523_v28 = vld [vmem:[#allocation45_spill] sm:$0xff] }
 0x92d   :  { %2058 = vmatpush.msrb.mxu0 %v4994_v34  ;;  %2081 = vmatpush.msrb.mxu1 %v4997_v63 }
 0x92e   :  { %2019 = vmatpush.msra.mxu2 %v4792_v38  ;;  %2042 = vmatpush.msra.mxu3 %v4913_v11 }
 0x92f   :  { %2059 = vmatpush.msrb.mxu0 %v5002_v3  ;;  %2082 = vmatpush.msrb.mxu1 %v5005_v4 }
 0x930   :  { %2020 = vmatpush.msra.mxu2 %v4798_v51  ;;  %2043 = vmatpush.msra.mxu3 %v4919_v16 }
 0x931   :  { %2060 = vmatpush.msrb.mxu0 %v5010_v7  ;;  %2083 = vmatpush.msrb.mxu1 %v5013_v15 }
 0x932   :  { %2021 = vmatpush.msra.mxu2 %v4804_v17  ;;  %2044 = vmatpush.msra.mxu3 %v6509_v27  ;;  %v6524_v17 = vld [vmem:[#allocation41_spill] sm:$0xff] }
 0x933   :  { %2061 = vmatpush.msrb.mxu0 %v6510_v30  ;;  %2084 = vmatpush.msrb.mxu1 %v6511_v35  ;;  %v388_v18 = vadd.f32 %v6524_v17, %v3808_v24 }
 0x934   :  { %2022 = vmatpush.msra.mxu2 %v6512_v48  ;;  %2045 = vmatpush.msra.mxu3 %v6513_v54 }
 0x935   :  { %2062 = vmatpush.msrb.mxu0 %v6514_v10  ;;  %2085 = vmatpush.msrb.mxu1 %v6515_v9 }
 0x936   :  { %2023 = vmatpush.msra.mxu2 %v6516_v62  ;;  %2046 = vmatpush.msra.mxu3 %v6517_v60 }
 0x937   :  { %2063 = vmatpush.msrb.mxu0 %v6518_v5  ;;  %2086 = vmatpush.msrb.mxu1 %v6519_v52 }
 0x938   :  { %2024 = vmatpush.msra.mxu2 %v6520_v32 }
 0x939   :  { %2064 = vmatpush.msrb.mxu0 %v6521_v49 }
 0x93a   :  { %2025 = vmatpush.msra.mxu2 %v6522_v46 }
 0x93b   :  { %2065 = vmatpush.msrb.mxu0 %v6523_v28 }
 0x93c   :  { %2026 = vmatpush.msra.mxu2 %v6472_v41 }
 0x93d   :  { %2066 = vmatpush.msrb.mxu0 %v5049_v23 }
 0x994   :  { %v1916_v38 = vpop.f32.mrf.mxu1 }
 0x99a   :  { %v1896_v51 = vpop.f32.mrf.mxu0  ;;  %v1876_v22 = vpop.f32.mrf.mxu3 }
 0x99b   :  { %v1917_v29 = vadd.f32 %v1916_v38, %v1896_v51  ;;  %v6532_v51 = vld [vmem:[#allocation42_spill] sm:$0xff] }
 0x99c   :  { %v290_v17 = vadd.f32 %v6532_v51, %v3806_v53  ;;  %v5499_v51 = vld [vmem:[#allocation8 + $0x170] sm:$0xff] }
 0x99d   :  { %v1920_v33 = vadd.f32 %v1917_v29, %v388_v18 }
 0x99f   :  { %3097 = vtanh.f32 %v1920_v33 }
 0x9a0   :  { %v1856_v21 = vpop.f32.mrf.mxu2 }
 0x9a1   :  { %v1877_v25 = vadd.f32 %v1876_v22, %v1856_v21  ;;  %v5442_v22 = vld [vmem:[#allocation8 + $0x1f0] sm:$0xff]  ;;  %v5445_v21 = vld [vmem:[#allocation8 + $0x1f8] sm:$0xff] }
 0x9a3   :  { %v1919_v45 = vadd.f32 %v1877_v25, %v287_v19  ;;  %v5451_v19 = vld [vmem:[#allocation8 + $0x1e8] sm:$0xff] }
 0x9a5   :  { %v3098_v43 = vpop.eup %3097  ;;  %3099 = vtanh.f32 %v1919_v45  ;;  %v5454_v45 = vld [vmem:[#allocation8 + $0x1d0] sm:$0xff] }
 0x9a6   :  { %1961 = vmatmul.f32.vlgmr.msrb.gmra.mxu3 %v3098_v43  ;;  %2001 = vmatmul.f32.vlgmr.msra.gmra.mxu1 %v3098_v43  ;;  %v5457_v43 = vld [vmem:[#allocation8 + $0x1d8] sm:$0xff] }
 0x9a7   :  { %2117 = vmatpush.msrb.mxu3 %v4838_v61  ;;  %2157 = vmatpush.msra.mxu1 %v4841_v47  ;;  %v5338_v61 = vld [vmem:[#allocation8 + $0xf8] sm:$0xff]  ;;  %v5342_v47 = vld [vmem:[#allocation8 + $0xe0] sm:$0xff] }
 0x9a9   :  { %2118 = vmatpush.msrb.mxu3 %v4844_v56  ;;  %2158 = vmatpush.msra.mxu1 %v4847_v44  ;;  %v5346_v56 = vld [vmem:[#allocation8 + $0xe8] sm:$0xff]  ;;  %v5350_v44 = vld [vmem:[#allocation8 + $0xd0] sm:$0xff] }
 0x9ab   :  { %v3100_v41 = vpop.eup %3099  ;;  %2119 = vmatpush.msrb.mxu3 %v4850_v13  ;;  %2159 = vmatpush.msra.mxu1 %v4853_v14  ;;  %v5354_v13 = vld [vmem:[#allocation8 + $0xd8] sm:$0xff]  ;;  %v5358_v14 = vld [vmem:[#allocation8 + $0xc0] sm:$0xff] }
 0x9ac   :  { %1941 = vmatmul.f32.vlgmr.msrb.gmra.mxu2 %v3100_v41  ;;  %1981 = vmatmul.f32.vlgmr.msra.gmra.mxu0 %v3100_v41  ;;  %v5461_v41 = vld [vmem:[#allocation8 + $0x1c0] sm:$0xff] }
 0x9ad   :  { %2097 = vmatpush.msrb.mxu2 %v5334_v37  ;;  %2120 = vmatpush.msrb.mxu3 %v4857_v59  ;;  %v5362_v59 = vld [vmem:[#allocation8 + $0xc8] sm:$0xff] }
 0x9ae   :  { %2137 = vmatpush.msra.mxu0 %v5338_v61  ;;  %2160 = vmatpush.msra.mxu1 %v4861_v2  ;;  %v5366_v2 = vld [vmem:[#allocation8 + $0xb0] sm:$0xff] }
 0x9af   :  { %2098 = vmatpush.msrb.mxu2 %v5342_v47  ;;  %2121 = vmatpush.msrb.mxu3 %v4865_v6  ;;  %v5370_v6 = vld [vmem:[#allocation8 + $0xb8] sm:$0xff] }
 0x9b0   :  { %2138 = vmatpush.msra.mxu0 %v5346_v56  ;;  %2161 = vmatpush.msra.mxu1 %v4869_v0  ;;  %v5374_v0 = vld [vmem:[#allocation8 + $0xa0] sm:$0xff] }
 0x9b1   :  { %2099 = vmatpush.msrb.mxu2 %v5350_v44  ;;  %2122 = vmatpush.msrb.mxu3 %v4873_v20  ;;  %v5378_v20 = vld [vmem:[#allocation8 + $0xa8] sm:$0xff] }
 0x9b2   :  { %2139 = vmatpush.msra.mxu0 %v5354_v13  ;;  %2162 = vmatpush.msra.mxu1 %v4877_v26  ;;  %v5382_v26 = vld [vmem:[#allocation8 + $0x90] sm:$0xff] }
 0x9b3   :  { %2100 = vmatpush.msrb.mxu2 %v5358_v14  ;;  %2123 = vmatpush.msrb.mxu3 %v4881_v58  ;;  %v5386_v58 = vld [vmem:[#allocation8 + $0x98] sm:$0xff] }
 0x9b4   :  { %2140 = vmatpush.msra.mxu0 %v5362_v59  ;;  %2163 = vmatpush.msra.mxu1 %v4885_v12  ;;  %v5390_v12 = vld [vmem:[#allocation8 + $0x80] sm:$0xff] }
 0x9b5   :  { %2101 = vmatpush.msrb.mxu2 %v5366_v2  ;;  %2124 = vmatpush.msrb.mxu3 %v4889_v1  ;;  %v5396_v1 = vld [vmem:[#allocation8 + $0x70] sm:$0xff] }
 0x9b6   :  { %2141 = vmatpush.msra.mxu0 %v5370_v6  ;;  %2164 = vmatpush.msra.mxu1 %v4977_v39 }
 0x9b7   :  { %2102 = vmatpush.msrb.mxu2 %v5374_v0  ;;  %2125 = vmatpush.msrb.mxu3 %v4895_v55  ;;  %v5402_v55 = vld [vmem:[#allocation8 + $0x60] sm:$0xff] }
 0x9b8   :  { %2142 = vmatpush.msra.mxu0 %v5378_v20  ;;  %2165 = vmatpush.msra.mxu1 %v4983_v50 }
 0x9b9   :  { %2103 = vmatpush.msrb.mxu2 %v5382_v26  ;;  %2126 = vmatpush.msrb.mxu3 %v4901_v57  ;;  %v5408_v57 = vld [vmem:[#allocation8 + $0x50] sm:$0xff] }
 0x9ba   :  { %2143 = vmatpush.msra.mxu0 %v5386_v58  ;;  %2166 = vmatpush.msra.mxu1 %v4989_v31 }
 0x9bb   :  { %2104 = vmatpush.msrb.mxu2 %v5390_v12  ;;  %2127 = vmatpush.msrb.mxu3 %v4907_v8  ;;  %v5414_v8 = vld [vmem:[#allocation8 + $0x40] sm:$0xff] }
 0x9bc   :  { %2144 = vmatpush.msra.mxu0 %v4994_v34  ;;  %2167 = vmatpush.msra.mxu1 %v4997_v63  ;;  %6526 = vst [vmem:[#allocation37_spill] sm:$0xff] %v5414_v8 }
 0x9bd   :  { %2105 = vmatpush.msrb.mxu2 %v5396_v1  ;;  %2128 = vmatpush.msrb.mxu3 %v4913_v11  ;;  %v5420_v11 = vld [vmem:[#allocation8 + $0x30] sm:$0xff] }
 0x9be   :  { %2145 = vmatpush.msra.mxu0 %v5002_v3  ;;  %2168 = vmatpush.msra.mxu1 %v5005_v4  ;;  %6527 = vst [vmem:[#allocation73_spill] sm:$0xff] %v5420_v11 }
 0x9bf   :  { %2106 = vmatpush.msrb.mxu2 %v5402_v55  ;;  %2129 = vmatpush.msrb.mxu3 %v4919_v16  ;;  %v5426_v16 = vld [vmem:[#allocation8 + $0x20] sm:$0xff] }
 0x9c0   :  { %2146 = vmatpush.msra.mxu0 %v5010_v7  ;;  %2169 = vmatpush.msra.mxu1 %v5013_v15  ;;  %6528 = vst [vmem:[#allocation74_spill] sm:$0xff] %v5426_v16 }
 0x9c1   :  { %2107 = vmatpush.msrb.mxu2 %v5408_v57  ;;  %2130 = vmatpush.msrb.mxu3 %v6509_v27 }
 0x9c2   :  { %2147 = vmatpush.msra.mxu0 %v6510_v30  ;;  %2170 = vmatpush.msra.mxu1 %v6511_v35 }
 0x9c3   :  { %2108 = vmatpush.msrb.mxu2 %v5414_v8  ;;  %2131 = vmatpush.msrb.mxu3 %v6513_v54  ;;  %v6531_v54 = vld [vmem:[#allocation43_spill] sm:$0xff] }
 0x9c4   :  { %2148 = vmatpush.msra.mxu0 %v6514_v10  ;;  %2171 = vmatpush.msra.mxu1 %v6515_v9  ;;  %v391_v62 = vadd.f32 %v6531_v54, %v3808_v24  ;;  %v5473_v54 = vld [vmem:[#allocation8 + $0x1b8] sm:$0xff] }
 0x9c5   :  { %2109 = vmatpush.msrb.mxu2 %v5420_v11  ;;  %2132 = vmatpush.msrb.mxu3 %v6517_v60 }
 0x9c6   :  { %2149 = vmatpush.msra.mxu0 %v6518_v5  ;;  %2172 = vmatpush.msra.mxu1 %v6519_v52 }
 0x9c7   :  { %2110 = vmatpush.msrb.mxu2 %v5426_v16 }
 0x9c8   :  { %2150 = vmatpush.msra.mxu0 %v6521_v49 }
 0x9c9   :  { %2111 = vmatpush.msrb.mxu2 %v5430_v42 }
 0x9ca   :  { %2151 = vmatpush.msra.mxu0 %v6523_v28 }
 0x9cb   :  { %2112 = vmatpush.msrb.mxu2 %v5434_v36 }
 0x9cc   :  { %2152 = vmatpush.msra.mxu0 %v5049_v23 }
 0xa23   :  { %v2002_v27 = vpop.f32.mrf.mxu1 }
 0xa29   :  { %v1982_v48 = vpop.f32.mrf.mxu0  ;;  %v1962_v46 = vpop.f32.mrf.mxu3 }
 0xa2a   :  { %v2003_v60 = vadd.f32 %v2002_v27, %v1982_v48  ;;  %v5465_v27 = vld [vmem:[#allocation8 + $0x1c8] sm:$0xff]  ;;  %v5469_v48 = vld [vmem:[#allocation8 + $0x1b0] sm:$0xff] }
 0xa2c   :  { %v2006_v32 = vadd.f32 %v2003_v60, %v391_v62  ;;  %v5477_v62 = vld [vmem:[#allocation8 + $0x1a0] sm:$0xff]  ;;  %v5481_v60 = vld [vmem:[#allocation8 + $0x1a8] sm:$0xff] }
 0xa2e   :  { %3101 = vtanh.f32 %v2006_v32  ;;  %v5485_v32 = vld [vmem:[#allocation8 + $0x190] sm:$0xff] }
 0xa2f   :  { %v1942_v38 = vpop.f32.mrf.mxu2 }
 0xa30   :  { %v1963_v18 = vadd.f32 %v1962_v46, %v1942_v38  ;;  %v5489_v46 = vld [vmem:[#allocation8 + $0x198] sm:$0xff]  ;;  %v5493_v38 = vld [vmem:[#allocation8 + $0x180] sm:$0xff] }
 0xa32   :  { %v2005_v29 = vadd.f32 %v1963_v18, %v290_v17  ;;  %v5505_v17 = vld [vmem:[#allocation8 + $0x160] sm:$0xff] }
 0xa34   :  { %v3102_v33 = vpop.eup %3101  ;;  %3103 = vtanh.f32 %v2005_v29 }
 0xa35   :  { %2047 = vmatmul.f32.vlgmr.msra.gmra.mxu3 %v3102_v33  ;;  %2087 = vmatmul.f32.vlgmr.msrb.gmra.mxu1 %v3102_v33  ;;  %v5581_v33 = vld [vmem:[#allocation8 + $0x188] sm:$0xff] }
 0xa36   :  { %2203 = vmatpush.msra.mxu3 %v5442_v22  ;;  %2243 = vmatpush.msrb.mxu1 %v5445_v21 }
 0xa38   :  { %2204 = vmatpush.msra.mxu3 %v5448_v40  ;;  %2244 = vmatpush.msrb.mxu1 %v5451_v19 }
 0xa3a   :  { %v3104_v25 = vpop.eup %3103  ;;  %2205 = vmatpush.msra.mxu3 %v5454_v45  ;;  %2245 = vmatpush.msrb.mxu1 %v5457_v43 }
 0xa3b   :  { %2027 = vmatmul.f32.vlgmr.msra.gmra.mxu2 %v3104_v25  ;;  %2067 = vmatmul.f32.vlgmr.msrb.gmra.mxu0 %v3104_v25  ;;  %v5587_v25 = vld [vmem:[#allocation8 + $0x178] sm:$0xff] }
 0xa3c   :  { %2183 = vmatpush.msra.mxu2 %v5334_v37  ;;  %2206 = vmatpush.msra.mxu3 %v5461_v41 }
 0xa3d   :  { %2223 = vmatpush.msrb.mxu0 %v5338_v61  ;;  %2246 = vmatpush.msrb.mxu1 %v5465_v27 }
 0xa3e   :  { %2184 = vmatpush.msra.mxu2 %v5342_v47  ;;  %2207 = vmatpush.msra.mxu3 %v5469_v48 }
 0xa3f   :  { %2224 = vmatpush.msrb.mxu0 %v5346_v56  ;;  %2247 = vmatpush.msrb.mxu1 %v5473_v54 }
 0xa40   :  { %2185 = vmatpush.msra.mxu2 %v5350_v44  ;;  %2208 = vmatpush.msra.mxu3 %v5477_v62 }
 0xa41   :  { %2225 = vmatpush.msrb.mxu0 %v5354_v13  ;;  %2248 = vmatpush.msrb.mxu1 %v5481_v60 }
 0xa42   :  { %2186 = vmatpush.msra.mxu2 %v5358_v14  ;;  %2209 = vmatpush.msra.mxu3 %v5485_v32 }
 0xa43   :  { %2226 = vmatpush.msrb.mxu0 %v5362_v59  ;;  %2249 = vmatpush.msrb.mxu1 %v5489_v46 }
 0xa44   :  { %2187 = vmatpush.msra.mxu2 %v5366_v2  ;;  %2210 = vmatpush.msra.mxu3 %v5493_v38 }
 0xa45   :  { %2227 = vmatpush.msrb.mxu0 %v5370_v6  ;;  %2250 = vmatpush.msrb.mxu1 %v4977_v39  ;;  %v5511_v39 = vld [vmem:[#allocation8 + $0x150] sm:$0xff] }
 0xa46   :  { %2188 = vmatpush.msra.mxu2 %v5374_v0  ;;  %2211 = vmatpush.msra.mxu3 %v5499_v51 }
 0xa47   :  { %2228 = vmatpush.msrb.mxu0 %v5378_v20  ;;  %2251 = vmatpush.msrb.mxu1 %v4983_v50  ;;  %v5517_v50 = vld [vmem:[#allocation8 + $0x140] sm:$0xff] }
 0xa48   :  { %2189 = vmatpush.msra.mxu2 %v5382_v26  ;;  %2212 = vmatpush.msra.mxu3 %v5505_v17 }
 0xa49   :  { %2229 = vmatpush.msrb.mxu0 %v5386_v58  ;;  %2252 = vmatpush.msrb.mxu1 %v4989_v31  ;;  %v5523_v31 = vld [vmem:[#allocation8 + $0x130] sm:$0xff] }
 0xa4a   :  { %2190 = vmatpush.msra.mxu2 %v5390_v12  ;;  %2213 = vmatpush.msra.mxu3 %v5511_v39 }
 0xa4b   :  { %2230 = vmatpush.msrb.mxu0 %v4994_v34  ;;  %2253 = vmatpush.msrb.mxu1 %v4997_v63  ;;  %v5529_v34 = vld [vmem:[#allocation8 + $0x120] sm:$0xff]  ;;  %v5535_v63 = vld [vmem:[#allocation8 + $0x110] sm:$0xff] }
 0xa4c   :  { %2191 = vmatpush.msra.mxu2 %v5396_v1  ;;  %2214 = vmatpush.msra.mxu3 %v5517_v50  ;;  %6533 = vst [vmem:[#allocation47_spill] sm:$0xff] %v5529_v34 }
 0xa4d   :  { %2231 = vmatpush.msrb.mxu0 %v5002_v3  ;;  %2254 = vmatpush.msrb.mxu1 %v5005_v4  ;;  %6534 = vst [vmem:[#allocation76_spill] sm:$0xff] %v5535_v63  ;;  %v5541_v3 = vld [vmem:[#allocation8 + $0x100] sm:$0xff] }
 0xa4e   :  { %2192 = vmatpush.msra.mxu2 %v5402_v55  ;;  %2215 = vmatpush.msra.mxu3 %v5523_v31  ;;  %6535 = vst [vmem:[#allocation23_spill] sm:$0xff] %v5541_v3 }
 0xa4f   :  { %2232 = vmatpush.msrb.mxu0 %v5010_v7  ;;  %2255 = vmatpush.msrb.mxu1 %v5013_v15  ;;  %v6536_v15 = vld [vmem:[#allocation50_spill] sm:$0xff] }
 0xa50   :  { %2193 = vmatpush.msra.mxu2 %v5408_v57  ;;  %2216 = vmatpush.msra.mxu3 %v5529_v34 }
 0xa51   :  { %2233 = vmatpush.msrb.mxu0 %v6510_v30  ;;  %2256 = vmatpush.msrb.mxu1 %v6511_v35  ;;  %v394_v30 = vadd.f32 %v6536_v15, %v3808_v24  ;;  %v5601_v15 = vld [vmem:[#allocation8 + $0x158] sm:$0xff] }
 0xa52   :  { %2194 = vmatpush.msra.mxu2 %v5414_v8  ;;  %2217 = vmatpush.msra.mxu3 %v5535_v63 }
 0xa53   :  { %2234 = vmatpush.msrb.mxu0 %v6514_v10  ;;  %2257 = vmatpush.msrb.mxu1 %v6515_v9 }
 0xa54   :  { %2195 = vmatpush.msra.mxu2 %v5420_v11  ;;  %2218 = vmatpush.msra.mxu3 %v5541_v3 }
 0xa55   :  { %2235 = vmatpush.msrb.mxu0 %v6518_v5  ;;  %2258 = vmatpush.msrb.mxu1 %v6519_v52  ;;  %v6537_v52 = vld [vmem:[#allocation49_spill] sm:$0xff] }
 0xa56   :  { %2196 = vmatpush.msra.mxu2 %v5426_v16 }
 0xa57   :  { %2236 = vmatpush.msrb.mxu0 %v6521_v49  ;;  %v293_v49 = vadd.f32 %v6537_v52, %v3806_v53  ;;  %v5625_v52 = vld [vmem:[#allocation8 + $0x128] sm:$0xff] }
 0xa58   :  { %2197 = vmatpush.msra.mxu2 %v5430_v42  ;;  %6539 = vst [vmem:[#allocation30_spill] sm:$0xff] %v5625_v52 }
 0xa59   :  { %2237 = vmatpush.msrb.mxu0 %v6523_v28 }
 0xa5a   :  { %2198 = vmatpush.msra.mxu2 %v5434_v36 }
 0xa5b   :  { %2238 = vmatpush.msrb.mxu0 %v5049_v23 }
 0xab2   :  { %v2088_v4 = vpop.f32.mrf.mxu1 }
 0xab8   :  { %v2068_v7 = vpop.f32.mrf.mxu0  ;;  %v2048_v9 = vpop.f32.mrf.mxu3 }
 0xab9   :  { %v2089_v35 = vadd.f32 %v2088_v4, %v2068_v7  ;;  %v5593_v4 = vld [vmem:[#allocation8 + $0x168] sm:$0xff] }
 0xaba   :  { %v5598_v7 = vld [vmem:[#allocation8 + $0x88] sm:$0xff] }
 0xabb   :  { %v2092_v10 = vadd.f32 %v2089_v35, %v394_v30  ;;  %v5606_v30 = vld [vmem:[#allocation8 + $0x78] sm:$0xff]  ;;  %v5609_v35 = vld [vmem:[#allocation8 + $0x148] sm:$0xff] }
 0xabd   :  { %3105 = vtanh.f32 %v2092_v10  ;;  %v5614_v10 = vld [vmem:[#allocation8 + $0x68] sm:$0xff] }
 0xabe   :  { %v2028_v5 = vpop.f32.mrf.mxu2 }
 0xabf   :  { %v2049_v18 = vadd.f32 %v2048_v9, %v2028_v5  ;;  %v5617_v9 = vld [vmem:[#allocation8 + $0x138] sm:$0xff] }
 0xac0   :  { %v5622_v5 = vld [vmem:[#allocation8 + $0x58] sm:$0xff] }
 0xac1   :  { %v2091_v29 = vadd.f32 %v2049_v18, %v293_v49  ;;  %6538 = vst [vmem:[#allocation21_spill] sm:$0xff] %v5622_v5  ;;  %v5630_v49 = vld [vmem:[#allocation8 + $0x48] sm:$0xff]  ;;  %v5633_v18 = vld [vmem:[#allocation8 + $0x118] sm:$0xff] }
 0xac2   :  { %6540 = vst [vmem:[#allocation22_spill] sm:$0xff] %v5630_v49 }
 0xac3   :  { %v3106_v28 = vpop.eup %3105  ;;  %3107 = vtanh.f32 %v2091_v29  ;;  %6541 = vst [vmem:[#allocation32_spill] sm:$0xff] %v5633_v18  ;;  %v5638_v29 = vld [vmem:[#allocation8 + $0x38] sm:$0xff] }
 0xac4   :  { %2133 = vmatmul.f32.vlgmr.msrb.gmra.mxu3 %v3106_v28  ;;  %2173 = vmatmul.f32.vlgmr.msra.gmra.mxu1 %v3106_v28  ;;  %6542 = vst [vmem:[#allocation26_spill] sm:$0xff] %v5638_v29  ;;  %v5641_v28 = vld [vmem:[#allocation8 + $0x108] sm:$0xff] }
 0xac5   :  { %2289 = vmatpush.msrb.mxu3 %v5442_v22  ;;  %2329 = vmatpush.msra.mxu1 %v5445_v21  ;;  %6543 = vst [vmem:[#allocation34_spill] sm:$0xff] %v5641_v28 }
 0xac7   :  { %2290 = vmatpush.msrb.mxu3 %v5448_v40  ;;  %2330 = vmatpush.msra.mxu1 %v5451_v19 }
 0xac9   :  { %v3108_v23 = vpop.eup %3107  ;;  %2291 = vmatpush.msrb.mxu3 %v5454_v45  ;;  %2331 = vmatpush.msra.mxu1 %v5457_v43 }
 0xaca   :  { %2113 = vmatmul.f32.vlgmr.msrb.gmra.mxu2 %v3108_v23  ;;  %2153 = vmatmul.f32.vlgmr.msra.gmra.mxu0 %v3108_v23  ;;  %v5645_v23 = vld [vmem:[#allocation8 + $0x28] sm:$0xff] }
 0xacb   :  { %2269 = vmatpush.msrb.mxu2 %v5334_v37  ;;  %2292 = vmatpush.msrb.mxu3 %v5461_v41  ;;  %6544 = vst [vmem:[#allocation27_spill] sm:$0xff] %v5645_v23 }
 0xacc   :  { %2309 = vmatpush.msra.mxu0 %v5338_v61  ;;  %2332 = vmatpush.msra.mxu1 %v5465_v27 }
 0xacd   :  { %2270 = vmatpush.msrb.mxu2 %v5342_v47  ;;  %2293 = vmatpush.msrb.mxu3 %v5469_v48 }
 0xace   :  { %2310 = vmatpush.msra.mxu0 %v5346_v56  ;;  %2333 = vmatpush.msra.mxu1 %v5473_v54 }
 0xacf   :  { %2271 = vmatpush.msrb.mxu2 %v5350_v44  ;;  %2294 = vmatpush.msrb.mxu3 %v5477_v62 }
 0xad0   :  { %2311 = vmatpush.msra.mxu0 %v5354_v13  ;;  %2334 = vmatpush.msra.mxu1 %v5481_v60 }
 0xad1   :  { %2272 = vmatpush.msrb.mxu2 %v5358_v14  ;;  %2295 = vmatpush.msrb.mxu3 %v5485_v32 }
 0xad2   :  { %2312 = vmatpush.msra.mxu0 %v5362_v59  ;;  %2335 = vmatpush.msra.mxu1 %v5489_v46 }
 0xad3   :  { %2273 = vmatpush.msrb.mxu2 %v5366_v2  ;;  %2296 = vmatpush.msrb.mxu3 %v5493_v38 }
 0xad4   :  { %2313 = vmatpush.msra.mxu0 %v5370_v6  ;;  %2336 = vmatpush.msra.mxu1 %v5581_v33 }
 0xad5   :  { %2274 = vmatpush.msrb.mxu2 %v5374_v0  ;;  %2297 = vmatpush.msrb.mxu3 %v5499_v51 }
 0xad6   :  { %2314 = vmatpush.msra.mxu0 %v5378_v20  ;;  %2337 = vmatpush.msra.mxu1 %v5587_v25 }
 0xad7   :  { %2275 = vmatpush.msrb.mxu2 %v5382_v26  ;;  %2298 = vmatpush.msrb.mxu3 %v5505_v17 }
 0xad8   :  { %2315 = vmatpush.msra.mxu0 %v5386_v58  ;;  %2338 = vmatpush.msra.mxu1 %v5593_v4 }
 0xad9   :  { %2276 = vmatpush.msrb.mxu2 %v5390_v12  ;;  %2299 = vmatpush.msrb.mxu3 %v5511_v39 }
 0xada   :  { %2316 = vmatpush.msra.mxu0 %v5598_v7  ;;  %2339 = vmatpush.msra.mxu1 %v5601_v15 }
 0xadb   :  { %2277 = vmatpush.msrb.mxu2 %v5396_v1  ;;  %2300 = vmatpush.msrb.mxu3 %v5517_v50 }
 0xadc   :  { %2317 = vmatpush.msra.mxu0 %v5606_v30  ;;  %2340 = vmatpush.msra.mxu1 %v5609_v35 }
 0xadd   :  { %2278 = vmatpush.msrb.mxu2 %v5402_v55  ;;  %2301 = vmatpush.msrb.mxu3 %v5523_v31 }
 0xade   :  { %2318 = vmatpush.msra.mxu0 %v5614_v10  ;;  %2341 = vmatpush.msra.mxu1 %v5617_v9 }
 0xadf   :  { %2279 = vmatpush.msrb.mxu2 %v5408_v57  ;;  %2302 = vmatpush.msrb.mxu3 %v5529_v34 }
 0xae0   :  { %2319 = vmatpush.msra.mxu0 %v5622_v5  ;;  %2342 = vmatpush.msra.mxu1 %v5625_v52 }
 0xae1   :  { %2280 = vmatpush.msrb.mxu2 %v5414_v8  ;;  %2303 = vmatpush.msrb.mxu3 %v5535_v63  ;;  %v6547_v8 = vld [vmem:[#allocation39_spill] sm:$0xff] }
 0xae2   :  { %2320 = vmatpush.msra.mxu0 %v5630_v49  ;;  %2343 = vmatpush.msra.mxu1 %v5633_v18  ;;  %v5649_v18 = vld [vmem:[#allocation8 + $0x18] sm:$0xff]  ;;  %v296_v52 = vadd.f32 %v6547_v8, %v3806_v53  ;;  %v6548_v8 = vld [vmem:[#allocation21_spill] sm:$0xff] }
 0xae3   :  { %2281 = vmatpush.msrb.mxu2 %v5420_v11  ;;  %2304 = vmatpush.msrb.mxu3 %v5541_v3  ;;  %6545 = vst [vmem:[#allocation18_spill] sm:$0xff] %v5649_v18  ;;  %v5653_v3 = vld [vmem:[#allocation8 + $0x8] sm:$0xff] }
 0xae4   :  { %2321 = vmatpush.msra.mxu0 %v5638_v29  ;;  %2344 = vmatpush.msra.mxu1 %v5641_v28 }
 0xae5   :  { %2282 = vmatpush.msrb.mxu2 %v5426_v16  ;;  %v6546_v16 = vld [vmem:[#allocation52_spill] sm:$0xff] }
 0xae6   :  { %2322 = vmatpush.msra.mxu0 %v5645_v23  ;;  %v397_v11 = vadd.f32 %v6546_v16, %v3808_v24  ;;  %v6549_v16 = vld [vmem:[#allocation30_spill] sm:$0xff] }
 0xae7   :  { %2283 = vmatpush.msrb.mxu2 %v5430_v42 }
 0xae8   :  { %2323 = vmatpush.msra.mxu0 %v5649_v18 }
 0xae9   :  { %2284 = vmatpush.msrb.mxu2 %v5434_v36 }
 0xaea   :  { %2324 = vmatpush.msra.mxu0 %v5653_v3 }
 0xb41   :  { %v2174_v29 = vpop.f32.mrf.mxu1 }
 0xb47   :  { %v2154_v28 = vpop.f32.mrf.mxu0  ;;  %v2134_v23 = vpop.f32.mrf.mxu3 }
 0xb48   :  { %v2175_v49 = vadd.f32 %v2174_v29, %v2154_v28  ;;  %v6557_v29 = vld [vmem:[#allocation34_spill] sm:$0xff] }
 0xb49   :  { %v6558_v28 = vld [vmem:[#allocation74_spill] sm:$0xff] }
 0xb4a   :  { %v2178_v63 = vadd.f32 %v2175_v49, %v397_v11  ;;  %v6555_v49 = vld [vmem:[#allocation23_spill] sm:$0xff] }
 0xb4c   :  { %3109 = vtanh.f32 %v2178_v63  ;;  %v6552_v63 = vld [vmem:[#allocation22_spill] sm:$0xff] }
 0xb4d   :  { %v2114_v42 = vpop.f32.mrf.mxu2 }
 0xb4e   :  { %v2135_v18 = vadd.f32 %v2134_v23, %v2114_v42  ;;  %v6550_v42 = vld [vmem:[#allocation37_spill] sm:$0xff]  ;;  %v6559_v23 = vld [vmem:[#allocation27_spill] sm:$0xff] }
 0xb50   :  { %v2177_v5 = vadd.f32 %v2135_v18, %v296_v52  ;;  %v6554_v52 = vld [vmem:[#allocation73_spill] sm:$0xff]  ;;  %v6556_v18 = vld [vmem:[#allocation26_spill] sm:$0xff] }
 0xb52   :  { %v3110_v36 = vpop.eup %3109  ;;  %3111 = vtanh.f32 %v2177_v5  ;;  %v6553_v5 = vld [vmem:[#allocation32_spill] sm:$0xff] }
 0xb53   :  { %2219 = vmatmul.f32.vlgmr.msra.gmra.mxu3 %v3110_v36  ;;  %2259 = vmatmul.f32.vlgmr.msrb.gmra.mxu1 %v3110_v36  ;;  %v6551_v36 = vld [vmem:[#allocation76_spill] sm:$0xff] }
 0xb54   :  { %2375 = vmatpush.msra.mxu3 %v5442_v22  ;;  %2415 = vmatpush.msrb.mxu1 %v5445_v21 }
 0xb56   :  { %2376 = vmatpush.msra.mxu3 %v5448_v40  ;;  %2416 = vmatpush.msrb.mxu1 %v5451_v19 }
 0xb58   :  { %v3112_v11 = vpop.eup %3111  ;;  %2377 = vmatpush.msra.mxu3 %v5454_v45  ;;  %2417 = vmatpush.msrb.mxu1 %v5457_v43 }
 0xb59   :  { %2199 = vmatmul.f32.vlgmr.msra.gmra.mxu2 %v3112_v11  ;;  %2239 = vmatmul.f32.vlgmr.msrb.gmra.mxu0 %v3112_v11  ;;  %v6560_v11 = vld [vmem:[#allocation46_spill] sm:$0xff] }
 0xb5a   :  { %2355 = vmatpush.msra.mxu2 %v5334_v37  ;;  %2378 = vmatpush.msra.mxu3 %v5461_v41 }
 0xb5b   :  { %2395 = vmatpush.msrb.mxu0 %v5338_v61  ;;  %2418 = vmatpush.msrb.mxu1 %v5465_v27 }
 0xb5c   :  { %2356 = vmatpush.msra.mxu2 %v5342_v47  ;;  %2379 = vmatpush.msra.mxu3 %v5469_v48 }
 0xb5d   :  { %2396 = vmatpush.msrb.mxu0 %v5346_v56  ;;  %2419 = vmatpush.msrb.mxu1 %v5473_v54 }
 0xb5e   :  { %2357 = vmatpush.msra.mxu2 %v5350_v44  ;;  %2380 = vmatpush.msra.mxu3 %v5477_v62 }
 0xb5f   :  { %2397 = vmatpush.msrb.mxu0 %v5354_v13  ;;  %2420 = vmatpush.msrb.mxu1 %v5481_v60 }
 0xb60   :  { %2358 = vmatpush.msra.mxu2 %v5358_v14  ;;  %2381 = vmatpush.msra.mxu3 %v5485_v32 }
 0xb61   :  { %2398 = vmatpush.msrb.mxu0 %v5362_v59  ;;  %2421 = vmatpush.msrb.mxu1 %v5489_v46 }
 0xb62   :  { %2359 = vmatpush.msra.mxu2 %v5366_v2  ;;  %2382 = vmatpush.msra.mxu3 %v5493_v38 }
 0xb63   :  { %2399 = vmatpush.msrb.mxu0 %v5370_v6  ;;  %2422 = vmatpush.msrb.mxu1 %v5581_v33 }
 0xb64   :  { %2360 = vmatpush.msra.mxu2 %v5374_v0  ;;  %2383 = vmatpush.msra.mxu3 %v5499_v51 }
 0xb65   :  { %2400 = vmatpush.msrb.mxu0 %v5378_v20  ;;  %2423 = vmatpush.msrb.mxu1 %v5587_v25 }
 0xb66   :  { %2361 = vmatpush.msra.mxu2 %v5382_v26  ;;  %2384 = vmatpush.msra.mxu3 %v5505_v17 }
 0xb67   :  { %2401 = vmatpush.msrb.mxu0 %v5386_v58  ;;  %2424 = vmatpush.msrb.mxu1 %v5593_v4 }
 0xb68   :  { %2362 = vmatpush.msra.mxu2 %v5390_v12  ;;  %2385 = vmatpush.msra.mxu3 %v5511_v39 }
 0xb69   :  { %2402 = vmatpush.msrb.mxu0 %v5598_v7  ;;  %2425 = vmatpush.msrb.mxu1 %v5601_v15 }
 0xb6a   :  { %2363 = vmatpush.msra.mxu2 %v5396_v1  ;;  %2386 = vmatpush.msra.mxu3 %v5517_v50 }
 0xb6b   :  { %2403 = vmatpush.msrb.mxu0 %v5606_v30  ;;  %2426 = vmatpush.msrb.mxu1 %v5609_v35 }
 0xb6c   :  { %2364 = vmatpush.msra.mxu2 %v5402_v55  ;;  %2387 = vmatpush.msra.mxu3 %v5523_v31 }
 0xb6d   :  { %2404 = vmatpush.msrb.mxu0 %v5614_v10  ;;  %2427 = vmatpush.msrb.mxu1 %v5617_v9 }
 0xb6e   :  { %2365 = vmatpush.msra.mxu2 %v5408_v57  ;;  %2388 = vmatpush.msra.mxu3 %v5529_v34 }
 0xb6f   :  { %2405 = vmatpush.msrb.mxu0 %v6548_v8  ;;  %2428 = vmatpush.msrb.mxu1 %v6549_v16 }
 0xb70   :  { %2366 = vmatpush.msra.mxu2 %v6550_v42  ;;  %2389 = vmatpush.msra.mxu3 %v6551_v36  ;;  %v6561_v42 = vld [vmem:[#allocation18_spill] sm:$0xff]  ;;  %v6562_v36 = vld [vmem:[#allocation75_spill] sm:$0xff] }
 0xb71   :  { %2406 = vmatpush.msrb.mxu0 %v6552_v63  ;;  %2429 = vmatpush.msrb.mxu1 %v6553_v5 }
 0xb72   :  { %2367 = vmatpush.msra.mxu2 %v6554_v52  ;;  %2390 = vmatpush.msra.mxu3 %v6555_v49  ;;  %v6563_v49 = vld [vmem:[#allocation54_spill] sm:$0xff] }
 0xb73   :  { %2407 = vmatpush.msrb.mxu0 %v6556_v18  ;;  %2430 = vmatpush.msrb.mxu1 %v6557_v29  ;;  %v400_v63 = vadd.f32 %v6563_v49, %v3808_v24  ;;  %v6571_v49 = vld [vmem:[#allocation32_spill] sm:$0xff] }
 0xb74   :  { %2368 = vmatpush.msra.mxu2 %v6558_v28 }
 0xb75   :  { %2408 = vmatpush.msrb.mxu0 %v6559_v23  ;;  %v6564_v23 = vld [vmem:[#allocation53_spill] sm:$0xff] }
 0xb76   :  { %2369 = vmatpush.msra.mxu2 %v6560_v11  ;;  %v299_v8 = vadd.f32 %v6564_v23, %v3806_v53  ;;  %v6575_v23 = vld [vmem:[#allocation34_spill] sm:$0xff] }
 0xb77   :  { %2409 = vmatpush.msrb.mxu0 %v6561_v42 }
 0xb78   :  { %2370 = vmatpush.msra.mxu2 %v6562_v36 }
 0xb79   :  { %2410 = vmatpush.msrb.mxu0 %v5653_v3 }
 0xbd0   :  { %v2260_v5 = vpop.f32.mrf.mxu1 }
 0xbd6   :  { %v2240_v52 = vpop.f32.mrf.mxu0  ;;  %v2220_v29 = vpop.f32.mrf.mxu3 }
 0xbd7   :  { %v2261_v18 = vadd.f32 %v2260_v5, %v2240_v52  ;;  %v6569_v5 = vld [vmem:[#allocation76_spill] sm:$0xff]  ;;  %v6570_v52 = vld [vmem:[#allocation22_spill] sm:$0xff] }
 0xbd9   :  { %v2264_v16 = vadd.f32 %v2261_v18, %v400_v63  ;;  %v6568_v63 = vld [vmem:[#allocation37_spill] sm:$0xff] }
 0xbda   :  { %v6572_v18 = vld [vmem:[#allocation73_spill] sm:$0xff] }
 0xbdb   :  { %3113 = vtanh.f32 %v2264_v16 }
 0xbdc   :  { %v2200_v28 = vpop.f32.mrf.mxu2 }
 0xbdd   :  { %v2221_v11 = vadd.f32 %v2220_v29, %v2200_v28  ;;  %v6573_v29 = vld [vmem:[#allocation23_spill] sm:$0xff]  ;;  %v6574_v28 = vld [vmem:[#allocation26_spill] sm:$0xff] }
 0xbdf   :  { %v2263_v34 = vadd.f32 %v2221_v11, %v299_v8  ;;  %v6566_v8 = vld [vmem:[#allocation21_spill] sm:$0xff]  ;;  %v6576_v11 = vld [vmem:[#allocation74_spill] sm:$0xff] }
 0xbe1   :  { %v3114_v42 = vpop.eup %3113  ;;  %3115 = vtanh.f32 %v2263_v34  ;;  %v6565_v34 = vld [vmem:[#allocation47_spill] sm:$0xff] }
 0xbe2   :  { %2305 = vmatmul.f32.vlgmr.msrb.gmra.mxu3 %v3114_v42  ;;  %2345 = vmatmul.f32.vlgmr.msra.gmra.mxu1 %v3114_v42  ;;  %v6567_v42 = vld [vmem:[#allocation30_spill] sm:$0xff] }
 0xbe3   :  { %2461 = vmatpush.msrb.mxu3 %v5442_v22  ;;  %2501 = vmatpush.msra.mxu1 %v5445_v21 }
 0xbe5   :  { %2462 = vmatpush.msrb.mxu3 %v5448_v40  ;;  %2502 = vmatpush.msra.mxu1 %v5451_v19 }
 0xbe7   :  { %v3116_v16 = vpop.eup %3115  ;;  %2463 = vmatpush.msrb.mxu3 %v5454_v45  ;;  %2503 = vmatpush.msra.mxu1 %v5457_v43 }
 0xbe8   :  { %2285 = vmatmul.f32.vlgmr.msrb.gmra.mxu2 %v3116_v16  ;;  %2325 = vmatmul.f32.vlgmr.msra.gmra.mxu0 %v3116_v16  ;;  %v6577_v16 = vld [vmem:[#allocation27_spill] sm:$0xff] }
 0xbe9   :  { %2441 = vmatpush.msrb.mxu2 %v5334_v37  ;;  %2464 = vmatpush.msrb.mxu3 %v5461_v41 }
 0xbea   :  { %2481 = vmatpush.msra.mxu0 %v5338_v61  ;;  %2504 = vmatpush.msra.mxu1 %v5465_v27 }
 0xbeb   :  { %2442 = vmatpush.msrb.mxu2 %v5342_v47  ;;  %2465 = vmatpush.msrb.mxu3 %v5469_v48 }
 0xbec   :  { %2482 = vmatpush.msra.mxu0 %v5346_v56  ;;  %2505 = vmatpush.msra.mxu1 %v5473_v54 }
 0xbed   :  { %2443 = vmatpush.msrb.mxu2 %v5350_v44  ;;  %2466 = vmatpush.msrb.mxu3 %v5477_v62 }
 0xbee   :  { %2483 = vmatpush.msra.mxu0 %v5354_v13  ;;  %2506 = vmatpush.msra.mxu1 %v5481_v60 }
 0xbef   :  { %2444 = vmatpush.msrb.mxu2 %v5358_v14  ;;  %2467 = vmatpush.msrb.mxu3 %v5485_v32 }
 0xbf0   :  { %2484 = vmatpush.msra.mxu0 %v5362_v59  ;;  %2507 = vmatpush.msra.mxu1 %v5489_v46 }
 0xbf1   :  { %2445 = vmatpush.msrb.mxu2 %v5366_v2  ;;  %2468 = vmatpush.msrb.mxu3 %v5493_v38 }
 0xbf2   :  { %2485 = vmatpush.msra.mxu0 %v5370_v6  ;;  %2508 = vmatpush.msra.mxu1 %v5581_v33 }
 0xbf3   :  { %2446 = vmatpush.msrb.mxu2 %v5374_v0  ;;  %2469 = vmatpush.msrb.mxu3 %v5499_v51 }
 0xbf4   :  { %2486 = vmatpush.msra.mxu0 %v5378_v20  ;;  %2509 = vmatpush.msra.mxu1 %v5587_v25 }
 0xbf5   :  { %2447 = vmatpush.msrb.mxu2 %v5382_v26  ;;  %2470 = vmatpush.msrb.mxu3 %v5505_v17 }
 0xbf6   :  { %2487 = vmatpush.msra.mxu0 %v5386_v58  ;;  %2510 = vmatpush.msra.mxu1 %v5593_v4 }
 0xbf7   :  { %2448 = vmatpush.msrb.mxu2 %v5390_v12  ;;  %2471 = vmatpush.msrb.mxu3 %v5511_v39 }
 0xbf8   :  { %2488 = vmatpush.msra.mxu0 %v5598_v7  ;;  %2511 = vmatpush.msra.mxu1 %v5601_v15 }
 0xbf9   :  { %2449 = vmatpush.msrb.mxu2 %v5396_v1  ;;  %2472 = vmatpush.msrb.mxu3 %v5517_v50 }
 0xbfa   :  { %2489 = vmatpush.msra.mxu0 %v5606_v30  ;;  %2512 = vmatpush.msra.mxu1 %v5609_v35 }
 0xbfb   :  { %2450 = vmatpush.msrb.mxu2 %v5402_v55  ;;  %2473 = vmatpush.msrb.mxu3 %v5523_v31 }
 0xbfc   :  { %2490 = vmatpush.msra.mxu0 %v5614_v10  ;;  %2513 = vmatpush.msra.mxu1 %v5617_v9 }
 0xbfd   :  { %2451 = vmatpush.msrb.mxu2 %v5408_v57  ;;  %2474 = vmatpush.msrb.mxu3 %v6565_v34 }
 0xbfe   :  { %2491 = vmatpush.msra.mxu0 %v6566_v8  ;;  %2514 = vmatpush.msra.mxu1 %v6567_v42  ;;  %v6578_v42 = vld [vmem:[#allocation46_spill] sm:$0xff] }
 0xbff   :  { %2452 = vmatpush.msrb.mxu2 %v6568_v63  ;;  %2475 = vmatpush.msrb.mxu3 %v6569_v5  ;;  %v6579_v63 = vld [vmem:[#allocation18_spill] sm:$0xff] }
 0xc00   :  { %2492 = vmatpush.msra.mxu0 %v6570_v52  ;;  %2515 = vmatpush.msra.mxu1 %v6571_v49 }
 0xc01   :  { %2453 = vmatpush.msrb.mxu2 %v6572_v18  ;;  %2476 = vmatpush.msrb.mxu3 %v6573_v29  ;;  %v6580_v29 = vld [vmem:[#allocation56_spill] sm:$0xff] }
 0xc02   :  { %2493 = vmatpush.msra.mxu0 %v6574_v28  ;;  %2516 = vmatpush.msra.mxu1 %v6575_v23  ;;  %v403_v52 = vadd.f32 %v6580_v29, %v3808_v24  ;;  %v6589_v29 = vld [vmem:[#allocation73_spill] sm:$0xff] }
 0xc03   :  { %2454 = vmatpush.msrb.mxu2 %v6576_v11 }
 0xc04   :  { %2494 = vmatpush.msra.mxu0 %v6577_v16  ;;  %v6581_v16 = vld [vmem:[#allocation55_spill] sm:$0xff] }
 0xc05   :  { %2455 = vmatpush.msrb.mxu2 %v6578_v42  ;;  %v302_v8 = vadd.f32 %v6581_v16, %v3806_v53  ;;  %v6593_v16 = vld [vmem:[#allocation74_spill] sm:$0xff] }
 0xc06   :  { %2495 = vmatpush.msra.mxu0 %v6579_v63 }
 0xc07   :  { %2456 = vmatpush.msrb.mxu2 %v6562_v36 }
 0xc08   :  { %2496 = vmatpush.msra.mxu0 %v5653_v3 }
 0xc5f   :  { %v2346_v49 = vpop.f32.mrf.mxu1 }
 0xc65   :  { %v2326_v18 = vpop.f32.mrf.mxu0  ;;  %v2306_v23 = vpop.f32.mrf.mxu3 }
 0xc66   :  { %v2347_v28 = vadd.f32 %v2346_v49, %v2326_v18  ;;  %v6587_v49 = vld [vmem:[#allocation22_spill] sm:$0xff]  ;;  %v6588_v18 = vld [vmem:[#allocation32_spill] sm:$0xff] }
 0xc68   :  { %v2350_v5 = vadd.f32 %v2347_v28, %v403_v52  ;;  %v6586_v52 = vld [vmem:[#allocation76_spill] sm:$0xff]  ;;  %v6590_v28 = vld [vmem:[#allocation23_spill] sm:$0xff] }
 0xc6a   :  { %3117 = vtanh.f32 %v2350_v5 }
 0xc6b   :  { %v2286_v11 = vpop.f32.mrf.mxu2 }
 0xc6c   :  { %v2307_v42 = vadd.f32 %v2306_v23, %v2286_v11  ;;  %v6591_v23 = vld [vmem:[#allocation26_spill] sm:$0xff] }
 0xc6d   :  { %v6592_v11 = vld [vmem:[#allocation34_spill] sm:$0xff] }
 0xc6e   :  { %v2349_v34 = vadd.f32 %v2307_v42, %v302_v8  ;;  %v6583_v8 = vld [vmem:[#allocation21_spill] sm:$0xff]  ;;  %v6584_v42 = vld [vmem:[#allocation30_spill] sm:$0xff] }
 0xc70   :  { %v3118_v63 = vpop.eup %3117  ;;  %3119 = vtanh.f32 %v2349_v34  ;;  %v6582_v34 = vld [vmem:[#allocation47_spill] sm:$0xff] }
 0xc71   :  { %2391 = vmatmul.f32.vlgmr.msra.gmra.mxu3 %v3118_v63  ;;  %2431 = vmatmul.f32.vlgmr.msrb.gmra.mxu1 %v3118_v63  ;;  %v6585_v63 = vld [vmem:[#allocation37_spill] sm:$0xff] }
 0xc72   :  { %2547 = vmatpush.msra.mxu3 %v5442_v22  ;;  %2587 = vmatpush.msrb.mxu1 %v5445_v21 }
 0xc74   :  { %2548 = vmatpush.msra.mxu3 %v5448_v40  ;;  %2588 = vmatpush.msrb.mxu1 %v5451_v19 }
 0xc76   :  { %v3120_v5 = vpop.eup %3119  ;;  %2549 = vmatpush.msra.mxu3 %v5454_v45  ;;  %2589 = vmatpush.msrb.mxu1 %v5457_v43 }
 0xc77   :  { %2371 = vmatmul.f32.vlgmr.msra.gmra.mxu2 %v3120_v5  ;;  %2411 = vmatmul.f32.vlgmr.msrb.gmra.mxu0 %v3120_v5  ;;  %v6594_v5 = vld [vmem:[#allocation27_spill] sm:$0xff] }
 0xc78   :  { %2527 = vmatpush.msra.mxu2 %v5334_v37  ;;  %2550 = vmatpush.msra.mxu3 %v5461_v41 }
 0xc79   :  { %2567 = vmatpush.msrb.mxu0 %v5338_v61  ;;  %2590 = vmatpush.msrb.mxu1 %v5465_v27 }
 0xc7a   :  { %2528 = vmatpush.msra.mxu2 %v5342_v47  ;;  %2551 = vmatpush.msra.mxu3 %v5469_v48 }
 0xc7b   :  { %2568 = vmatpush.msrb.mxu0 %v5346_v56  ;;  %2591 = vmatpush.msrb.mxu1 %v5473_v54 }
 0xc7c   :  { %2529 = vmatpush.msra.mxu2 %v5350_v44  ;;  %2552 = vmatpush.msra.mxu3 %v5477_v62 }
 0xc7d   :  { %2569 = vmatpush.msrb.mxu0 %v5354_v13  ;;  %2592 = vmatpush.msrb.mxu1 %v5481_v60 }
 0xc7e   :  { %2530 = vmatpush.msra.mxu2 %v5358_v14  ;;  %2553 = vmatpush.msra.mxu3 %v5485_v32 }
 0xc7f   :  { %2570 = vmatpush.msrb.mxu0 %v5362_v59  ;;  %2593 = vmatpush.msrb.mxu1 %v5489_v46 }
 0xc80   :  { %2531 = vmatpush.msra.mxu2 %v5366_v2  ;;  %2554 = vmatpush.msra.mxu3 %v5493_v38 }
 0xc81   :  { %2571 = vmatpush.msrb.mxu0 %v5370_v6  ;;  %2594 = vmatpush.msrb.mxu1 %v5581_v33 }
 0xc82   :  { %2532 = vmatpush.msra.mxu2 %v5374_v0  ;;  %2555 = vmatpush.msra.mxu3 %v5499_v51 }
 0xc83   :  { %2572 = vmatpush.msrb.mxu0 %v5378_v20  ;;  %2595 = vmatpush.msrb.mxu1 %v5587_v25 }
 0xc84   :  { %2533 = vmatpush.msra.mxu2 %v5382_v26  ;;  %2556 = vmatpush.msra.mxu3 %v5505_v17 }
 0xc85   :  { %2573 = vmatpush.msrb.mxu0 %v5386_v58  ;;  %2596 = vmatpush.msrb.mxu1 %v5593_v4 }
 0xc86   :  { %2534 = vmatpush.msra.mxu2 %v5390_v12  ;;  %2557 = vmatpush.msra.mxu3 %v5511_v39 }
 0xc87   :  { %2574 = vmatpush.msrb.mxu0 %v5598_v7  ;;  %2597 = vmatpush.msrb.mxu1 %v5601_v15 }
 0xc88   :  { %2535 = vmatpush.msra.mxu2 %v5396_v1  ;;  %2558 = vmatpush.msra.mxu3 %v5517_v50 }
 0xc89   :  { %2575 = vmatpush.msrb.mxu0 %v5606_v30  ;;  %2598 = vmatpush.msrb.mxu1 %v5609_v35 }
 0xc8a   :  { %2536 = vmatpush.msra.mxu2 %v5402_v55  ;;  %2559 = vmatpush.msra.mxu3 %v5523_v31 }
 0xc8b   :  { %2576 = vmatpush.msrb.mxu0 %v5614_v10  ;;  %2599 = vmatpush.msrb.mxu1 %v5617_v9 }
 0xc8c   :  { %2537 = vmatpush.msra.mxu2 %v5408_v57  ;;  %2560 = vmatpush.msra.mxu3 %v6582_v34 }
 0xc8d   :  { %2577 = vmatpush.msrb.mxu0 %v6583_v8  ;;  %2600 = vmatpush.msrb.mxu1 %v6584_v42  ;;  %v6595_v42 = vld [vmem:[#allocation46_spill] sm:$0xff] }
 0xc8e   :  { %2538 = vmatpush.msra.mxu2 %v6585_v63  ;;  %2561 = vmatpush.msra.mxu3 %v6586_v52  ;;  %v6596_v63 = vld [vmem:[#allocation18_spill] sm:$0xff] }
 0xc8f   :  { %2578 = vmatpush.msrb.mxu0 %v6587_v49  ;;  %2601 = vmatpush.msrb.mxu1 %v6588_v18 }
 0xc90   :  { %2539 = vmatpush.msra.mxu2 %v6589_v29  ;;  %2562 = vmatpush.msra.mxu3 %v6590_v28  ;;  %v6597_v28 = vld [vmem:[#allocation58_spill] sm:$0xff] }
 0xc91   :  { %2579 = vmatpush.msrb.mxu0 %v6591_v23  ;;  %2602 = vmatpush.msrb.mxu1 %v6592_v11  ;;  %v406_v49 = vadd.f32 %v6597_v28, %v3808_v24 }
 0xc92   :  { %2540 = vmatpush.msra.mxu2 %v6593_v16 }
 0xc93   :  { %2580 = vmatpush.msrb.mxu0 %v6594_v5  ;;  %v6598_v5 = vld [vmem:[#allocation57_spill] sm:$0xff] }
 0xc94   :  { %2541 = vmatpush.msra.mxu2 %v6595_v42  ;;  %v305_v8 = vadd.f32 %v6598_v5, %v3806_v53  ;;  %v6034_v5 = vld [vmem:[#allocation8 + $0x10] sm:$0xff] }
 0xc95   :  { %2581 = vmatpush.msrb.mxu0 %v6596_v63 }
 0xc96   :  { %2542 = vmatpush.msra.mxu2 %v6562_v36 }
 0xc97   :  { %2582 = vmatpush.msrb.mxu0 %v5653_v3 }
 0xcee   :  { %v2432_v18 = vpop.f32.mrf.mxu1 }
 0xcf4   :  { %v2412_v29 = vpop.f32.mrf.mxu0  ;;  %v2392_v11 = vpop.f32.mrf.mxu3 }
 0xcf5   :  { %v2433_v23 = vadd.f32 %v2432_v18, %v2412_v29  ;;  %v6615_v18 = vld [vmem:[#allocation59_spill] sm:$0xff] }
 0xcf6   :  { %v308_v29 = vadd.f32 %v6615_v18, %v3806_v53  ;;  %v3362_v18 = vld [vmem:[#allocation8 + $0x1e0] sm:$0xff] }
 0xcf7   :  { %v2436_v52 = vadd.f32 %v2433_v23, %v406_v49 }
 0xcf9   :  { %3121 = vtanh.f32 %v2436_v52 }
 0xcfa   :  { %v2372_v16 = vpop.f32.mrf.mxu2 }
 0xcfb   :  { %v2393_v42 = vadd.f32 %v2392_v11, %v2372_v16  ;;  %v5938_v16 = vld [vmem:[#allocation8 + $0xf0] sm:$0xff] }
 0xcfd   :  { %v2435_v34 = vadd.f32 %v2393_v42, %v305_v8 }
 0xcff   :  { %v3122_v63 = vpop.eup %3121  ;;  %3123 = vtanh.f32 %v2435_v34 }
 0xd00   :  { %2477 = vmatmul.f32.vlgmr.msrb.gmra.mxu3 %v3122_v63  ;;  %2517 = vmatmul.f32.vlgmr.msra.gmra.mxu1 %v3122_v63 }
 0xd01   :  { %2633 = vmatpush.msrb.mxu3 %v5442_v22  ;;  %2673 = vmatpush.msra.mxu1 %v5445_v21 }
 0xd03   :  { %2634 = vmatpush.msrb.mxu3 %v5448_v40  ;;  %2674 = vmatpush.msra.mxu1 %v5451_v19 }
 0xd05   :  { %v3124_v52 = vpop.eup %3123  ;;  %2635 = vmatpush.msrb.mxu3 %v5454_v45  ;;  %2675 = vmatpush.msra.mxu1 %v5457_v43 }
 0xd06   :  { %2457 = vmatmul.f32.vlgmr.msrb.gmra.mxu2 %v3124_v52  ;;  %2497 = vmatmul.f32.vlgmr.msra.gmra.mxu0 %v3124_v52  ;;  %v6038_v52 = vld [vmem:[#allocation8] sm:$0xff] }
 0xd07   :  { %2613 = vmatpush.msrb.mxu2 %v5334_v37  ;;  %2636 = vmatpush.msrb.mxu3 %v5461_v41  ;;  %v6599_v37 = vld [vmem:[#allocation47_spill] sm:$0xff] }
 0xd08   :  { %2653 = vmatpush.msra.mxu0 %v5338_v61  ;;  %2676 = vmatpush.msra.mxu1 %v5465_v27  ;;  %v6600_v61 = vld [vmem:[#allocation21_spill] sm:$0xff] }
 0xd09   :  { %2614 = vmatpush.msrb.mxu2 %v5342_v47  ;;  %2637 = vmatpush.msrb.mxu3 %v5469_v48  ;;  %v6601_v47 = vld [vmem:[#allocation30_spill] sm:$0xff] }
 0xd0a   :  { %2654 = vmatpush.msra.mxu0 %v5346_v56  ;;  %2677 = vmatpush.msra.mxu1 %v5473_v54  ;;  %v6602_v56 = vld [vmem:[#allocation37_spill] sm:$0xff] }
 0xd0b   :  { %2615 = vmatpush.msrb.mxu2 %v5350_v44  ;;  %2638 = vmatpush.msrb.mxu3 %v5477_v62  ;;  %v6603_v44 = vld [vmem:[#allocation76_spill] sm:$0xff] }
 0xd0c   :  { %2655 = vmatpush.msra.mxu0 %v5354_v13  ;;  %2678 = vmatpush.msra.mxu1 %v5481_v60  ;;  %v6604_v13 = vld [vmem:[#allocation22_spill] sm:$0xff] }
 0xd0d   :  { %2616 = vmatpush.msrb.mxu2 %v5358_v14  ;;  %2639 = vmatpush.msrb.mxu3 %v5485_v32  ;;  %v6605_v14 = vld [vmem:[#allocation32_spill] sm:$0xff] }
 0xd0e   :  { %2656 = vmatpush.msra.mxu0 %v5362_v59  ;;  %2679 = vmatpush.msra.mxu1 %v5489_v46  ;;  %v6606_v59 = vld [vmem:[#allocation73_spill] sm:$0xff] }
 0xd0f   :  { %2617 = vmatpush.msrb.mxu2 %v5366_v2  ;;  %2640 = vmatpush.msrb.mxu3 %v5493_v38  ;;  %v6607_v2 = vld [vmem:[#allocation23_spill] sm:$0xff] }
 0xd10   :  { %2657 = vmatpush.msra.mxu0 %v5370_v6  ;;  %2680 = vmatpush.msra.mxu1 %v5581_v33  ;;  %v6608_v6 = vld [vmem:[#allocation26_spill] sm:$0xff] }
 0xd11   :  { %2618 = vmatpush.msrb.mxu2 %v5374_v0  ;;  %2641 = vmatpush.msrb.mxu3 %v5499_v51  ;;  %v6609_v0 = vld [vmem:[#allocation34_spill] sm:$0xff] }
 0xd12   :  { %2658 = vmatpush.msra.mxu0 %v5378_v20  ;;  %2681 = vmatpush.msra.mxu1 %v5587_v25  ;;  %v6610_v20 = vld [vmem:[#allocation74_spill] sm:$0xff] }
 0xd13   :  { %2619 = vmatpush.msrb.mxu2 %v5382_v26  ;;  %2642 = vmatpush.msrb.mxu3 %v5505_v17  ;;  %v6611_v26 = vld [vmem:[#allocation27_spill] sm:$0xff] }
 0xd14   :  { %2659 = vmatpush.msra.mxu0 %v5386_v58  ;;  %2682 = vmatpush.msra.mxu1 %v5593_v4  ;;  %v6612_v58 = vld [vmem:[#allocation46_spill] sm:$0xff] }
 0xd15   :  { %2620 = vmatpush.msrb.mxu2 %v5390_v12  ;;  %2643 = vmatpush.msrb.mxu3 %v5511_v39  ;;  %v6613_v12 = vld [vmem:[#allocation18_spill] sm:$0xff] }
 0xd16   :  { %2660 = vmatpush.msra.mxu0 %v5598_v7  ;;  %2683 = vmatpush.msra.mxu1 %v5601_v15 }
 0xd17   :  { %2621 = vmatpush.msrb.mxu2 %v5396_v1  ;;  %2644 = vmatpush.msrb.mxu3 %v5517_v50 }
 0xd18   :  { %2661 = vmatpush.msra.mxu0 %v5606_v30  ;;  %2684 = vmatpush.msra.mxu1 %v5609_v35 }
 0xd19   :  { %2622 = vmatpush.msrb.mxu2 %v5402_v55  ;;  %2645 = vmatpush.msrb.mxu3 %v5523_v31 }
 0xd1a   :  { %2662 = vmatpush.msra.mxu0 %v5614_v10  ;;  %2685 = vmatpush.msra.mxu1 %v5617_v9 }
 0xd1b   :  { %2623 = vmatpush.msrb.mxu2 %v5408_v57  ;;  %2646 = vmatpush.msrb.mxu3 %v6599_v37  ;;  %v6614_v57 = vld [vmem:[#allocation60_spill] sm:$0xff] }
 0xd1c   :  { %2663 = vmatpush.msra.mxu0 %v6600_v61  ;;  %2686 = vmatpush.msra.mxu1 %v6601_v47  ;;  %v409_v34 = vadd.f32 %v6614_v57, %v3808_v24 }
 0xd1d   :  { %2624 = vmatpush.msrb.mxu2 %v6602_v56  ;;  %2647 = vmatpush.msrb.mxu3 %v6603_v44 }
 0xd1e   :  { %2664 = vmatpush.msra.mxu0 %v6604_v13  ;;  %2687 = vmatpush.msra.mxu1 %v6605_v14 }
 0xd1f   :  { %2625 = vmatpush.msrb.mxu2 %v6606_v59  ;;  %2648 = vmatpush.msrb.mxu3 %v6607_v2 }
 0xd20   :  { %2665 = vmatpush.msra.mxu0 %v6608_v6  ;;  %2688 = vmatpush.msra.mxu1 %v6609_v0 }
 0xd21   :  { %2626 = vmatpush.msrb.mxu2 %v6610_v20 }
 0xd22   :  { %2666 = vmatpush.msra.mxu0 %v6611_v26 }
 0xd23   :  { %2627 = vmatpush.msrb.mxu2 %v6612_v58 }
 0xd24   :  { %2667 = vmatpush.msra.mxu0 %v6613_v12 }
 0xd25   :  { %2628 = vmatpush.msrb.mxu2 %v6562_v36 }
 0xd26   :  { %2668 = vmatpush.msra.mxu0 %v5653_v3 }
 0xd7d   :  { %v2518_v1 = vpop.f32.mrf.mxu1 }
 0xd83   :  { %v2498_v55 = vpop.f32.mrf.mxu0  ;;  %v2478_v63 = vpop.f32.mrf.mxu3 }
 0xd84   :  { %v2519_v8 = vadd.f32 %v2518_v1, %v2498_v55  ;;  %v6617_v55 = vld [vmem:[#allocation61_spill] sm:$0xff] }
 0xd85   :  { %v311_v57 = vadd.f32 %v6617_v55, %v3806_v53  ;;  %v6621_v55 = vld [vmem:[#allocation65_spill] sm:$0xff] }
 0xd86   :  { %v2522_v42 = vadd.f32 %v2519_v8, %v409_v34 }
 0xd88   :  { %3125 = vtanh.f32 %v2522_v42 }
 0xd89   :  { %v2458_v49 = vpop.f32.mrf.mxu2 }
 0xd8a   :  { %v2479_v28 = vadd.f32 %v2478_v63, %v2458_v49  ;;  %v3360_v63 = vld [vmem:[#allocation8 + $0x1f0] sm:$0xff]  ;;  %v3361_v49 = vld [vmem:[#allocation8 + $0x1f8] sm:$0xff] }
 0xd8c   :  { %v2521_v23 = vadd.f32 %v2479_v28, %v308_v29  ;;  %v3363_v29 = vld [vmem:[#allocation8 + $0x1e8] sm:$0xff] }
 0xd8e   :  { %v3126_v11 = vpop.eup %3125  ;;  %3127 = vtanh.f32 %v2521_v23  ;;  %v3364_v23 = vld [vmem:[#allocation8 + $0x1d0] sm:$0xff] }
 0xd8f   :  { %2563 = vmatmul.f32.vlgmr.msra.gmra.mxu3 %v3126_v11  ;;  %2603 = vmatmul.f32.vlgmr.msrb.gmra.mxu1 %v3126_v11  ;;  %v3365_v11 = vld [vmem:[#allocation8 + $0x1d8] sm:$0xff] }
 0xd90   :  { %2719 = vmatpush.msra.mxu3 %v5442_v22  ;;  %2759 = vmatpush.msrb.mxu1 %v5445_v21  ;;  %v5942_v22 = vld [vmem:[#allocation8 + $0xf8] sm:$0xff]  ;;  %v5946_v21 = vld [vmem:[#allocation8 + $0xe0] sm:$0xff] }
 0xd92   :  { %2720 = vmatpush.msra.mxu3 %v5448_v40  ;;  %2760 = vmatpush.msrb.mxu1 %v5451_v19  ;;  %v5950_v40 = vld [vmem:[#allocation8 + $0xe8] sm:$0xff]  ;;  %v5954_v19 = vld [vmem:[#allocation8 + $0xd0] sm:$0xff] }
 0xd94   :  { %v3128_v36 = vpop.eup %3127  ;;  %2721 = vmatpush.msra.mxu3 %v5454_v45  ;;  %2761 = vmatpush.msrb.mxu1 %v5457_v43  ;;  %v5958_v45 = vld [vmem:[#allocation8 + $0xd8] sm:$0xff]  ;;  %v5962_v43 = vld [vmem:[#allocation8 + $0xc0] sm:$0xff] }
 0xd95   :  { %2543 = vmatmul.f32.vlgmr.msra.gmra.mxu2 %v3128_v36  ;;  %2583 = vmatmul.f32.vlgmr.msrb.gmra.mxu0 %v3128_v36  ;;  %v3366_v36 = vld [vmem:[#allocation8 + $0x1c0] sm:$0xff] }
 0xd96   :  { %2699 = vmatpush.msra.mxu2 %v5938_v16  ;;  %2722 = vmatpush.msra.mxu3 %v5461_v41  ;;  %v5966_v41 = vld [vmem:[#allocation8 + $0xc8] sm:$0xff] }
 0xd97   :  { %2739 = vmatpush.msrb.mxu0 %v5942_v22  ;;  %2762 = vmatpush.msrb.mxu1 %v5465_v27  ;;  %v5970_v27 = vld [vmem:[#allocation8 + $0xb0] sm:$0xff] }
 0xd98   :  { %2700 = vmatpush.msra.mxu2 %v5946_v21  ;;  %2723 = vmatpush.msra.mxu3 %v5469_v48  ;;  %v5974_v48 = vld [vmem:[#allocation8 + $0xb8] sm:$0xff] }
 0xd99   :  { %2740 = vmatpush.msrb.mxu0 %v5950_v40  ;;  %2763 = vmatpush.msrb.mxu1 %v5473_v54  ;;  %v5978_v54 = vld [vmem:[#allocation8 + $0xa0] sm:$0xff] }
 0xd9a   :  { %2701 = vmatpush.msra.mxu2 %v5954_v19  ;;  %2724 = vmatpush.msra.mxu3 %v5477_v62  ;;  %v5982_v62 = vld [vmem:[#allocation8 + $0xa8] sm:$0xff] }
 0xd9b   :  { %2741 = vmatpush.msrb.mxu0 %v5958_v45  ;;  %2764 = vmatpush.msrb.mxu1 %v5481_v60  ;;  %v5986_v60 = vld [vmem:[#allocation8 + $0x90] sm:$0xff] }
 0xd9c   :  { %2702 = vmatpush.msra.mxu2 %v5962_v43  ;;  %2725 = vmatpush.msra.mxu3 %v5485_v32  ;;  %v5990_v32 = vld [vmem:[#allocation8 + $0x98] sm:$0xff] }
 0xd9d   :  { %2742 = vmatpush.msrb.mxu0 %v5966_v41  ;;  %2765 = vmatpush.msrb.mxu1 %v5489_v46  ;;  %v5994_v46 = vld [vmem:[#allocation8 + $0x80] sm:$0xff] }
 0xd9e   :  { %2703 = vmatpush.msra.mxu2 %v5970_v27  ;;  %2726 = vmatpush.msra.mxu3 %v5493_v38  ;;  %v6000_v38 = vld [vmem:[#allocation8 + $0x70] sm:$0xff] }
 0xd9f   :  { %2743 = vmatpush.msrb.mxu0 %v5974_v48  ;;  %2766 = vmatpush.msrb.mxu1 %v5581_v33 }
 0xda0   :  { %2704 = vmatpush.msra.mxu2 %v5978_v54  ;;  %2727 = vmatpush.msra.mxu3 %v5499_v51  ;;  %v6006_v51 = vld [vmem:[#allocation8 + $0x60] sm:$0xff] }
 0xda1   :  { %2744 = vmatpush.msrb.mxu0 %v5982_v62  ;;  %2767 = vmatpush.msrb.mxu1 %v5587_v25 }
 0xda2   :  { %2705 = vmatpush.msra.mxu2 %v5986_v60  ;;  %2728 = vmatpush.msra.mxu3 %v5505_v17  ;;  %v6012_v17 = vld [vmem:[#allocation8 + $0x50] sm:$0xff] }
 0xda3   :  { %2745 = vmatpush.msrb.mxu0 %v5990_v32  ;;  %2768 = vmatpush.msrb.mxu1 %v5593_v4 }
 0xda4   :  { %2706 = vmatpush.msra.mxu2 %v5994_v46  ;;  %2729 = vmatpush.msra.mxu3 %v5511_v39  ;;  %v6018_v39 = vld [vmem:[#allocation8 + $0x40] sm:$0xff] }
 0xda5   :  { %2746 = vmatpush.msrb.mxu0 %v5598_v7  ;;  %2769 = vmatpush.msrb.mxu1 %v5601_v15 }
 0xda6   :  { %2707 = vmatpush.msra.mxu2 %v6000_v38  ;;  %2730 = vmatpush.msra.mxu3 %v5517_v50  ;;  %v6024_v50 = vld [vmem:[#allocation8 + $0x30] sm:$0xff] }
 0xda7   :  { %2747 = vmatpush.msrb.mxu0 %v5606_v30  ;;  %2770 = vmatpush.msrb.mxu1 %v5609_v35 }
 0xda8   :  { %2708 = vmatpush.msra.mxu2 %v6006_v51  ;;  %2731 = vmatpush.msra.mxu3 %v5523_v31  ;;  %v6030_v31 = vld [vmem:[#allocation8 + $0x20] sm:$0xff] }
 0xda9   :  { %2748 = vmatpush.msrb.mxu0 %v5614_v10  ;;  %2771 = vmatpush.msrb.mxu1 %v5617_v9 }
 0xdaa   :  { %2709 = vmatpush.msra.mxu2 %v6012_v17  ;;  %2732 = vmatpush.msra.mxu3 %v6599_v37 }
 0xdab   :  { %2749 = vmatpush.msrb.mxu0 %v6600_v61  ;;  %2772 = vmatpush.msrb.mxu1 %v6601_v47 }
 0xdac   :  { %2710 = vmatpush.msra.mxu2 %v6018_v39  ;;  %2733 = vmatpush.msra.mxu3 %v6603_v44  ;;  %v6616_v44 = vld [vmem:[#allocation62_spill] sm:$0xff] }
 0xdad   :  { %2750 = vmatpush.msrb.mxu0 %v6604_v13  ;;  %2773 = vmatpush.msrb.mxu1 %v6605_v14  ;;  %v412_v59 = vadd.f32 %v6616_v44, %v3808_v24  ;;  %v3369_v44 = vld [vmem:[#allocation8 + $0x1b8] sm:$0xff] }
 0xdae   :  { %2711 = vmatpush.msra.mxu2 %v6024_v50  ;;  %2734 = vmatpush.msra.mxu3 %v6607_v2 }
 0xdaf   :  { %2751 = vmatpush.msrb.mxu0 %v6608_v6  ;;  %2774 = vmatpush.msrb.mxu1 %v6609_v0 }
 0xdb0   :  { %2712 = vmatpush.msra.mxu2 %v6030_v31 }
 0xdb1   :  { %2752 = vmatpush.msrb.mxu0 %v6611_v26 }
 0xdb2   :  { %2713 = vmatpush.msra.mxu2 %v6034_v5 }
 0xdb3   :  { %2753 = vmatpush.msrb.mxu0 %v6613_v12 }
 0xdb4   :  { %2714 = vmatpush.msra.mxu2 %v6038_v52 }
 0xdb5   :  { %2754 = vmatpush.msrb.mxu0 %v5653_v3 }
 0xe0c   :  { %v2604_v37 = vpop.f32.mrf.mxu1 }
 0xe12   :  { %v2584_v56 = vpop.f32.mrf.mxu0  ;;  %v2564_v58 = vpop.f32.mrf.mxu3 }
 0xe13   :  { %v2605_v2 = vadd.f32 %v2604_v37, %v2584_v56  ;;  %v3367_v37 = vld [vmem:[#allocation8 + $0x1c8] sm:$0xff]  ;;  %v3368_v56 = vld [vmem:[#allocation8 + $0x1b0] sm:$0xff] }
 0xe15   :  { %v2608_v20 = vadd.f32 %v2605_v2, %v412_v59  ;;  %v3370_v59 = vld [vmem:[#allocation8 + $0x1a0] sm:$0xff] }
 0xe17   :  { %3129 = vtanh.f32 %v2608_v20 }
 0xe18   :  { %v2544_v1 = vpop.f32.mrf.mxu2 }
 0xe19   :  { %v2565_v34 = vadd.f32 %v2564_v58, %v2544_v1 }
 0xe1b   :  { %v2607_v8 = vadd.f32 %v2565_v34, %v311_v57  ;;  %v317_v57 = vadd.f32 %v6621_v55, %v3806_v53 }
 0xe1d   :  { %v3130_v42 = vpop.eup %3129  ;;  %3131 = vtanh.f32 %v2607_v8 }
 0xe1e   :  { %2649 = vmatmul.f32.vlgmr.msrb.gmra.mxu3 %v3130_v42  ;;  %2689 = vmatmul.f32.vlgmr.msra.gmra.mxu1 %v3130_v42 }
 0xe1f   :  { %2805 = vmatpush.msrb.mxu3 %v3360_v63  ;;  %2845 = vmatpush.msra.mxu1 %v3361_v49  ;;  %v2880_v49 = vld [vmem:[#allocation9 + $0x58] sm:$0xff] }
 0xe21   :  { %2806 = vmatpush.msrb.mxu3 %v3362_v18  ;;  %2846 = vmatpush.msra.mxu1 %v3363_v29  ;;  %v2893_v18 = vld [vmem:[#allocation9 + $0xc0] sm:$0xff]  ;;  %v2879_v29 = vld [vmem:[#allocation9 + $0x50] sm:$0xff] }
 0xe23   :  { %v3132_v28 = vpop.eup %3131  ;;  %2807 = vmatpush.msrb.mxu3 %v3364_v23  ;;  %2847 = vmatpush.msra.mxu1 %v3365_v11  ;;  %v2878_v23 = vld [vmem:[#allocation9 + $0x48] sm:$0xff]  ;;  %v2891_v11 = vld [vmem:[#allocation9 + $0xb0] sm:$0xff] }
 0xe24   :  { %2629 = vmatmul.f32.vlgmr.msrb.gmra.mxu2 %v3132_v28  ;;  %2669 = vmatmul.f32.vlgmr.msra.gmra.mxu0 %v3132_v28  ;;  %v2892_v28 = vld [vmem:[#allocation9 + $0xb8] sm:$0xff] }
 0xe25   :  { %2785 = vmatpush.msrb.mxu2 %v5938_v16  ;;  %2808 = vmatpush.msrb.mxu3 %v3366_v36  ;;  %v3371_v16 = vld [vmem:[#allocation8 + $0x1a8] sm:$0xff]  ;;  %v2877_v36 = vld [vmem:[#allocation9 + $0x40] sm:$0xff] }
 0xe26   :  { %2825 = vmatpush.msra.mxu0 %v5942_v22  ;;  %2848 = vmatpush.msra.mxu1 %v3367_v37  ;;  %v3372_v22 = vld [vmem:[#allocation8 + $0x190] sm:$0xff]  ;;  %v2890_v37 = vld [vmem:[#allocation9 + $0xa8] sm:$0xff] }
 0xe27   :  { %2786 = vmatpush.msrb.mxu2 %v5946_v21  ;;  %2809 = vmatpush.msrb.mxu3 %v3368_v56  ;;  %v3373_v21 = vld [vmem:[#allocation8 + $0x198] sm:$0xff] }
 0xe28   :  { %2826 = vmatpush.msra.mxu0 %v5950_v40  ;;  %2849 = vmatpush.msra.mxu1 %v3369_v44  ;;  %v3374_v40 = vld [vmem:[#allocation8 + $0x180] sm:$0xff]  ;;  %v2876_v56 = vld [vmem:[#allocation9 + $0x38] sm:$0xff] }
 0xe29   :  { %2787 = vmatpush.msrb.mxu2 %v5954_v19  ;;  %2810 = vmatpush.msrb.mxu3 %v3370_v59  ;;  %v3375_v19 = vld [vmem:[#allocation8 + $0x170] sm:$0xff]  ;;  %v2889_v44 = vld [vmem:[#allocation9 + $0xa0] sm:$0xff] }
 0xe2a   :  { %2827 = vmatpush.msra.mxu0 %v5958_v45  ;;  %2850 = vmatpush.msra.mxu1 %v3371_v16  ;;  %v3376_v45 = vld [vmem:[#allocation8 + $0x160] sm:$0xff]  ;;  %v2875_v59 = vld [vmem:[#allocation9 + $0x30] sm:$0xff]  ;;  %v2888_v16 = vld [vmem:[#allocation9 + $0x98] sm:$0xff] }
 0xe2b   :  { %2788 = vmatpush.msrb.mxu2 %v5962_v43  ;;  %2811 = vmatpush.msrb.mxu3 %v3372_v22  ;;  %v3377_v43 = vld [vmem:[#allocation8 + $0x150] sm:$0xff]  ;;  %v2874_v22 = vld [vmem:[#allocation9 + $0x28] sm:$0xff] }
 0xe2c   :  { %2828 = vmatpush.msra.mxu0 %v5966_v41  ;;  %2851 = vmatpush.msra.mxu1 %v3373_v21  ;;  %v2887_v21 = vld [vmem:[#allocation9 + $0x90] sm:$0xff] }
 0xe2d   :  { %2789 = vmatpush.msrb.mxu2 %v5970_v27  ;;  %2812 = vmatpush.msrb.mxu3 %v3374_v40  ;;  %v2900_v27 = vld [vmem:[#allocation9 + $0xf8] sm:$0xff]  ;;  %v2873_v40 = vld [vmem:[#allocation9 + $0x20] sm:$0xff] }
 0xe2e   :  { %2829 = vmatpush.msra.mxu0 %v5974_v48  ;;  %2852 = vmatpush.msra.mxu1 %v5581_v33  ;;  %v3378_v33 = vld [vmem:[#allocation8 + $0x140] sm:$0xff]  ;;  %v2899_v48 = vld [vmem:[#allocation9 + $0xf0] sm:$0xff] }
 0xe2f   :  { %2790 = vmatpush.msrb.mxu2 %v5978_v54  ;;  %2813 = vmatpush.msrb.mxu3 %v3375_v19  ;;  %v2884_v54 = vld [vmem:[#allocation9 + $0x78] sm:$0xff]  ;;  %v2886_v19 = vld [vmem:[#allocation9 + $0x88] sm:$0xff] }
 0xe30   :  { %2830 = vmatpush.msra.mxu0 %v5982_v62  ;;  %2853 = vmatpush.msra.mxu1 %v5587_v25  ;;  %v3379_v25 = vld [vmem:[#allocation8 + $0x130] sm:$0xff] }
 0xe31   :  { %2791 = vmatpush.msrb.mxu2 %v5986_v60  ;;  %2814 = vmatpush.msrb.mxu3 %v3376_v45  ;;  %v2883_v62 = vld [vmem:[#allocation9 + $0x70] sm:$0xff]  ;;  %v2898_v60 = vld [vmem:[#allocation9 + $0xe8] sm:$0xff]  ;;  %v2872_v45 = vld [vmem:[#allocation9 + $0x18] sm:$0xff] }
 0xe32   :  { %2831 = vmatpush.msra.mxu0 %v5990_v32  ;;  %2854 = vmatpush.msra.mxu1 %v5593_v4  ;;  %v3380_v4 = vld [vmem:[#allocation8 + $0x120] sm:$0xff]  ;;  %v2882_v32 = vld [vmem:[#allocation9 + $0x68] sm:$0xff] }
 0xe33   :  { %2792 = vmatpush.msrb.mxu2 %v5994_v46  ;;  %2815 = vmatpush.msrb.mxu3 %v3377_v43  ;;  %v2897_v46 = vld [vmem:[#allocation9 + $0xe0] sm:$0xff] }
 0xe34   :  { %2832 = vmatpush.msra.mxu0 %v5598_v7  ;;  %2855 = vmatpush.msra.mxu1 %v5601_v15  ;;  %v3381_v7 = vld [vmem:[#allocation8 + $0x110] sm:$0xff]  ;;  %v3382_v15 = vld [vmem:[#allocation8 + $0x100] sm:$0xff] }
 0xe35   :  { %2793 = vmatpush.msrb.mxu2 %v6000_v38  ;;  %2816 = vmatpush.msrb.mxu3 %v3378_v33  ;;  %v2881_v38 = vld [vmem:[#allocation9 + $0x60] sm:$0xff]  ;;  %v2871_v33 = vld [vmem:[#allocation9 + $0x10] sm:$0xff] }
 0xe36   :  { %2833 = vmatpush.msra.mxu0 %v5606_v30  ;;  %2856 = vmatpush.msra.mxu1 %v5609_v35  ;;  %v2885_v43 = vld [vmem:[#allocation9 + $0x80] sm:$0xff] }
 0xe37   :  { %2794 = vmatpush.msrb.mxu2 %v6006_v51  ;;  %2817 = vmatpush.msrb.mxu3 %v3379_v25  ;;  %v2896_v51 = vld [vmem:[#allocation9 + $0xd8] sm:$0xff]  ;;  %v2870_v25 = vld [vmem:[#allocation9 + $0x8] sm:$0xff] }
 0xe38   :  { %2834 = vmatpush.msra.mxu0 %v5614_v10  ;;  %2857 = vmatpush.msra.mxu1 %v5617_v9  ;;  %v6618_v10 = vld [vmem:[#allocation64_spill] sm:$0xff] }
 0xe39   :  { %2795 = vmatpush.msrb.mxu2 %v6012_v17  ;;  %2818 = vmatpush.msrb.mxu3 %v3380_v4  ;;  %v415_v9 = vadd.f32 %v6618_v10, %v3808_v24  ;;  %v2895_v17 = vld [vmem:[#allocation9 + $0xd0] sm:$0xff]  ;;  %v2869_v4 = vld [vmem:[#allocation9] sm:$0xff] }
 0xe3a   :  { %2835 = vmatpush.msra.mxu0 %v6600_v61  ;;  %2858 = vmatpush.msra.mxu1 %v6601_v47 }
 0xe3b   :  { %2796 = vmatpush.msrb.mxu2 %v6018_v39  ;;  %2819 = vmatpush.msrb.mxu3 %v3381_v7  ;;  %v2894_v39 = vld [vmem:[#allocation9 + $0xc8] sm:$0xff] }
 0xe3c   :  { %2836 = vmatpush.msra.mxu0 %v6604_v13  ;;  %2859 = vmatpush.msra.mxu1 %v6605_v14 }
 0xe3d   :  { %2797 = vmatpush.msrb.mxu2 %v6024_v50  ;;  %2820 = vmatpush.msrb.mxu3 %v3382_v15 }
 0xe3e   :  { %2837 = vmatpush.msra.mxu0 %v6608_v6  ;;  %2860 = vmatpush.msra.mxu1 %v6609_v0  ;;  %v6619_v6 = vld [vmem:[#allocation63_spill] sm:$0xff] }
 0xe3f   :  { %2798 = vmatpush.msrb.mxu2 %v6030_v31  ;;  %v314_v0 = vadd.f32 %v6619_v6, %v3806_v53 }
 0xe40   :  { %2838 = vmatpush.msra.mxu0 %v6611_v26 }
 0xe41   :  { %2799 = vmatpush.msrb.mxu2 %v6034_v5  ;;  %v6620_v5 = vld [vmem:[#allocation66_spill] sm:$0xff] }
 0xe42   :  { %2839 = vmatpush.msra.mxu0 %v6613_v12 }
 0xe43   :  { %2800 = vmatpush.msrb.mxu2 %v6038_v52  ;;  %v418_v52 = vadd.f32 %v6620_v5, %v3808_v24 }
 0xe44   :  { %2840 = vmatpush.msra.mxu0 %v5653_v3 }
 0xe9b   :  { %v2690_v30 = vpop.f32.mrf.mxu1 }
 0xea1   :  { %v2670_v35 = vpop.f32.mrf.mxu0  ;;  %v2650_v13 = vpop.f32.mrf.mxu3 }
 0xea2   :  { %v2691_v61 = vadd.f32 %v2690_v30, %v2670_v35  ;;  %v6622_v30 = vld [vmem:[#allocation68_spill] sm:$0xff] }
 0xea3   :  { %v421_v35 = vadd.f32 %v6622_v30, %v3808_v24 }
 0xea4   :  { %v2694_v47 = vadd.f32 %v2691_v61, %v415_v9 }
 0xea6   :  { %3133 = vtanh.f32 %v2694_v47 }
 0xea7   :  { %v2630_v14 = vpop.f32.mrf.mxu2 }
 0xea8   :  { %v2651_v26 = vadd.f32 %v2650_v13, %v2630_v14  ;;  %v6623_v13 = vld [vmem:[#allocation67_spill] sm:$0xff] }
 0xea9   :  { %v320_v14 = vadd.f32 %v6623_v13, %v3806_v53 }
 0xeaa   :  { %v2693_v41 = vadd.f32 %v2651_v26, %v314_v0 }
 0xeac   :  { %v3134_v12 = vpop.eup %3133  ;;  %3135 = vtanh.f32 %v2693_v41 }
 0xead   :  { %2735 = vmatmul.f32.vlgmr.msra.gmra.mxu3 %v3134_v12  ;;  %2775 = vmatmul.f32.vlgmr.msrb.gmra.mxu1 %v3134_v12  ;;  %v3032_v12 = vld [vmem:[%s6110_s5] ss:$0 sm:$0xff] }
 0xeae   :  { %2925 = vmatpush.msra.mxu3 %v2900_v27 }
 0xeb0   :  { %2926 = vmatpush.msra.mxu3 %v2899_v48 }
 0xeb2   :  { %v3136_v3 = vpop.eup %3135  ;;  %2927 = vmatpush.msra.mxu3 %v2898_v60 }
 0xeb3   :  { %2715 = vmatmul.f32.vlgmr.msra.gmra.mxu2 %v3136_v3  ;;  %2755 = vmatmul.f32.vlgmr.msrb.gmra.mxu0 %v3136_v3 }
 0xeb4   :  { %2905 = vmatpush.msra.mxu2 %v2884_v54  ;;  %2928 = vmatpush.msra.mxu3 %v2897_v46 }
 0xeb6   :  { %2906 = vmatpush.msra.mxu2 %v2883_v62  ;;  %2929 = vmatpush.msra.mxu3 %v2896_v51 }
 0xeb8   :  { %2907 = vmatpush.msra.mxu2 %v2882_v32  ;;  %2930 = vmatpush.msra.mxu3 %v2895_v17 }
 0xeba   :  { %2908 = vmatpush.msra.mxu2 %v2881_v38  ;;  %2931 = vmatpush.msra.mxu3 %v2894_v39 }
 0xebc   :  { %2909 = vmatpush.msra.mxu2 %v2880_v49  ;;  %2932 = vmatpush.msra.mxu3 %v2893_v18 }
 0xebe   :  { %2910 = vmatpush.msra.mxu2 %v2879_v29  ;;  %2933 = vmatpush.msra.mxu3 %v2892_v28 }
 0xec0   :  { %2911 = vmatpush.msra.mxu2 %v2878_v23  ;;  %2934 = vmatpush.msra.mxu3 %v2891_v11 }
 0xec2   :  { %2912 = vmatpush.msra.mxu2 %v2877_v36  ;;  %2935 = vmatpush.msra.mxu3 %v2890_v37 }
 0xec4   :  { %2913 = vmatpush.msra.mxu2 %v2876_v56  ;;  %2936 = vmatpush.msra.mxu3 %v2889_v44 }
 0xec6   :  { %2914 = vmatpush.msra.mxu2 %v2875_v59  ;;  %2937 = vmatpush.msra.mxu3 %v2888_v16 }
 0xec8   :  { %2915 = vmatpush.msra.mxu2 %v2874_v22  ;;  %2938 = vmatpush.msra.mxu3 %v2887_v21 }
 0xeca   :  { %2916 = vmatpush.msra.mxu2 %v2873_v40  ;;  %2939 = vmatpush.msra.mxu3 %v2886_v19 }
 0xecc   :  { %2917 = vmatpush.msra.mxu2 %v2872_v45  ;;  %2940 = vmatpush.msra.mxu3 %v2885_v43 }
 0xece   :  { %2918 = vmatpush.msra.mxu2 %v2871_v33 }
 0xed0   :  { %2919 = vmatpush.msra.mxu2 %v2870_v25 }
 0xed2   :  { %2920 = vmatpush.msra.mxu2 %v2869_v4 }
 0xf2a   :  { %v2776_v50 = vpop.f32.mrf.mxu1 }
 0xf30   :  { %v2756_v31 = vpop.f32.mrf.mxu0  ;;  %v2736_v58 = vpop.f32.mrf.mxu3 }
 0xf31   :  { %v2777_v2 = vadd.f32 %v2776_v50, %v2756_v31 }
 0xf33   :  { %v2780_v20 = vadd.f32 %v2777_v2, %v418_v52 }
 0xf35   :  { %3137 = vtanh.f32 %v2780_v20 }
 0xf36   :  { %v2716_v1 = vpop.f32.mrf.mxu2 }
 0xf37   :  { %v2737_v34 = vadd.f32 %v2736_v58, %v2716_v1 }
 0xf39   :  { %v2779_v8 = vadd.f32 %v2737_v34, %v317_v57 }
 0xf3b   :  { %v3138_v42 = vpop.eup %3137  ;;  %3139 = vtanh.f32 %v2779_v8 }
 0xf3c   :  { %2821 = vmatmul.f32.vlgmr.msrb.gmra.mxu3 %v3138_v42  ;;  %2861 = vmatmul.f32.vlgmr.msra.gmra.mxu1 %v3138_v42 }
 0xf41   :  { %v3140_v63 = vpop.eup %3139 }
 0xf42   :  { %2801 = vmatmul.f32.vlgmr.msrb.gmra.mxu2 %v3140_v63  ;;  %2841 = vmatmul.f32.vlgmr.msra.gmra.mxu0 %v3140_v63 }
 0xfb9   :  { %v2862_v7 = vpop.f32.mrf.mxu1 }
 0xfbf   :  { %v2842_v15 = vpop.f32.mrf.mxu0  ;;  %v2822_v61 = vpop.f32.mrf.mxu3 }
 0xfc0   :  { %v2863_v10 = vadd.f32 %v2862_v7, %v2842_v15 }
 0xfc2   :  { %v2866_v9 = vadd.f32 %v2863_v10, %v421_v35 }
 0xfc4   :  { %3141 = vtanh.f32 %v2866_v9 }
 0xfc5   :  { %v2802_v47 = vpop.f32.mrf.mxu2 }
 0xfc6   :  { %v2823_v6 = vadd.f32 %v2822_v61, %v2802_v47 }
 0xfc8   :  { %v2865_v0 = vadd.f32 %v2823_v6, %v320_v14 }
 0xfca   :  { %v3142_v26 = vpop.eup %3141  ;;  %3143 = vtanh.f32 %v2865_v0 }
 0xfcb   :  { %2941 = vmatmul.f32.vlgmr.msra.gmra.mxu3 %v3142_v26 }
 0xfd0   :  { %v3144_v41 = vpop.eup %3143 }
 0xfd1   :  { %2921 = vmatmul.f32.vlgmr.msra.gmra.mxu2 %v3144_v41 }
0x104e   :  { %v2942_v53 = vpop.f32.mrf.mxu3 }
0x1054   :  { %v2922_v24 = vpop.f32.mrf.mxu2 }
0x1055   :  { %v2923_v3 = vadd.f32 %v3032_v12, %v2922_v24 }
0x1057   :  { %v2943_v27 = vadd.f32 %v2942_v53, %v2923_v3 }
0x1059   :  { %2945 = vst [vmem:[#allocation11] sm:$0xff] %v2943_v27 }
0x105a   :  { %2956 = dma.vmem_to_hbm [thread:$0]  %s2952_s21, 128, %s2954_s24, [#allocation5]  }
0x105b   :  { %3509 = dma.done.wait [#allocation5], 128  }
0x105c   :  { %3510 = vsyncadd [#allocation5], 4294967168 }
0x105d   :  { %2961 = vsyncpa [#allocation4], 1 }
0x105e   :  { %2962 = vsyncpa [#allocation7], 1 }
0x105f   :  { %2963 = vsyncpa [#allocation10], 1 }
0x1060   :  { %2964 = vsyncpa [#allocation5], 1 }

</bundles_post_ra>
